<compile_context>
chip_gen: v6e
topology: v6e:2x2x1
jax: 0.10.0
libtpu: 0.0.40
codegen_flags: <defaults>
</compile_context>

<pallas_src>
import jax
import jax.numpy as jnp
from jax.experimental import pallas as pl
from jax.experimental.pallas import tpu as pltpu

# ---- problem sizes (small, TPU friendly) ----
B = 2                 # batch
N = 64                # sequence length (tokens)
DIM = 128             # embedding dim (multiple of 128 -> lane dense)
NUM_HEADS = 4
HEAD_DIM = DIM // NUM_HEADS
MLP_RATIO = 4.0
HIDDEN = int(DIM * MLP_RATIO)
MLP_CHUNK = 256       # hidden-dim chunk width for the fc1/GELU/fc2 pipeline
EPS = 1e-5
SCALE = HEAD_DIM ** -0.5      # qk_scale default = head_dim ** -0.5

_SQRT_2_OVER_PI = 0.7978845608028654


def _gelu_tanh(x):
    # tanh-approximate GELU (EUP tanh, not an erf VPU polynomial).
    return 0.5 * x * (1.0 + jnp.tanh(_SQRT_2_OVER_PI * (x + 0.044715 * x * x * x)))


def _gelu_exact(x):
    # nn.GELU default (exact, erf-based) -- used only by the f32 reference.
    return 0.5 * x * (1.0 + jax.lax.erf(x * 0.7071067811865476))


def _layernorm(x, gamma, beta):
    mu = jnp.mean(x, axis=-1, keepdims=True)
    xc = x - mu
    var = jnp.mean(xc * xc, axis=-1, keepdims=True)
    return xc * jax.lax.rsqrt(var + EPS) * gamma + beta


def block_kernel(x_ref, g1_ref, b1_ref, wqkv_ref, wproj_ref, bproj_ref,
                 g2_ref, b2_ref, wf1_ref, bf1_ref, wf2_ref, bf2_ref, o_ref):
    n, c = N, DIM
    bf16 = jnp.bfloat16

    x = x_ref[0]                                   # (N, C) f32, one batch row

    # --- norm1: LayerNorm over channels (f32) ---
    xn = _layernorm(x, g1_ref[...], b1_ref[...])

    # --- attention: qkv (no bias) -> per-head softmax -> proj (bias) ---
    # f32 MXU accumulation, stored bf16 and consumed immediately.
    qkv = jnp.dot(xn.astype(bf16), wqkv_ref[...],
                  preferred_element_type=jnp.float32).astype(bf16)   # (N, 3C)

    # Heads are static 32-lane slices of qkv -> no reshape/transpose relayout.
    sa_heads = []
    for h in range(NUM_HEADS):
        lo = h * HEAD_DIM
        q_h = qkv[:, lo:lo + HEAD_DIM]                         # (N, 32) bf16
        k_h = qkv[:, c + lo:c + lo + HEAD_DIM]                 # (N, 32) bf16
        v_h = qkv[:, 2 * c + lo:2 * c + lo + HEAD_DIM]         # (N, 32) bf16

        s = jax.lax.dot_general(q_h, k_h, (((1,), (1,)), ((), ())),
                                preferred_element_type=jnp.float32) * SCALE
        s = s - jnp.max(s, axis=-1, keepdims=True)
        p = jnp.exp(s)                                         # f32 softmax
        p = p * pl.reciprocal(jnp.sum(p, axis=-1, keepdims=True), approx=True)

        sa_heads.append(jnp.dot(p.astype(bf16), v_h,
                                preferred_element_type=jnp.float32).astype(bf16))

    sa = jnp.concatenate(sa_heads, axis=-1)                    # (N, C) bf16

    proj = jnp.dot(sa, wproj_ref[...],
                   preferred_element_type=jnp.float32) + bproj_ref[...]
    x1 = x + proj                                              # residual: raw x

    # --- norm2 + MLP (fc1 -> GELU -> fc2) + second residual ---
    x1n_b = _layernorm(x1, g2_ref[...], b2_ref[...]).astype(bf16)

    mlp = jnp.zeros((n, c), jnp.float32)
    for c0 in range(0, HIDDEN, MLP_CHUNK):                     # chunked hidden dim
        h1 = jnp.dot(x1n_b, wf1_ref[:, c0:c0 + MLP_CHUNK],
                     preferred_element_type=jnp.float32) + bf1_ref[:, c0:c0 + MLP_CHUNK]
        h1 = _gelu_tanh(h1)
        mlp = mlp + jnp.dot(h1.astype(bf16), wf2_ref[c0:c0 + MLP_CHUNK, :],
                            preferred_element_type=jnp.float32)
    mlp = mlp + bf2_ref[...]

    o_ref[0] = x1 + mlp


def _rep(shape):
    nd = len(shape)
    return pl.BlockSpec(shape, lambda b, _nd=nd: (0,) * _nd)


@jax.jit
def transformer_block_pallas(x, p):
    x = x.astype(jnp.float32)

    in_specs = [
        pl.BlockSpec((1, N, DIM), lambda b: (b, 0, 0)),   # x (one batch row/step)
        _rep((1, DIM)), _rep((1, DIM)),                   # ln1 gamma / beta
        _rep((DIM, 3 * DIM)),                             # W_qkv   (bf16)
        _rep((DIM, DIM)), _rep((1, DIM)),                 # W_proj / b_proj
        _rep((1, DIM)), _rep((1, DIM)),                   # ln2 gamma / beta
        _rep((DIM, HIDDEN)), _rep((1, HIDDEN)),           # fc1 W / b
        _rep((HIDDEN, DIM)), _rep((1, DIM)),              # fc2 W / b
    ]
    out_specs = pl.BlockSpec((1, N, DIM), lambda b: (b, 0, 0))

    return pl.pallas_call(
        block_kernel,
        out_shape=jax.ShapeDtypeStruct((B, N, DIM), jnp.float32),
        grid=(B,),
        in_specs=in_specs,
        out_specs=out_specs,
        compiler_params=pltpu.CompilerParams(dimension_semantics=("parallel",)),
    )(x, p["g1"], p["b1"], p["wqkv"], p["wproj"], p["bproj"],
      p["g2"], p["b2"], p["wf1"], p["bf1"], p["wf2"], p["bf2"])


def prepare_params(p):
    """Cast matmul weights to bf16 ONCE (outside the jitted call path)."""
    q = dict(p)
    for k in ("wqkv", "wproj", "wf1", "wf2"):
        q[k] = p[k].astype(jnp.bfloat16)
    return q


# ----------------- plain-JAX f32 reference (sanity check) -----------------
def transformer_block_reference(x, p):
    x = x.astype(jnp.float32)
    xn = _layernorm(x, p["g1"], p["b1"])
    qkv = xn @ p["wqkv"]
    q, k, v = qkv[..., :DIM], qkv[..., DIM:2 * DIM], qkv[..., 2 * DIM:]

    def heads(t):
        return t.reshape(B, N, NUM_HEADS, HEAD_DIM).transpose(0, 2, 1, 3)

    qh, kh, vh = heads(q), heads(k), heads(v)
    att = jnp.einsum("bhqd,bhkd->bhqk", qh, kh) * SCALE
    att = jax.nn.softmax(att, axis=-1)
    sa = (jnp.einsum("bhqk,bhkd->bhqd", att, vh)
             .transpose(0, 2, 1, 3).reshape(B, N, DIM))
    x1 = x + (sa @ p["wproj"] + p["bproj"])
    x1n = _layernorm(x1, p["g2"], p["b2"])
    h1 = _gelu_exact(x1n @ p["wf1"] + p["bf1"])
    return x1 + (h1 @ p["wf2"] + p["bf2"])


def init_params(key):
    ks = jax.random.split(key, 11)
    f32 = jnp.float32

    def rnd(i, shape, scale=0.05):
        return (scale * jax.random.normal(ks[i], shape)).astype(f32)

    return dict(
        g1=1.0 + rnd(0, (1, DIM)), b1=rnd(1, (1, DIM)),
        wqkv=rnd(2, (DIM, 3 * DIM)),                       # qkv_bias=False
        wproj=rnd(3, (DIM, DIM)), bproj=rnd(4, (1, DIM)),
        g2=1.0 + rnd(5, (1, DIM)), b2=rnd(6, (1, DIM)),
        wf1=rnd(7, (DIM, HIDDEN)), bf1=rnd(8, (1, HIDDEN)),
        wf2=rnd(9, (HIDDEN, DIM)), bf2=rnd(10, (1, DIM)),
    )


if __name__ == "__main__":
    key = jax.random.PRNGKey(0)
    pkey, xkey = jax.random.split(key)
    params = init_params(pkey)
    params_dev = prepare_params(params)          # bf16 weights, cast once
    x = jax.random.normal(xkey, (B, N, DIM), dtype=jnp.float32)   # (B, N, C)

    out = jax.block_until_ready(transformer_block_pallas(x, params_dev))
    ref = transformer_block_reference(x, params)

    assert out.shape == (B, N, DIM)
    assert bool(jnp.all(jnp.isfinite(out)))
    # Tolerance contract: bf16 MXU operands, approx reciprocal in softmax and
    # tanh-approx GELU are deliberate precision trades vs. the f32/erf ref.
    max_err = float(jnp.max(jnp.abs(out - ref)))
    assert max_err < 5e-2, f"kernel/reference mismatch: max abs err {max_err}"
    print("KERNEL_OK")
</pallas_src>

<mosaic_0001>
module attributes {stable_mosaic.version = 11 : i64} {
  func.func @block_kernel(%arg0: i32, %arg1: memref<1x64x128xf32, #tpu.memory_space<vmem>>, %arg2: memref<1x128xf32, #tpu.memory_space<vmem>>, %arg3: memref<1x128xf32, #tpu.memory_space<vmem>>, %arg4: memref<128x384xbf16, #tpu.memory_space<vmem>>, %arg5: memref<128x128xbf16, #tpu.memory_space<vmem>>, %arg6: memref<1x128xf32, #tpu.memory_space<vmem>>, %arg7: memref<1x128xf32, #tpu.memory_space<vmem>>, %arg8: memref<1x128xf32, #tpu.memory_space<vmem>>, %arg9: memref<128x512xbf16, #tpu.memory_space<vmem>>, %arg10: memref<1x512xf32, #tpu.memory_space<vmem>>, %arg11: memref<512x128xbf16, #tpu.memory_space<vmem>>, %arg12: memref<1x128xf32, #tpu.memory_space<vmem>>, %arg13: memref<1x64x128xf32, #tpu.memory_space<vmem>>) attributes {dimension_semantics = [#tpu.dimension_semantics<parallel>], iteration_bounds = array<i64: 2>, scalar_prefetch = 0 : i64, scratch_operands = 0 : i64, tpu.core_type = #tpu.core_type<tc>, window_params = [{transform_indices = @transform_0, window_bounds = array<i64: 1, 64, 128>}, {pipeline_mode = #tpu.pipeline_mode<synchronous>, transform_indices = @transform_1, window_bounds = array<i64: 1, 128>}, {pipeline_mode = #tpu.pipeline_mode<synchronous>, transform_indices = @transform_2, window_bounds = array<i64: 1, 128>}, {pipeline_mode = #tpu.pipeline_mode<synchronous>, transform_indices = @transform_3, window_bounds = array<i64: 128, 384>}, {pipeline_mode = #tpu.pipeline_mode<synchronous>, transform_indices = @transform_4, window_bounds = array<i64: 128, 128>}, {pipeline_mode = #tpu.pipeline_mode<synchronous>, transform_indices = @transform_5, window_bounds = array<i64: 1, 128>}, {pipeline_mode = #tpu.pipeline_mode<synchronous>, transform_indices = @transform_6, window_bounds = array<i64: 1, 128>}, {pipeline_mode = #tpu.pipeline_mode<synchronous>, transform_indices = @transform_7, window_bounds = array<i64: 1, 128>}, {pipeline_mode = #tpu.pipeline_mode<synchronous>, transform_indices = @transform_8, window_bounds = array<i64: 128, 512>}, {pipeline_mode = #tpu.pipeline_mode<synchronous>, transform_indices = @transform_9, window_bounds = array<i64: 1, 512>}, {pipeline_mode = #tpu.pipeline_mode<synchronous>, transform_indices = @transform_10, window_bounds = array<i64: 512, 128>}, {pipeline_mode = #tpu.pipeline_mode<synchronous>, transform_indices = @transform_11, window_bounds = array<i64: 1, 128>}, {transform_indices = @transform_12, window_bounds = array<i64: 1, 64, 128>}]} {
    %c0 = arith.constant 0 : index
    %c0_0 = arith.constant 0 : index
    %c0_1 = arith.constant 0 : index
    %0 = vector.load %arg1[%c0, %c0_0, %c0_1] : memref<1x64x128xf32, #tpu.memory_space<vmem>>, vector<1x64x128xf32>
    %1 = vector.shape_cast %0 : vector<1x64x128xf32> to vector<64x128xf32>
    %c0_2 = arith.constant 0 : index
    %c0_3 = arith.constant 0 : index
    %2 = vector.load %arg2[%c0_2, %c0_3] : memref<1x128xf32, #tpu.memory_space<vmem>>, vector<1x128xf32>
    %c0_4 = arith.constant 0 : index
    %c0_5 = arith.constant 0 : index
    %3 = vector.load %arg3[%c0_4, %c0_5] : memref<1x128xf32, #tpu.memory_space<vmem>>, vector<1x128xf32>
    %cst = arith.constant dense<0.000000e+00> : vector<64xf32>
    %4 = vector.multi_reduction <add>, %1, %cst [1] : vector<64x128xf32> to vector<64xf32>
    %5 = vector.shape_cast %4 : vector<64xf32> to vector<64x1xf32>
    %cst_6 = arith.constant 1.280000e+02 : f32
    %6 = vector.broadcast %cst_6 : f32 to vector<64x1xf32>
    %7 = arith.divf %5, %6 : vector<64x1xf32>
    %8 = vector.broadcast %7 : vector<64x1xf32> to vector<64x128xf32>
    %9 = arith.subf %1, %8 : vector<64x128xf32>
    %10 = arith.mulf %9, %9 : vector<64x128xf32>
    %cst_7 = arith.constant dense<0.000000e+00> : vector<64xf32>
    %11 = vector.multi_reduction <add>, %10, %cst_7 [1] : vector<64x128xf32> to vector<64xf32>
    %12 = vector.shape_cast %11 : vector<64xf32> to vector<64x1xf32>
    %cst_8 = arith.constant 1.280000e+02 : f32
    %13 = vector.broadcast %cst_8 : f32 to vector<64x1xf32>
    %14 = arith.divf %12, %13 : vector<64x1xf32>
    %cst_9 = arith.constant 9.99999974E-6 : f32
    %15 = vector.broadcast %cst_9 : f32 to vector<64x1xf32>
    %16 = arith.addf %14, %15 : vector<64x1xf32>
    %17 = math.rsqrt %16 : vector<64x1xf32>
    %18 = vector.broadcast %17 : vector<64x1xf32> to vector<64x128xf32>
    %19 = arith.mulf %9, %18 : vector<64x128xf32>
    %20 = vector.broadcast %2 : vector<1x128xf32> to vector<64x128xf32>
    %21 = arith.mulf %19, %20 : vector<64x128xf32>
    %22 = vector.broadcast %3 : vector<1x128xf32> to vector<64x128xf32>
    %23 = arith.addf %21, %22 : vector<64x128xf32>
    %24 = arith.truncf %23 : vector<64x128xf32> to vector<64x128xbf16>
    %c0_10 = arith.constant 0 : index
    %c0_11 = arith.constant 0 : index
    %25 = vector.load %arg4[%c0_10, %c0_11] : memref<128x384xbf16, #tpu.memory_space<vmem>>, vector<128x384xbf16>
    %cst_12 = arith.constant dense<0.000000e+00> : vector<64x384xf32>
    %26 = tpu.matmul %24, %25, %cst_12 {dimension_numbers = #tpu.dot_dimension_numbers<[1], [0], [0], [1], [0, 0, 1, 1], [], []>} : vector<64x128xbf16>, vector<128x384xbf16>, vector<64x384xf32> -> vector<64x384xf32>
    %27 = arith.truncf %26 : vector<64x384xf32> to vector<64x384xbf16>
    %28 = vector.extract_strided_slice %27 {offsets = [0, 0], sizes = [64, 32], strides = [1, 1]} : vector<64x384xbf16> to vector<64x32xbf16>
    %29 = vector.extract_strided_slice %27 {offsets = [0, 128], sizes = [64, 32], strides = [1, 1]} : vector<64x384xbf16> to vector<64x32xbf16>
    %30 = vector.extract_strided_slice %27 {offsets = [0, 256], sizes = [64, 32], strides = [1, 1]} : vector<64x384xbf16> to vector<64x32xbf16>
    %cst_13 = arith.constant dense<0.000000e+00> : vector<64x64xf32>
    %31 = tpu.matmul %28, %29, %cst_13 {dimension_numbers = #tpu.dot_dimension_numbers<[1], [1], [0], [0], [0, 0, 1, 0], [], []>} : vector<64x32xbf16>, vector<64x32xbf16>, vector<64x64xf32> -> vector<64x64xf32>
    %cst_14 = arith.constant 0.176776692 : f32
    %32 = vector.broadcast %cst_14 : f32 to vector<64x64xf32>
    %33 = arith.mulf %31, %32 : vector<64x64xf32>
    %cst_15 = arith.constant dense<0xFF800000> : vector<64xf32>
    %34 = vector.multi_reduction <maximumf>, %33, %cst_15 [1] : vector<64x64xf32> to vector<64xf32>
    %35 = vector.shape_cast %34 : vector<64xf32> to vector<64x1xf32>
    %36 = vector.broadcast %35 : vector<64x1xf32> to vector<64x64xf32>
    %37 = arith.subf %33, %36 : vector<64x64xf32>
    %38 = math.exp %37 : vector<64x64xf32>
    %cst_16 = arith.constant dense<0.000000e+00> : vector<64xf32>
    %39 = vector.multi_reduction <add>, %38, %cst_16 [1] : vector<64x64xf32> to vector<64xf32>
    %40 = vector.shape_cast %39 : vector<64xf32> to vector<64x1xf32>
    %41 = tpu.reciprocal %40 {approx = true} : vector<64x1xf32> -> vector<64x1xf32>
    %42 = vector.broadcast %41 : vector<64x1xf32> to vector<64x64xf32>
    %43 = arith.mulf %38, %42 : vector<64x64xf32>
    %44 = arith.truncf %43 : vector<64x64xf32> to vector<64x64xbf16>
    %cst_17 = arith.constant dense<0.000000e+00> : vector<64x32xf32>
    %45 = tpu.matmul %44, %30, %cst_17 {dimension_numbers = #tpu.dot_dimension_numbers<[1], [0], [0], [1], [0, 0, 1, 1], [], []>} : vector<64x64xbf16>, vector<64x32xbf16>, vector<64x32xf32> -> vector<64x32xf32>
    %46 = arith.truncf %45 : vector<64x32xf32> to vector<64x32xbf16>
    %47 = vector.extract_strided_slice %27 {offsets = [0, 32], sizes = [64, 32], strides = [1, 1]} : vector<64x384xbf16> to vector<64x32xbf16>
    %48 = vector.extract_strided_slice %27 {offsets = [0, 160], sizes = [64, 32], strides = [1, 1]} : vector<64x384xbf16> to vector<64x32xbf16>
    %49 = vector.extract_strided_slice %27 {offsets = [0, 288], sizes = [64, 32], strides = [1, 1]} : vector<64x384xbf16> to vector<64x32xbf16>
    %cst_18 = arith.constant dense<0.000000e+00> : vector<64x64xf32>
    %50 = tpu.matmul %47, %48, %cst_18 {dimension_numbers = #tpu.dot_dimension_numbers<[1], [1], [0], [0], [0, 0, 1, 0], [], []>} : vector<64x32xbf16>, vector<64x32xbf16>, vector<64x64xf32> -> vector<64x64xf32>
    %cst_19 = arith.constant 0.176776692 : f32
    %51 = vector.broadcast %cst_19 : f32 to vector<64x64xf32>
    %52 = arith.mulf %50, %51 : vector<64x64xf32>
    %cst_20 = arith.constant dense<0xFF800000> : vector<64xf32>
    %53 = vector.multi_reduction <maximumf>, %52, %cst_20 [1] : vector<64x64xf32> to vector<64xf32>
    %54 = vector.shape_cast %53 : vector<64xf32> to vector<64x1xf32>
    %55 = vector.broadcast %54 : vector<64x1xf32> to vector<64x64xf32>
    %56 = arith.subf %52, %55 : vector<64x64xf32>
    %57 = math.exp %56 : vector<64x64xf32>
    %cst_21 = arith.constant dense<0.000000e+00> : vector<64xf32>
    %58 = vector.multi_reduction <add>, %57, %cst_21 [1] : vector<64x64xf32> to vector<64xf32>
    %59 = vector.shape_cast %58 : vector<64xf32> to vector<64x1xf32>
    %60 = tpu.reciprocal %59 {approx = true} : vector<64x1xf32> -> vector<64x1xf32>
    %61 = vector.broadcast %60 : vector<64x1xf32> to vector<64x64xf32>
    %62 = arith.mulf %57, %61 : vector<64x64xf32>
    %63 = arith.truncf %62 : vector<64x64xf32> to vector<64x64xbf16>
    %cst_22 = arith.constant dense<0.000000e+00> : vector<64x32xf32>
    %64 = tpu.matmul %63, %49, %cst_22 {dimension_numbers = #tpu.dot_dimension_numbers<[1], [0], [0], [1], [0, 0, 1, 1], [], []>} : vector<64x64xbf16>, vector<64x32xbf16>, vector<64x32xf32> -> vector<64x32xf32>
    %65 = arith.truncf %64 : vector<64x32xf32> to vector<64x32xbf16>
    %66 = vector.extract_strided_slice %27 {offsets = [0, 64], sizes = [64, 32], strides = [1, 1]} : vector<64x384xbf16> to vector<64x32xbf16>
    %67 = vector.extract_strided_slice %27 {offsets = [0, 192], sizes = [64, 32], strides = [1, 1]} : vector<64x384xbf16> to vector<64x32xbf16>
    %68 = vector.extract_strided_slice %27 {offsets = [0, 320], sizes = [64, 32], strides = [1, 1]} : vector<64x384xbf16> to vector<64x32xbf16>
    %cst_23 = arith.constant dense<0.000000e+00> : vector<64x64xf32>
    %69 = tpu.matmul %66, %67, %cst_23 {dimension_numbers = #tpu.dot_dimension_numbers<[1], [1], [0], [0], [0, 0, 1, 0], [], []>} : vector<64x32xbf16>, vector<64x32xbf16>, vector<64x64xf32> -> vector<64x64xf32>
    %cst_24 = arith.constant 0.176776692 : f32
    %70 = vector.broadcast %cst_24 : f32 to vector<64x64xf32>
    %71 = arith.mulf %69, %70 : vector<64x64xf32>
    %cst_25 = arith.constant dense<0xFF800000> : vector<64xf32>
    %72 = vector.multi_reduction <maximumf>, %71, %cst_25 [1] : vector<64x64xf32> to vector<64xf32>
    %73 = vector.shape_cast %72 : vector<64xf32> to vector<64x1xf32>
    %74 = vector.broadcast %73 : vector<64x1xf32> to vector<64x64xf32>
    %75 = arith.subf %71, %74 : vector<64x64xf32>
    %76 = math.exp %75 : vector<64x64xf32>
    %cst_26 = arith.constant dense<0.000000e+00> : vector<64xf32>
    %77 = vector.multi_reduction <add>, %76, %cst_26 [1] : vector<64x64xf32> to vector<64xf32>
    %78 = vector.shape_cast %77 : vector<64xf32> to vector<64x1xf32>
    %79 = tpu.reciprocal %78 {approx = true} : vector<64x1xf32> -> vector<64x1xf32>
    %80 = vector.broadcast %79 : vector<64x1xf32> to vector<64x64xf32>
    %81 = arith.mulf %76, %80 : vector<64x64xf32>
    %82 = arith.truncf %81 : vector<64x64xf32> to vector<64x64xbf16>
    %cst_27 = arith.constant dense<0.000000e+00> : vector<64x32xf32>
    %83 = tpu.matmul %82, %68, %cst_27 {dimension_numbers = #tpu.dot_dimension_numbers<[1], [0], [0], [1], [0, 0, 1, 1], [], []>} : vector<64x64xbf16>, vector<64x32xbf16>, vector<64x32xf32> -> vector<64x32xf32>
    %84 = arith.truncf %83 : vector<64x32xf32> to vector<64x32xbf16>
    %85 = vector.extract_strided_slice %27 {offsets = [0, 96], sizes = [64, 32], strides = [1, 1]} : vector<64x384xbf16> to vector<64x32xbf16>
    %86 = vector.extract_strided_slice %27 {offsets = [0, 224], sizes = [64, 32], strides = [1, 1]} : vector<64x384xbf16> to vector<64x32xbf16>
    %87 = vector.extract_strided_slice %27 {offsets = [0, 352], sizes = [64, 32], strides = [1, 1]} : vector<64x384xbf16> to vector<64x32xbf16>
    %cst_28 = arith.constant dense<0.000000e+00> : vector<64x64xf32>
    %88 = tpu.matmul %85, %86, %cst_28 {dimension_numbers = #tpu.dot_dimension_numbers<[1], [1], [0], [0], [0, 0, 1, 0], [], []>} : vector<64x32xbf16>, vector<64x32xbf16>, vector<64x64xf32> -> vector<64x64xf32>
    %cst_29 = arith.constant 0.176776692 : f32
    %89 = vector.broadcast %cst_29 : f32 to vector<64x64xf32>
    %90 = arith.mulf %88, %89 : vector<64x64xf32>
    %cst_30 = arith.constant dense<0xFF800000> : vector<64xf32>
    %91 = vector.multi_reduction <maximumf>, %90, %cst_30 [1] : vector<64x64xf32> to vector<64xf32>
    %92 = vector.shape_cast %91 : vector<64xf32> to vector<64x1xf32>
    %93 = vector.broadcast %92 : vector<64x1xf32> to vector<64x64xf32>
    %94 = arith.subf %90, %93 : vector<64x64xf32>
    %95 = math.exp %94 : vector<64x64xf32>
    %cst_31 = arith.constant dense<0.000000e+00> : vector<64xf32>
    %96 = vector.multi_reduction <add>, %95, %cst_31 [1] : vector<64x64xf32> to vector<64xf32>
    %97 = vector.shape_cast %96 : vector<64xf32> to vector<64x1xf32>
    %98 = tpu.reciprocal %97 {approx = true} : vector<64x1xf32> -> vector<64x1xf32>
    %99 = vector.broadcast %98 : vector<64x1xf32> to vector<64x64xf32>
    %100 = arith.mulf %95, %99 : vector<64x64xf32>
    %101 = arith.truncf %100 : vector<64x64xf32> to vector<64x64xbf16>
    %cst_32 = arith.constant dense<0.000000e+00> : vector<64x32xf32>
    %102 = tpu.matmul %101, %87, %cst_32 {dimension_numbers = #tpu.dot_dimension_numbers<[1], [0], [0], [1], [0, 0, 1, 1], [], []>} : vector<64x64xbf16>, vector<64x32xbf16>, vector<64x32xf32> -> vector<64x32xf32>
    %103 = arith.truncf %102 : vector<64x32xf32> to vector<64x32xbf16>
    %104 = tpu.concatenate %46, %65, %84, %103 in 1 : vector<64x32xbf16>, vector<64x32xbf16>, vector<64x32xbf16>, vector<64x32xbf16> -> vector<64x128xbf16>
    %c0_33 = arith.constant 0 : index
    %c0_34 = arith.constant 0 : index
    %105 = vector.load %arg5[%c0_33, %c0_34] : memref<128x128xbf16, #tpu.memory_space<vmem>>, vector<128x128xbf16>
    %cst_35 = arith.constant dense<0.000000e+00> : vector<64x128xf32>
    %106 = tpu.matmul %104, %105, %cst_35 {dimension_numbers = #tpu.dot_dimension_numbers<[1], [0], [0], [1], [0, 0, 1, 1], [], []>} : vector<64x128xbf16>, vector<128x128xbf16>, vector<64x128xf32> -> vector<64x128xf32>
    %c0_36 = arith.constant 0 : index
    %c0_37 = arith.constant 0 : index
    %107 = vector.load %arg6[%c0_36, %c0_37] : memref<1x128xf32, #tpu.memory_space<vmem>>, vector<1x128xf32>
    %108 = vector.broadcast %107 : vector<1x128xf32> to vector<64x128xf32>
    %109 = arith.addf %106, %108 : vector<64x128xf32>
    %110 = arith.addf %1, %109 : vector<64x128xf32>
    %c0_38 = arith.constant 0 : index
    %c0_39 = arith.constant 0 : index
    %111 = vector.load %arg7[%c0_38, %c0_39] : memref<1x128xf32, #tpu.memory_space<vmem>>, vector<1x128xf32>
    %c0_40 = arith.constant 0 : index
    %c0_41 = arith.constant 0 : index
    %112 = vector.load %arg8[%c0_40, %c0_41] : memref<1x128xf32, #tpu.memory_space<vmem>>, vector<1x128xf32>
    %cst_42 = arith.constant dense<0.000000e+00> : vector<64xf32>
    %113 = vector.multi_reduction <add>, %110, %cst_42 [1] : vector<64x128xf32> to vector<64xf32>
    %114 = vector.shape_cast %113 : vector<64xf32> to vector<64x1xf32>
    %cst_43 = arith.constant 1.280000e+02 : f32
    %115 = vector.broadcast %cst_43 : f32 to vector<64x1xf32>
    %116 = arith.divf %114, %115 : vector<64x1xf32>
    %117 = vector.broadcast %116 : vector<64x1xf32> to vector<64x128xf32>
    %118 = arith.subf %110, %117 : vector<64x128xf32>
    %119 = arith.mulf %118, %118 : vector<64x128xf32>
    %cst_44 = arith.constant dense<0.000000e+00> : vector<64xf32>
    %120 = vector.multi_reduction <add>, %119, %cst_44 [1] : vector<64x128xf32> to vector<64xf32>
    %121 = vector.shape_cast %120 : vector<64xf32> to vector<64x1xf32>
    %cst_45 = arith.constant 1.280000e+02 : f32
    %122 = vector.broadcast %cst_45 : f32 to vector<64x1xf32>
    %123 = arith.divf %121, %122 : vector<64x1xf32>
    %cst_46 = arith.constant 9.99999974E-6 : f32
    %124 = vector.broadcast %cst_46 : f32 to vector<64x1xf32>
    %125 = arith.addf %123, %124 : vector<64x1xf32>
    %126 = math.rsqrt %125 : vector<64x1xf32>
    %127 = vector.broadcast %126 : vector<64x1xf32> to vector<64x128xf32>
    %128 = arith.mulf %118, %127 : vector<64x128xf32>
    %129 = vector.broadcast %111 : vector<1x128xf32> to vector<64x128xf32>
    %130 = arith.mulf %128, %129 : vector<64x128xf32>
    %131 = vector.broadcast %112 : vector<1x128xf32> to vector<64x128xf32>
    %132 = arith.addf %130, %131 : vector<64x128xf32>
    %133 = arith.truncf %132 : vector<64x128xf32> to vector<64x128xbf16>
    %cst_47 = arith.constant 0.000000e+00 : f32
    %134 = vector.broadcast %cst_47 : f32 to vector<64x128xf32>
    %c0_48 = arith.constant 0 : index
    %c0_49 = arith.constant 0 : index
    %135 = vector.load %arg9[%c0_48, %c0_49] : memref<128x512xbf16, #tpu.memory_space<vmem>>, vector<128x256xbf16>
    %cst_50 = arith.constant dense<0.000000e+00> : vector<64x256xf32>
    %136 = tpu.matmul %133, %135, %cst_50 {dimension_numbers = #tpu.dot_dimension_numbers<[1], [0], [0], [1], [0, 0, 1, 1], [], []>} : vector<64x128xbf16>, vector<128x256xbf16>, vector<64x256xf32> -> vector<64x256xf32>
    %c0_51 = arith.constant 0 : index
    %c0_52 = arith.constant 0 : index
    %137 = vector.load %arg10[%c0_51, %c0_52] : memref<1x512xf32, #tpu.memory_space<vmem>>, vector<1x256xf32>
    %138 = vector.broadcast %137 : vector<1x256xf32> to vector<64x256xf32>
    %139 = arith.addf %136, %138 : vector<64x256xf32>
    %cst_53 = arith.constant 5.000000e-01 : f32
    %140 = vector.broadcast %cst_53 : f32 to vector<64x256xf32>
    %141 = arith.mulf %140, %139 : vector<64x256xf32>
    %cst_54 = arith.constant 4.471500e-02 : f32
    %142 = vector.broadcast %cst_54 : f32 to vector<64x256xf32>
    %143 = arith.mulf %142, %139 : vector<64x256xf32>
    %144 = arith.mulf %143, %139 : vector<64x256xf32>
    %145 = arith.mulf %144, %139 : vector<64x256xf32>
    %146 = arith.addf %139, %145 : vector<64x256xf32>
    %cst_55 = arith.constant 0.797884583 : f32
    %147 = vector.broadcast %cst_55 : f32 to vector<64x256xf32>
    %148 = arith.mulf %147, %146 : vector<64x256xf32>
    %149 = math.tanh %148 : vector<64x256xf32>
    %cst_56 = arith.constant 1.000000e+00 : f32
    %150 = vector.broadcast %cst_56 : f32 to vector<64x256xf32>
    %151 = arith.addf %150, %149 : vector<64x256xf32>
    %152 = arith.mulf %141, %151 : vector<64x256xf32>
    %153 = arith.truncf %152 : vector<64x256xf32> to vector<64x256xbf16>
    %c0_57 = arith.constant 0 : index
    %c0_58 = arith.constant 0 : index
    %154 = vector.load %arg11[%c0_57, %c0_58] : memref<512x128xbf16, #tpu.memory_space<vmem>>, vector<256x128xbf16>
    %cst_59 = arith.constant dense<0.000000e+00> : vector<64x128xf32>
    %155 = tpu.matmul %153, %154, %cst_59 {dimension_numbers = #tpu.dot_dimension_numbers<[1], [0], [0], [1], [0, 0, 1, 1], [], []>} : vector<64x256xbf16>, vector<256x128xbf16>, vector<64x128xf32> -> vector<64x128xf32>
    %156 = arith.addf %134, %155 : vector<64x128xf32>
    %c0_60 = arith.constant 0 : index
    %c256 = arith.constant 256 : index
    %157 = vector.load %arg9[%c0_60, %c256] : memref<128x512xbf16, #tpu.memory_space<vmem>>, vector<128x256xbf16>
    %cst_61 = arith.constant dense<0.000000e+00> : vector<64x256xf32>
    %158 = tpu.matmul %133, %157, %cst_61 {dimension_numbers = #tpu.dot_dimension_numbers<[1], [0], [0], [1], [0, 0, 1, 1], [], []>} : vector<64x128xbf16>, vector<128x256xbf16>, vector<64x256xf32> -> vector<64x256xf32>
    %c0_62 = arith.constant 0 : index
    %c256_63 = arith.constant 256 : index
    %159 = vector.load %arg10[%c0_62, %c256_63] : memref<1x512xf32, #tpu.memory_space<vmem>>, vector<1x256xf32>
    %160 = vector.broadcast %159 : vector<1x256xf32> to vector<64x256xf32>
    %161 = arith.addf %158, %160 : vector<64x256xf32>
    %cst_64 = arith.constant 5.000000e-01 : f32
    %162 = vector.broadcast %cst_64 : f32 to vector<64x256xf32>
    %163 = arith.mulf %162, %161 : vector<64x256xf32>
    %cst_65 = arith.constant 4.471500e-02 : f32
    %164 = vector.broadcast %cst_65 : f32 to vector<64x256xf32>
    %165 = arith.mulf %164, %161 : vector<64x256xf32>
    %166 = arith.mulf %165, %161 : vector<64x256xf32>
    %167 = arith.mulf %166, %161 : vector<64x256xf32>
    %168 = arith.addf %161, %167 : vector<64x256xf32>
    %cst_66 = arith.constant 0.797884583 : f32
    %169 = vector.broadcast %cst_66 : f32 to vector<64x256xf32>
    %170 = arith.mulf %169, %168 : vector<64x256xf32>
    %171 = math.tanh %170 : vector<64x256xf32>
    %cst_67 = arith.constant 1.000000e+00 : f32
    %172 = vector.broadcast %cst_67 : f32 to vector<64x256xf32>
    %173 = arith.addf %172, %171 : vector<64x256xf32>
    %174 = arith.mulf %163, %173 : vector<64x256xf32>
    %175 = arith.truncf %174 : vector<64x256xf32> to vector<64x256xbf16>
    %c256_68 = arith.constant 256 : index
    %c0_69 = arith.constant 0 : index
    %176 = vector.load %arg11[%c256_68, %c0_69] : memref<512x128xbf16, #tpu.memory_space<vmem>>, vector<256x128xbf16>
    %cst_70 = arith.constant dense<0.000000e+00> : vector<64x128xf32>
    %177 = tpu.matmul %175, %176, %cst_70 {dimension_numbers = #tpu.dot_dimension_numbers<[1], [0], [0], [1], [0, 0, 1, 1], [], []>} : vector<64x256xbf16>, vector<256x128xbf16>, vector<64x128xf32> -> vector<64x128xf32>
    %178 = arith.addf %156, %177 : vector<64x128xf32>
    %c0_71 = arith.constant 0 : index
    %c0_72 = arith.constant 0 : index
    %179 = vector.load %arg12[%c0_71, %c0_72] : memref<1x128xf32, #tpu.memory_space<vmem>>, vector<1x128xf32>
    %180 = vector.broadcast %179 : vector<1x128xf32> to vector<64x128xf32>
    %181 = arith.addf %178, %180 : vector<64x128xf32>
    %182 = arith.addf %110, %181 : vector<64x128xf32>
    %c0_73 = arith.constant 0 : index
    %c0_74 = arith.constant 0 : index
    %c0_75 = arith.constant 0 : index
    %183 = vector.load %arg13[%c0_73, %c0_74, %c0_75] : memref<1x64x128xf32, #tpu.memory_space<vmem>>, vector<1x64x128xf32>
    %184 = vector.shape_cast %183 : vector<1x64x128xf32> to vector<64x128xf32>
    %185 = vector.shape_cast %182 : vector<64x128xf32> to vector<1x64x128xf32>
    tpu.vector_store %arg13[%c0_73, %c0_74, %c0_75], %185 {strides = array<i32>} : memref<1x64x128xf32, #tpu.memory_space<vmem>>, vector<1x64x128xf32>,
    return
  }
  func.func @transform_0(%arg0: i32) -> (i32, i32, i32) {
    %c0_i32 = arith.constant 0 : i32
    %c0_i32_0 = arith.constant 0 : i32
    %c0_i32_1 = arith.constant 0 : i32
    return %arg0, %c0_i32, %c0_i32_0 : i32, i32, i32
  }
  func.func @transform_1(%arg0: i32) -> (i32, i32) {
    %c0_i32 = arith.constant 0 : i32
    %c0_i32_0 = arith.constant 0 : i32
    %c0_i32_1 = arith.constant 0 : i32
    return %c0_i32, %c0_i32_0 : i32, i32
  }
  func.func @transform_2(%arg0: i32) -> (i32, i32) {
    %c0_i32 = arith.constant 0 : i32
    %c0_i32_0 = arith.constant 0 : i32
    %c0_i32_1 = arith.constant 0 : i32
    return %c0_i32, %c0_i32_0 : i32, i32
  }
  func.func @transform_3(%arg0: i32) -> (i32, i32) {
    %c0_i32 = arith.constant 0 : i32
    %c0_i32_0 = arith.constant 0 : i32
    %c0_i32_1 = arith.constant 0 : i32
    return %c0_i32, %c0_i32_0 : i32, i32
  }
  func.func @transform_4(%arg0: i32) -> (i32, i32) {
    %c0_i32 = arith.constant 0 : i32
    %c0_i32_0 = arith.constant 0 : i32
    %c0_i32_1 = arith.constant 0 : i32
    return %c0_i32, %c0_i32_0 : i32, i32
  }
  func.func @transform_5(%arg0: i32) -> (i32, i32) {
    %c0_i32 = arith.constant 0 : i32
    %c0_i32_0 = arith.constant 0 : i32
    %c0_i32_1 = arith.constant 0 : i32
    return %c0_i32, %c0_i32_0 : i32, i32
  }
  func.func @transform_6(%arg0: i32) -> (i32, i32) {
    %c0_i32 = arith.constant 0 : i32
    %c0_i32_0 = arith.constant 0 : i32
    %c0_i32_1 = arith.constant 0 : i32
    return %c0_i32, %c0_i32_0 : i32, i32
  }
  func.func @transform_7(%arg0: i32) -> (i32, i32) {
    %c0_i32 = arith.constant 0 : i32
    %c0_i32_0 = arith.constant 0 : i32
    %c0_i32_1 = arith.constant 0 : i32
    return %c0_i32, %c0_i32_0 : i32, i32
  }
  func.func @transform_8(%arg0: i32) -> (i32, i32) {
    %c0_i32 = arith.constant 0 : i32
    %c0_i32_0 = arith.constant 0 : i32
    %c0_i32_1 = arith.constant 0 : i32
    return %c0_i32, %c0_i32_0 : i32, i32
  }
  func.func @transform_9(%arg0: i32) -> (i32, i32) {
    %c0_i32 = arith.constant 0 : i32
    %c0_i32_0 = arith.constant 0 : i32
    %c0_i32_1 = arith.constant 0 : i32
    return %c0_i32, %c0_i32_0 : i32, i32
  }
  func.func @transform_10(%arg0: i32) -> (i32, i32) {
    %c0_i32 = arith.constant 0 : i32
    %c0_i32_0 = arith.constant 0 : i32
    %c0_i32_1 = arith.constant 0 : i32
    return %c0_i32, %c0_i32_0 : i32, i32
  }
  func.func @transform_11(%arg0: i32) -> (i32, i32) {
    %c0_i32 = arith.constant 0 : i32
    %c0_i32_0 = arith.constant 0 : i32
    %c0_i32_1 = arith.constant 0 : i32
    return %c0_i32, %c0_i32_0 : i32, i32
  }
  func.func @transform_12(%arg0: i32) -> (i32, i32, i32) {
    %c0_i32 = arith.constant 0 : i32
    %c0_i32_0 = arith.constant 0 : i32
    %c0_i32_1 = arith.constant 0 : i32
    return %arg0, %c0_i32, %c0_i32_0 : i32, i32, i32
  }
}

</mosaic_0001>

<bundles_post_ra>
// kernel: transformer_block_pallas.1
= control target key start
LH: loop header
LB: loop body
LE: loop exit
PB: predicated region body
PF: predicated region fallthrough
CT: control target
= control target key end

     0   :  { %s6472_s0 = inlined_call_operand.hbm [shape: f32[2,64,128], index: 0, kind: input, shape index: {}]   ;;  %s6473_s1 = inlined_call_operand.vmem [shape: f32[1,128], index: 1, kind: input, shape index: {}]   ;;  %s6474_s2 = inlined_call_operand.hbm [shape: f32[1,128], index: 2, kind: input, shape index: {}]   ;;  %s6475_s3 = inlined_call_operand.hbm [shape: bf16[128,384], index: 3, kind: input, shape index: {}]   ;;  %s6476_s4 = inlined_call_operand.hbm [shape: bf16[128,128], index: 4, kind: input, shape index: {}]   ;;  %s6477_s5 = inlined_call_operand.vmem [shape: f32[1,128], index: 5, kind: input, shape index: {}]   ;;  %s6478_s6 = inlined_call_operand.vmem [shape: f32[1,128], index: 6, kind: input, shape index: {}]   ;;  %s6479_s7 = inlined_call_operand.hbm [shape: f32[1,128], index: 7, kind: input, shape index: {}]   ;;  %s6480_s8 = inlined_call_operand.hbm [shape: bf16[128,512], index: 8, kind: input, shape index: {}]   ;;  %s6481_s9 = inlined_call_operand.vmem [shape: f32[1,512], index: 9, kind: input, shape index: {}]   ;;  %s6482_s10 = inlined_call_operand.hbm [shape: bf16[512,128], index: 10, kind: input, shape index: {}]   ;;  %s6483_s11 = inlined_call_operand.hbm [shape: f32[1,128], index: 11, kind: input, shape index: {}]   ;;  %s6484_s12 = inlined_call_operand.hbm [shape: f32[2,64,128], index: 12, kind: output, shape index: {}]  }
   0x1   :  { %6509 = sst [smem:[#allocation42_spill]] %s6474_s2 }
   0x2   :  { %6510 = sst [smem:[#allocation43_spill]] %s6475_s3 }
   0x3   :  { %6511 = sst [smem:[#allocation44_spill]] %s6476_s4 }
   0x4   :  { %6512 = sst [smem:[#allocation45_spill]] %s6479_s7 }
   0x5   :  { %6513 = sst [smem:[#allocation46_spill]] %s6480_s8 }
   0x6   :  { %6514 = sst [smem:[#allocation47_spill]] %s6482_s10 }
   0x7   :  { %17 = vsyncpa [#allocation3], 0 }
   0x8   :  { %19 = vsyncpa [#allocation3 + $0x1], 0 }
   0x9   :  { %20 = vsyncpa [#allocation6], 0 }
   0xa   :  { %21 = vsyncpa [#allocation9], 0 }
   0xb   :  { %22 = vsyncpa [#allocation12], 0 }
   0xc   :  { %23 = vsyncpa [#allocation15], 0 }
   0xd   :  { %24 = vsyncpa [#allocation4], 0 }
   0xe   :  { %26 = vsyncpa [#allocation4 + $0x1], 0  ;;  %s5107_s21 = smov 0   ;;  %s5109_s22 = smov 0  }
   0xf   :  { %s5111_s23 = smov 0   ;;  %s5113_s24 = smov 0  }
  0x10 LB: > { %s5019_s25 = smov [#allocation5]   ;;  %s5128_s27 = sadd.s32 4294967295, %s5017_s24   ;;  %s5017_s24 = sphi %s5113_s24, %s6587_s24   ;;  %s5013_s23 = sphi %s5111_s23, %s6586_s23   ;;  %s5009_s22 = sphi %s5109_s22, %s6585_s22   ;;  %s5005_s21 = sphi %s5107_s21, %s6584_s21  }
  0x11   : > { %s336_s26 = sshll.u32 %s5019_s25, 4  ;;  %p3721_p0 = scmp.ge.s32.totalorder %s5017_s24, 1  ;;  %s337_s26 = int_to_ptr.vmem [resolvable:$true] %s336_s26 }
  0x12   : > { %p6487_p1 = scmp.eq.s32.totalorder %s5128_s27, 0  ;;  %p320_p2 = scmp.lt.s32.totalorder %s5017_s24, 3 }
  0x13   : > { %s5020_s29 = smov [#allocation8]   ;;  %s5021_s14 = smov [#allocation11]  }
  0x14   : > { %p5133_p3 = pnand %p3721_p0, %p320_p2  ;;  %s359_s30 = sshll.u32 %s5020_s29, 4  ;;  %s5140_s30 = int_to_ptr.vmem [resolvable:$true] %s359_s30 }
  0x15   : > { %s389_s15 = sshll.u32 %s5021_s14, 4  ;;  %s4738_s17 = scalar_lea.vmem %s337_s26, 16  ;;  %s5148_s15 = int_to_ptr.vmem [resolvable:$true] %s389_s15 }
  0x16   : > { %s6515_s28 = scalar_select %p5133_p3, 1, 0 }
  0x17   : > { %p4276_p5 = pneg %p5133_p3  ;;  %p4739_p8 = scmp.ne.s32.totalorder %s337_s26, %s4738_s17 }
  0x18   : > { %s4745_s18 = scalar_lea.vmem %s337_s26, 32  ;;  %p4746_p11 = scmp.lt.s32.totalorder %s337_s26, %s337_s26 }
  0x19   : > { %p5144_p6 = pnand %p4276_p5, %p6487_p1  ;;  %p4747_p12 = scmp.lt.s32.totalorder %s4745_s18, %s4738_s17 }
  0x1b   : > { %p5152_p7 = pneg %p5144_p6  ;;  %p4748_p13 = por %p4747_p12, %p4746_p11 }
  0x1d   : > { %p4741_p9 = pnand %p4739_p8, %p5152_p7 }
  0x1f   : > { %p4742_p10 = pneg %p4741_p9 }
  0x21   : > { %p4749_p0 = pnand %p4748_p13, %p4742_p10 }
  0x23   : > { %4752 = shalt.err (!%p4749_p0)
}
  0x24   : > { %s6518_s2 = sld [smem:[#allocation42_spill]]  ;;  %s4764_s25 = scalar_lea.vmem %s5140_s30, 1024 }
  0x25   : > { %p4765_p2 = scmp.ne.s32.totalorder %s5140_s30, %s4764_s25  ;;  %p4772_p9 = scmp.lt.s32.totalorder %s5140_s30, %s5140_s30 }
  0x26   : > { %p4773_p11 = scmp.lt.s32.totalorder %s4764_s25, %s4764_s25 }
  0x27   : > { %p4767_p5 = pnand %p4765_p2, %p5152_p7 }
  0x28   : > { %p4774_p10 = por %p4773_p11, %p4772_p9 }
  0x29   : > { %p4768_p8 = pneg %p4767_p5 }
  0x2a   : > { %4279 = dma.hbm_to_vmem [thread:$0]  (!%p5144_p6), %s6518_s2, 16, %s337_s26, [#allocation6]  }
  0x2b   : > { %p4775_p12 = pnand %p4774_p10, %p4768_p8 }
  0x2d   : > { %4778 = shalt.err (!%p4775_p12)
}
  0x2e   : > { %s6485_s29 = smov 64   ;;  %s6486_s14 = smov 4  }
  0x2f   : > { %s6519_s4 = sld [smem:[#allocation44_spill]]  ;;  %s4790_s18 = scalar_lea.vmem %s5148_s15, 4096 }
  0x30   : > { %p4791_p13 = scmp.ne.s32.totalorder %s5148_s15, %s4790_s18  ;;  %p4798_p5 = scmp.lt.s32.totalorder %s5148_s15, %s5148_s15 }
  0x31   : > { %p4799_p8 = scmp.lt.s32.totalorder %s4790_s18, %s4790_s18 }
  0x32   : > { %p4793_p0 = pnand %p4791_p13, %p5152_p7 }
  0x33   : > { %p4800_p9 = por %p4799_p8, %p4798_p5 }
  0x34   : > { %p4794_p2 = pneg %p4793_p0 }
  0x35   : > { %4285 = dma.hbm_to_vmem [thread:$0]  (!%p5144_p6), %s6519_s4, 1024, %s5140_s30, [#allocation9], %s6485_s29, %s6485_s29, %s6486_s14  }
  0x36   : > { %p4801_p11 = pnand %p4800_p9, %p4794_p2 }
  0x38   : > { %4804 = shalt.err (!%p4801_p11)
}
  0x39   : > { %s5024_s19 = smov 256   ;;  %s5025_s20 = smov 16  }
  0x3a   : > { %s6520_s8 = sld [smem:[#allocation46_spill]]  ;;  %s5026_s30 = smov [#allocation7]  }
  0x3b   : > { %s346_s17 = sshll.u32 %s5026_s30, 4  ;;  %s347_s17 = int_to_ptr.vmem [resolvable:$true] %s346_s17 }
  0x3c   : > { %s4816_s29 = scalar_lea.vmem %s347_s17, 3072  ;;  %p4824_p0 = scmp.lt.s32.totalorder %s347_s17, %s347_s17 }
  0x3d   : > { %p4817_p10 = scmp.ne.s32.totalorder %s347_s17, %s4816_s29  ;;  %p4825_p2 = scmp.lt.s32.totalorder %s4816_s29, %s4816_s29 }
  0x3f   : > { %p4819_p12 = pnand %p4817_p10, %p5152_p7  ;;  %p4826_p5 = por %p4825_p2, %p4824_p0 }
  0x40   : > { %4291 = dma.hbm_to_vmem [thread:$0]  (!%p5144_p6), %s6520_s8, 4096, %s5148_s15, [#allocation12], %s5024_s19, %s5024_s19, %s5025_s20  }
  0x41   : > { %p4820_p13 = pneg %p4819_p12 }
  0x43   : > { %p4827_p8 = pnand %p4826_p5, %p4820_p13 }
  0x45   : > { %4830 = shalt.err (!%p4827_p8)
}
  0x46   : > { %s5027_s18 = smov 192   ;;  %s5028_s14 = smov 12  }
  0x47   : > { %s6521_s3 = sld [smem:[#allocation43_spill]]  ;;  %s5029_s19 = smov [#allocation10]  }
  0x48   : > { %s379_s20 = sshll.u32 %s5029_s19, 4  ;;  %s5030_s26 = smov [#allocation13]   ;;  %s380_s20 = int_to_ptr.vmem [resolvable:$true] %s379_s20 }
  0x49   : > { %s405_s30 = sshll.u32 %s5030_s26, 4  ;;  %s4842_s2 = scalar_lea.vmem %s380_s20, 16  ;;  %s406_s30 = int_to_ptr.vmem [resolvable:$true] %s405_s30 }
  0x4a   : > { %p4843_p9 = scmp.ne.s32.totalorder %s380_s20, %s4842_s2  ;;  %s4849_s29 = scalar_lea.vmem %s380_s20, 32 }
  0x4b   : > { %p4850_p12 = scmp.lt.s32.totalorder %s380_s20, %s380_s20  ;;  %p4851_p13 = scmp.lt.s32.totalorder %s4849_s29, %s4842_s2 }
  0x4c   : > { %p4845_p11 = pnand %p4843_p9, %p5152_p7 }
  0x4d   : > { %4282 = dma.hbm_to_vmem [thread:$0]  (!%p5144_p6), %s6521_s3, 3072, %s347_s17, [#allocation6], %s5027_s18, %s5027_s18, %s5028_s14  }
  0x4e   : > { %p4846_p10 = pneg %p4845_p11  ;;  %p4852_p0 = por %p4851_p13, %p4850_p12 }
  0x50   : > { %p4853_p2 = pnand %p4852_p0, %p4846_p10 }
  0x52   : > { %4856 = shalt.err (!%p4853_p2)
}
  0x53   : > { %s6522_s7 = sld [smem:[#allocation45_spill]]  ;;  %s4868_s18 = scalar_lea.vmem %s406_s30, 4096 }
  0x54   : > { %p4869_p5 = scmp.ne.s32.totalorder %s406_s30, %s4868_s18  ;;  %p4876_p9 = scmp.lt.s32.totalorder %s406_s30, %s406_s30 }
  0x55   : > { %p4877_p11 = scmp.lt.s32.totalorder %s4868_s18, %s4868_s18 }
  0x56   : > { %p4871_p8 = pnand %p4869_p5, %p5152_p7 }
  0x57   : > { %p4878_p1 = por %p4877_p11, %p4876_p9 }
  0x58   : > { %p4872_p4 = pneg %p4871_p8 }
  0x59   : > { %4288 = dma.hbm_to_vmem [thread:$0]  (!%p5144_p6), %s6522_s7, 16, %s380_s20, [#allocation9]  }
  0x5a   : > { %p4879_p3 = pnand %p4878_p1, %p4872_p4 }
  0x5c   : > { %4882 = shalt.err (!%p4879_p3)
}
  0x5d   : > { %s6523_s2 = smov 4   ;;  %s6524_s25 = smov 64  }
  0x5e   : > { %s6525_s10 = sld [smem:[#allocation47_spill]]  ;;  %s5031_s20 = smov [#allocation14]  }
  0x5f   : > { %s419_s26 = sshll.u32 %s5031_s20, 4  ;;  %s420_s26 = int_to_ptr.vmem [resolvable:$true] %s419_s26 }
  0x60   : > { %s4894_s29 = scalar_lea.vmem %s420_s26, 16  ;;  %s4901_s14 = scalar_lea.vmem %s420_s26, 32 }
  0x61   : > { %p4895_p10 = scmp.ne.s32.totalorder %s420_s26, %s4894_s29  ;;  %p4902_p1 = scmp.lt.s32.totalorder %s420_s26, %s420_s26 }
  0x62   : > { %p4903_p3 = scmp.lt.s32.totalorder %s4901_s14, %s4894_s29 }
  0x63   : > { %p4897_p12 = pnand %p4895_p10, %p5152_p7 }
  0x64   : > { %4294 = dma.hbm_to_vmem [thread:$0]  (!%p5144_p6), %s6525_s10, 4096, %s406_s30, [#allocation12], %s6524_s25, %s6524_s25, %s6523_s2  }
  0x65   : > { %p4898_p13 = pneg %p4897_p12  ;;  %p4904_p4 = por %p4903_p3, %p4902_p1 }
  0x67   : > { %p4905_p0 = pnand %p4904_p4, %p4898_p13 }
  0x69   : > { %4908 = shalt.err (!%p4905_p0)
}
  0x6a   : > { %4297 = dma.hbm_to_vmem [thread:$0]  (!%p5144_p6), %s6483_s11, 16, %s420_s26, [#allocation15]  }
  0x6b   : > { %s3720_s16 = sadd.s32 4294967294, %s5017_s24   ;;  %s5223_s13 = sadd.s32 1, %s5017_s24  }
  0x6c   : > { %s39_s30 = sadd.s32 1, %s5013_s23  ;;  %s36_s2 = ssub.s32 %s5017_s24, %s5223_s13 }
  0x6d   : > { %p46_p7 = scmp.ne.s32.totalorder %s5013_s23, %s5009_s22  ;;  %p37_p2 = scmp.eq.s32.totalorder %s36_s2, 0 }
  0x6e   : > { %p47_p5 = scmp.eq.s32.totalorder %s5017_s24, 0  ;;  %p52_p8 = scmp.ne.s32.totalorder %s5009_s22, %s5005_s21 }
  0x6f   : > { %p307_p9 = scmp.eq.s32.totalorder %s5128_s27, 1  ;;  %p6526_p10 = scmp.eq.s32.totalorder %s5128_s27, 0 }
  0x70   : > { %s5235_s25 = scalar_select %p37_p2, %s5013_s23, %s39_s30  }
  0x71   : > { %p48_p11 = por %p47_p5, %p46_p7  ;;  %p5239_p12 = por %p6526_p10, %p52_p8 }
  0x72   : > { %p5243_p6 = por %p307_p9, %p46_p7  ;;  %p313_p13 = scmp.eq.s32.totalorder %s3720_s16, 1 }
  0x73   : > { %s6527_s15 = scalar_select %p5239_p12, 1, 0 }
  0x74   : > { %s6528_s19 = scalar_select %p5243_p6, 1, 0 }
  0x75   : > { %p4313_p1 = scmp.lt.s32.totalorder %s5017_s24, 2  ;;  %s430_s20 = sand.u32 1, %s5013_s23  }
  0x76   : > { %p5249_p3 = por %p313_p13, %p52_p8  ;;  %s3730_s29 = sshll.u32 %s430_s20, 6 }
  0x77   : > { %s3882_s14 = sshll.u32 %s5017_s24, 10  ;;  %s434_s2 = scalar_lea.vmem [#allocation2], %s3730_s29 }
  0x78   : > { %s6529_s26 = scalar_select %p5249_p3, 1, 0 }
  0x79   : > { %s5257_s30 = scalar_lea.hbm %s6472_s0, %s3882_s14  ;;  %s441_s3 = sshll.u32 %s434_s2, 4  ;;  %s5263_s3 = int_to_ptr.vmem [resolvable:$true] %s441_s3 }
  0x7a   : > { %p5259_p4 = pnand %p4313_p1, %p48_p11  ;;  %s5265_s4 = scalar_lea.sflag [#allocation3], %s430_s20 }
  0x7b   : > { %s4909_s7 = scalar_lea.hbm %s5257_s30, 1024  ;;  %s4914_s29 = scalar_lea.hbm %s6472_s0, 2048 }
  0x7c   : > { %p4910_p0 = scmp.ne.s32.totalorder %s5257_s30, %s4909_s7  ;;  %p4911_p7 = pneg %p5259_p4 }
  0x7d   : > { %p4915_p8 = scmp.lt.s32.totalorder %s5257_s30, %s6472_s0  ;;  %p4916_p9 = scmp.lt.s32.totalorder %s4914_s29, %s4909_s7 }
  0x7e   : > { %p4912_p2 = pnand %p4911_p7, %p4910_p0 }
  0x7f   : > { %p4917_p11 = por %p4916_p9, %p4915_p8 }
  0x80   : > { %p4913_p5 = pneg %p4912_p2 }
  0x82   : > { %p4918_p10 = pnand %p4917_p11, %p4913_p5 }
  0x84   : > { %4921 = shalt.err (!%p4918_p10)
}
  0x85   : > { %s4922_s20 = scalar_lea.vmem %s5263_s3, 1024  ;;  %s5032_s8 = smov [#allocation2]  }
  0x86   : > { %p4923_p13 = scmp.ne.s32.totalorder %s5263_s3, %s4922_s20  ;;  %s4927_s10 = sshll.u32 %s5032_s8, 4  ;;  %s4928_s10 = int_to_ptr.vmem [resolvable:$false] %s4927_s10 }
  0x87   : > { %s4929_s14 = scalar_lea.vmem %s4928_s10, 2048  ;;  %p4930_p2 = scmp.lt.s32.totalorder %s5263_s3, %s4928_s10 }
  0x88   : > { %p4925_p1 = pnand %p4923_p13, %p4911_p7  ;;  %p4931_p3 = scmp.lt.s32.totalorder %s4929_s14, %s4922_s20 }
  0x8a   : > { %p4926_p0 = pneg %p4925_p1  ;;  %p4932_p6 = por %p4931_p3, %p4930_p2 }
  0x8c   : > { %p4933_p12 = pnand %p4932_p6, %p4926_p0 }
  0x8e   : > { %4936 = shalt.err (!%p4933_p12)
}
  0x8f   : > { %s5033_s7 = smov 128   ;;  %s5034_s17 = smov 8  }
  0x90   : > { %4301 = dma.hbm_to_vmem [thread:$0]  (!%p5259_p4), %s5257_s30, 1024, %s5263_s3, %s5265_s4, %s5033_s7, %s5033_s7, %s5034_s17  }
  0x91   : > { %p6531_p7 = scmp.ne.s32.totalorder %s6515_s28, 0 }
  0x93   : > { %453 = sbr.rel (%p6531_p7) target bundleno = 3841 (0xf01), region = 68 }
  0x98   : > { %s5289_s8 = sand.u32 1, %s5009_s22   ;;  %p6532_p12 = scmp.ne.s32.totalorder %s6527_s15, 0 }
  0x99   : > { %s3734_s10 = sshll.u32 %s5289_s8, 6  ;;  %s456_s29 = scalar_lea.sflag [#allocation3], %s5289_s8 }
  0x9a   : > { %s5295_s18 = scalar_lea.vmem [#allocation2], %s3734_s10 }
  0x9b   : > { %4980 = dma.done.wait (%p6532_p12), %s456_s29, 1024  }
  0x9c   : > { %4982 = vsyncadd (%p6532_p12), %s456_s29, 4294966272  ;;  %p6533_p6 = scmp.eq.s32.totalorder %s5128_s27, 0 }
  0x9e   : > { %4984 = dma.done.wait (%p6533_p6), [#allocation6], 3088   ;;  %p6534_p3 = pmov %p6533_p6 }
  0xa0   : > { %4986 = vsyncadd (%p6534_p3), [#allocation6], 4294964208  ;;  %p6535_p4 = pmov %p6534_p3 }
  0xa1   : > { %p6536_p5 = pmov %p6534_p3 }
  0xa2   : > { %4988 = dma.done.wait (%p6535_p4), [#allocation9], 1040  }
  0xa3   : > { %4990 = vsyncadd (%p6536_p5), [#allocation9], 4294966256  ;;  %p6537_p8 = pmov %p6534_p3 }
  0xa4   : > { %p6538_p9 = pmov %p6534_p3 }
  0xa5   : > { %4992 = dma.done.wait (%p6537_p8), [#allocation12], 8192  }
  0xa6   : > { %4994 = vsyncadd (%p6538_p9), [#allocation12], 4294959104  ;;  %p6539_p11 = pmov %p6534_p3 }
  0xa7   : > { %p6540_p10 = pmov %p6534_p3 }
  0xa8   : > { %4996 = dma.done.wait (%p6539_p11), [#allocation15], 16  }
  0xa9   : > { %4998 = vsyncadd (%p6540_p10), [#allocation15], 4294967280  ;;  %v529_v0 = vld [vmem:[%s5295_s18] sm:$0xff]  ;;  %v531_v1 = vld [vmem:[%s5295_s18 + $0x10] sm:$0xff]  ;;  %v6491_v62 = vmov 0   ;;  %vm970_vm0 = vcmask 261120  }
  0xaa   : > { %539 = vadd.xlane.f32.xlu0 %v529_v0  ;;  %543 = vadd.xlane.f32.xlu1 %v531_v1  ;;  %v530_v2 = vld [vmem:[%s5295_s18 + $0x8] sm:$0xff]  ;;  %v532_v3 = vld [vmem:[%s5295_s18 + $0x18] sm:$0xff]  ;;  %v533_v4 = vld [vmem:[%s5295_s18 + $0x20] sm:$0xff]  ;;  %vm1068_vm1 = vcmask 523264   ;;  %s5036_s28 = smov 96   ;;  %s5037_s15 = smov 64  }
  0xab   : > { %v534_v5 = vld [vmem:[%s5295_s18 + $0x28] sm:$0xff]  ;;  %v535_v6 = vld [vmem:[%s5295_s18 + $0x30] sm:$0xff]  ;;  %v536_v7 = vld [vmem:[%s5295_s18 + $0x38] sm:$0xff]  ;;  %852 = vmatprep.mubr.bf16.mxu0 %v6491_v62  ;;  %s5038_s30 = smov 32   ;;  %vm2204_vm2 = vcmask 785408   ;;  %s6398_s3 = scalar_lea.vmem [#allocation16], %s3734_s10 }
  0xac   : > { %v4375_v8 = vld [vmem:[#allocation7 + $0xac] ss:$12 sps:$4 sm:$0xff]   ;;  %v4377_v9 = vld [vmem:[#allocation7 + $0xa8] ss:$12 sps:$4 sm:$0xff]   ;;  %v4380_v42 = vld [vmem:[#allocation7 + $0xb0] ss:$12 sps:$4 sm:$0xff]  }
  0xad   : > { %820 = vmatprep.subr.bf16.mxu0 %v4375_v8  ;;  %v4378_v41 = vld [vmem:[#allocation7 + $0x94] ss:$12 sps:$4 sm:$0xff]   ;;  %v4381_v43 = vld [vmem:[#allocation7 + $0x90] ss:$12 sps:$4 sm:$0xff]   ;;  %4052 = vmatprep.subr.bf16.mxu1 %v4380_v42  ;;  %v4384_v46 = vld [vmem:[#allocation7 + $0x98] ss:$12 sps:$4 sm:$0xff]  }
  0xae   : > { %541 = vadd.xlane.f32.xlu0 %v530_v2  ;;  %545 = vadd.xlane.f32.xlu1 %v532_v3  ;;  %v4382_v45 = vld [vmem:[#allocation7 + $0x7c] ss:$12 sps:$4 sm:$0xff]   ;;  %v4385_v47 = vld [vmem:[#allocation7 + $0x78] ss:$12 sps:$4 sm:$0xff]   ;;  %v4388_v49 = vld [vmem:[#allocation7 + $0x80] ss:$12 sps:$4 sm:$0xff]  }
  0xaf   : > { %821 = vmatpush1.bf16.msra.mxu0 %v4377_v9  ;;  %4053 = vmatpush3.bf16.msra.mxu1 %v4380_v42  ;;  %v4386_v48 = vld [vmem:[#allocation7 + $0x64] ss:$12 sps:$4 sm:$0xff]   ;;  %v4389_v50 = vld [vmem:[#allocation7 + $0x60] ss:$12 sps:$4 sm:$0xff]   ;;  %v4392_v52 = vld [vmem:[#allocation7 + $0x68] ss:$12 sps:$4 sm:$0xff]  }
  0xb0   : > { %822 = vmatprep.subr.bf16.mxu0 %v4378_v41  ;;  %4054 = vmatprep.subr.bf16.mxu1 %v4384_v46  ;;  %v4390_v51 = vld [vmem:[#allocation7 + $0x4c] ss:$12 sps:$4 sm:$0xff]   ;;  %v4393_v53 = vld [vmem:[#allocation7 + $0x48] ss:$12 sps:$4 sm:$0xff]   ;;  %v4396_v55 = vld [vmem:[#allocation7 + $0x50] ss:$12 sps:$4 sm:$0xff]  }
  0xb1   : > { %v4394_v54 = vld [vmem:[#allocation7 + $0x34] ss:$12 sps:$4 sm:$0xff]   ;;  %v4397_v56 = vld [vmem:[#allocation7 + $0x30] ss:$12 sps:$4 sm:$0xff]   ;;  %v4400_v58 = vld [vmem:[#allocation7 + $0x38] ss:$12 sps:$4 sm:$0xff]  }
  0xb2   : > { %547 = vadd.xlane.f32.xlu0 %v533_v4  ;;  %549 = vadd.xlane.f32.xlu1 %v534_v5  ;;  %v4398_v57 = vld [vmem:[#allocation7 + $0x1c] ss:$12 sps:$4 sm:$0xff]   ;;  %v4401_v59 = vld [vmem:[#allocation7 + $0x18] ss:$12 sps:$4 sm:$0xff]   ;;  %v4404_v61 = vld [vmem:[#allocation7 + $0x20] ss:$12 sps:$4 sm:$0xff]  }
  0xb3   : > { %823 = vmatpush1.bf16.msra.mxu0 %v4381_v43  ;;  %4055 = vmatpush3.bf16.msra.mxu1 %v4384_v46  ;;  %v4402_v60 = vld [vmem:[#allocation7 + $0x4] ss:$12 sps:$4 sm:$0xff]   ;;  %v4405_v63 = vld [vmem:[#allocation7] ss:$12 sps:$4 sm:$0xff]   ;;  %s3883_s10 = sshll.u32 %s5128_s27, 10  ;;  %s3580_s4 = sshll.u32 %s6398_s3, 4  ;;  %s6427_s4 = int_to_ptr.vmem [resolvable:$true] %s3580_s4 }
  0xb4   : > { %824 = vmatprep.subr.bf16.mxu0 %v4382_v45  ;;  %4056 = vmatprep.subr.bf16.mxu1 %v4388_v49  ;;  %s3567_s16 = scalar_lea.sflag [#allocation4], %s5289_s8  ;;  %s4937_s2 = scalar_lea.vmem %s6427_s4, 1024 }
  0xb5   : > { %p4938_p13 = scmp.ne.s32.totalorder %s6427_s4, %s4937_s2  ;;  %p6581_p1 = scmp.ne.s32.totalorder %s6528_s19, 0 }
  0xb6   : > { %551 = vadd.xlane.f32.xlu0 %v535_v6  ;;  %553 = vadd.xlane.f32.xlu1 %v536_v7  ;;  %s5039_s27 = smov [#allocation16]  }
  0xb7   : > { %825 = vmatpush1.bf16.msra.mxu0 %v4385_v47  ;;  %4057 = vmatpush3.bf16.msra.mxu1 %v4388_v49  ;;  %p4939_p0 = pnand %p4938_p13, %p6581_p1  ;;  %s4941_s20 = sshll.u32 %s5039_s27, 4  ;;  %s4942_s20 = int_to_ptr.vmem [resolvable:$false] %s4941_s20 }
  0xb8   : > { %826 = vmatprep.subr.bf16.mxu0 %v4386_v48  ;;  %4058 = vmatprep.subr.bf16.mxu1 %v4392_v52  ;;  %s4943_s14 = scalar_lea.vmem %s4942_s20, 2048  ;;  %p4944_p7 = scmp.lt.s32.totalorder %s6427_s4, %s4942_s20 }
  0xb9   : > { %p4940_p2 = pneg %p4939_p0  ;;  %p4945_p12 = scmp.lt.s32.totalorder %s4943_s14, %s4937_s2 }
  0xbb   : > { %827 = vmatpush1.bf16.msra.mxu0 %v4389_v50  ;;  %4059 = vmatpush3.bf16.msra.mxu1 %v4392_v52  ;;  %p4946_p6 = por %p4945_p12, %p4944_p7 }
  0xbc   : > { %828 = vmatprep.subr.bf16.mxu0 %v4390_v51  ;;  %4060 = vmatprep.subr.bf16.mxu1 %v4396_v55 }
  0xbd   : > { %p4947_p3 = pnand %p4946_p6, %p4940_p2 }
  0xbf   : > { %829 = vmatpush1.bf16.msra.mxu0 %v4393_v53  ;;  %4061 = vmatpush3.bf16.msra.mxu1 %v4396_v55 }
  0xc0   : > { %830 = vmatprep.subr.bf16.mxu0 %v4394_v54  ;;  %4062 = vmatprep.subr.bf16.mxu1 %v4400_v58 }
  0xc3   : > { %831 = vmatpush1.bf16.msra.mxu0 %v4397_v56  ;;  %4063 = vmatpush3.bf16.msra.mxu1 %v4400_v58 }
  0xc4   : > { %832 = vmatprep.subr.bf16.mxu0 %v4398_v57  ;;  %4064 = vmatprep.subr.bf16.mxu1 %v4404_v61 }
  0xc7   : > { %833 = vmatpush1.bf16.msra.mxu0 %v4401_v59  ;;  %4065 = vmatpush3.bf16.msra.mxu1 %v4404_v61 }
  0xc8   : > { %834 = vmatprep.subr.bf16.mxu0 %v4402_v60 }
  0xcb   : > { %835 = vmatpush1.bf16.msra.mxu0 %v4405_v63 }
 0x133   : > { %v540_v10 = vpop.xlane.xlu0 %539  ;;  %v544_v11 = vpop.xlane.xlu1 %543 }
 0x134   : > { %v556_v12 = vmul.f32 0.0078125, %v540_v10  ;;  %v558_v13 = vmul.f32 0.0078125, %v544_v11 }
 0x136   : > { %v5325_v14 = vsub.f32 %v529_v0, %v556_v12  ;;  %v5327_v15 = vsub.f32 %v531_v1, %v558_v13  ;;  %v4406_v0 = vld [vmem:[#allocation7 + $0x8] ss:$12 sps:$4 sm:$0xff]  }
 0x137   : > { %v542_v16 = vpop.xlane.xlu0 %541  ;;  %v546_v17 = vpop.xlane.xlu1 %545  ;;  %4066 = vmatprep.subr.bf16.mxu1 %v4406_v0 }
 0x138   : > { %v557_v18 = vmul.f32 0.0078125, %v542_v16  ;;  %v572_v19 = vmul.f32 %v5325_v14, %v5325_v14  ;;  %v559_v20 = vmul.f32 0.0078125, %v546_v17  ;;  %v574_v21 = vmul.f32 %v5327_v15, %v5327_v15  ;;  %4067 = vmatpush3.bf16.msra.mxu1 %v4406_v0 }
 0x13a   : > { %580 = vadd.xlane.f32.xlu0 %v572_v19  ;;  %v5333_v22 = vsub.f32 %v530_v2, %v557_v18  ;;  %v5335_v23 = vsub.f32 %v532_v3, %v559_v20 }
 0x13b   : > { %v548_v24 = vpop.xlane.xlu0 %547  ;;  %v550_v25 = vpop.xlane.xlu1 %549 }
 0x13c   : > { %v560_v26 = vmul.f32 0.0078125, %v548_v24  ;;  %v573_v27 = vmul.f32 %v5333_v22, %v5333_v22  ;;  %v561_v28 = vmul.f32 0.0078125, %v550_v25  ;;  %v575_v29 = vmul.f32 %v5335_v23, %v5335_v23 }
 0x13e   : > { %584 = vadd.xlane.f32.xlu0 %v574_v21  ;;  %582 = vadd.xlane.f32.xlu1 %v573_v27  ;;  %v5341_v30 = vsub.f32 %v533_v4, %v560_v26  ;;  %v5343_v31 = vsub.f32 %v534_v5, %v561_v28 }
 0x13f   : > { %v552_v32 = vpop.xlane.xlu0 %551  ;;  %v554_v33 = vpop.xlane.xlu1 %553 }
 0x140   : > { %v562_v34 = vmul.f32 0.0078125, %v552_v32  ;;  %v576_v35 = vmul.f32 %v5341_v30, %v5341_v30  ;;  %v563_v36 = vmul.f32 0.0078125, %v554_v33  ;;  %v577_v37 = vmul.f32 %v5343_v31, %v5343_v31  ;;  %v3743_v33 = vld [vmem:[%s6473_s1] ss:$0 sm:$0xff] }
 0x142   : > { %586 = vadd.xlane.f32.xlu1 %v575_v29  ;;  %588 = vadd.xlane.f32.xlu0 %v576_v35  ;;  %v5349_v38 = vsub.f32 %v535_v6, %v562_v34  ;;  %v5351_v39 = vsub.f32 %v536_v7, %v563_v36 }
 0x144   : > { %v578_v40 = vmul.f32 %v5349_v38, %v5349_v38  ;;  %v579_v44 = vmul.f32 %v5351_v39, %v5351_v39 }
 0x146   : > { %590 = vadd.xlane.f32.xlu1 %v577_v37  ;;  %592 = vadd.xlane.f32.xlu0 %v578_v40  ;;  %v3744_v40 = vld [vmem:[#allocation5] ss:$0 sm:$0xff] }
 0x14a   : > { %594 = vadd.xlane.f32.xlu1 %v579_v44 }
 0x1c3   : > { %v581_v1 = vpop.xlane.xlu0 %580 }
 0x1c4   : > { %v596_v2 = vmul.f32 0.0078125, %v581_v1 }
 0x1c6   : > { %v604_v3 = vadd.f32 1e-05, %v596_v2 }
 0x1c7   : > { %v583_v4 = vpop.xlane.xlu1 %582  ;;  %v585_v5 = vpop.xlane.xlu0 %584 }
 0x1c8   : > { %4495 = vrsqrt.f32 %v604_v3  ;;  %v597_v6 = vmul.f32 0.0078125, %v583_v4  ;;  %v598_v7 = vmul.f32 0.0078125, %v585_v5 }
 0x1ca   : > { %v605_v8 = vadd.f32 1e-05, %v597_v6  ;;  %v606_v9 = vadd.f32 1e-05, %v598_v7 }
 0x1cb   : > { %v587_v10 = vpop.xlane.xlu1 %586  ;;  %v589_v11 = vpop.xlane.xlu0 %588 }
 0x1cc   : > { %4497 = vrsqrt.f32 %v605_v8  ;;  %v599_v12 = vmul.f32 0.0078125, %v587_v10  ;;  %v600_v13 = vmul.f32 0.0078125, %v589_v11 }
 0x1cd   : > { %4499 = vrsqrt.f32 %v606_v9 }
 0x1ce   : > { %v607_v16 = vadd.f32 1e-05, %v599_v12  ;;  %v608_v17 = vadd.f32 1e-05, %v600_v13 }
 0x1cf   : > { %v591_v18 = vpop.xlane.xlu1 %590  ;;  %v593_v19 = vpop.xlane.xlu0 %592 }
 0x1d0   : > { %4501 = vrsqrt.f32 %v607_v16  ;;  %v601_v20 = vmul.f32 0.0078125, %v591_v18  ;;  %v602_v21 = vmul.f32 0.0078125, %v593_v19 }
 0x1d1   : > { %4503 = vrsqrt.f32 %v608_v17 }
 0x1d2   : > { %v609_v24 = vadd.f32 1e-05, %v601_v20  ;;  %v610_v25 = vadd.f32 1e-05, %v602_v21 }
 0x1d3   : > { %v595_v26 = vpop.xlane.xlu1 %594 }
 0x1d4   : > { %4505 = vrsqrt.f32 %v609_v24  ;;  %v603_v27 = vmul.f32 0.0078125, %v595_v26 }
 0x1d5   : > { %v4496_v28 = vpop.eup %4495  ;;  %4507 = vrsqrt.f32 %v610_v25 }
 0x1d6   : > { %v611_v29 = vadd.f32 1e-05, %v603_v27  ;;  %v620_v32 = vmul.f32 %v4496_v28, %v5325_v14 }
 0x1d8   : > { %4509 = vrsqrt.f32 %v611_v29  ;;  %v634_v37 = vmul.f32 %v3743_v33, %v620_v32 }
 0x1d9   : > { %v4498_v34 = vpop.eup %4497 }
 0x1da   : > { %v4500_v35 = vpop.eup %4499  ;;  %v621_v36 = vmul.f32 %v4498_v34, %v5333_v22  ;;  %v648_v46 = vadd.f32 %v3744_v40, %v634_v37 }
 0x1db   : > { %v622_v41 = vmul.f32 %v4500_v35, %v5327_v15 }
 0x1dc   : > { %v635_v42 = vmul.f32 %v3743_v33, %v621_v36 }
 0x1dd   : > { %v4502_v43 = vpop.eup %4501  ;;  %v636_v44 = vmul.f32 %v3743_v33, %v622_v41 }
 0x1de   : > { %v4504_v45 = vpop.eup %4503  ;;  %v649_v47 = vadd.f32 %v3744_v40, %v635_v42  ;;  %v623_v14 = vmul.f32 %v4502_v43, %v5335_v23 }
 0x1df   : > { %v624_v48 = vmul.f32 %v4504_v45, %v5341_v30  ;;  %v650_v52 = vadd.f32 %v3744_v40, %v636_v44 }
 0x1e0   : > { %v656_v49 = vpack.c.bf16 %v649_v47, %v648_v46  ;;  %v637_v50 = vmul.f32 %v3743_v33, %v623_v14 }
 0x1e1   : > { %v4506_v51 = vpop.eup %4505  ;;  %v638_v54 = vmul.f32 %v3743_v33, %v624_v48 }
 0x1e2   : > { %v4508_v53 = vpop.eup %4507  ;;  %853 = vmatmul.mubr.bf16.vlgmr.msra.gmra.mxu0 %v656_v49  ;;  %4068 = vmatprep.mubr.bf16.mxu1 %v656_v49  ;;  %v651_v22 = vadd.f32 %v3744_v40, %v637_v50  ;;  %v625_v15 = vmul.f32 %v4506_v51, %v5343_v31 }
 0x1e3   : > { %862 = vmatprep.mubr.bf16.mxu0 %v6491_v62  ;;  %v626_v55 = vmul.f32 %v4508_v53, %v5349_v38  ;;  %v652_v30 = vadd.f32 %v3744_v40, %v638_v54 }
 0x1e4   : > { %v657_v56 = vpack.c.bf16 %v651_v22, %v650_v52  ;;  %v639_v57 = vmul.f32 %v3743_v33, %v625_v15 }
 0x1e5   : > { %v4510_v23 = vpop.eup %4509  ;;  %v640_v60 = vmul.f32 %v3743_v33, %v626_v55 }
 0x1e6   : > { %4069 = vmatmul.mubr.bf16.vlgmr.msra.gmra.mxu1 %v657_v56  ;;  %v653_v58 = vadd.f32 %v3744_v40, %v639_v57  ;;  %v627_v59 = vmul.f32 %v4510_v23, %v5351_v39 }
 0x1e7   : > { %v654_v0 = vadd.f32 %v3744_v40, %v640_v60 }
 0x1e8   : > { %v658_v61 = vpack.c.bf16 %v653_v58, %v652_v30  ;;  %v641_v63 = vmul.f32 %v3743_v33, %v627_v59 }
 0x1ea   : > { %863 = vmatmul.mubr.bf16.gmra.mxu0 %v657_v56  ;;  %4072 = vmatprep.mubr.bf16.mxu1 %v658_v61  ;;  %v655_v31 = vadd.f32 %v3744_v40, %v641_v63 }
 0x1eb   : > { %872 = vmatprep.mubr.bf16.mxu0 %v6491_v62 }
 0x1ec   : > { %v659_v1 = vpack.c.bf16 %v655_v31, %v654_v0 }
 0x1ee   : > { %4073 = vmatmul.mubr.bf16.gmra.mxu1 %v659_v1 }
 0x1f2   : > { %873 = vmatmul.mubr.bf16.gmra.mxu0 %v658_v61 }
 0x1f3   : > { %882 = vmatprep.mubr.bf16.mxu0 %v6491_v62 }
 0x1fa   : > { %883 = vmatmul.mubr.bf16.gmra.mxu0 %v659_v1 }
 0x2a2   : > { %v854_v38 = vpop.f32.mrf.mxu0 }
 0x2a4   : > { %v856_v2 = vpop.f32.mrf.mxu0 }
 0x2a6   : > { %v858_v3 = vpop.f32.mrf.mxu0  ;;  %v4070_v4 = vpop.f32.mrf.mxu1 }
 0x2a7   : > { %v5372_v39 = vpack.c.bf16 %v858_v3, %v854_v38 }
 0x2a8   : > { %v860_v5 = vpop.f32.mrf.mxu0  ;;  %v927_v6 = vpop.f32.mrf.mxu1 }
 0x2a9   : > { %4084 = vmatprep.mubr.msk.bf16.mxu0 %vm970_vm0, %v5372_v39  ;;  %v5408_v42 = vpack.c.bf16 %v860_v5, %v856_v2 }
 0x2aa   : > { %v864_v7 = vpop.f32.mrf.mxu0  ;;  %v4071_v8 = vpop.f32.mrf.mxu1 }
 0x2ab   : > { %v5383_v27 = vpack.c.bf16 %v4071_v8, %v4070_v4  ;;  %v984_v44 = vsel %vm970_vm0, %v5408_v42, 0 }
 0x2ac   : > { %v866_v9 = vpop.f32.mrf.mxu0  ;;  %v930_v10 = vpop.f32.mrf.mxu1 }
 0x2ad   : > { %v5387_v32 = vpack.c.bf16 %v930_v10, %v927_v6 }
 0x2ae   : > { %v868_v11 = vpop.f32.mrf.mxu0  ;;  %v4074_v12 = vpop.f32.mrf.mxu1 }
 0x2af   : > { %v5416_v45 = vpack.c.bf16 %v868_v11, %v864_v7 }
 0x2b0   : > { %v870_v13 = vpop.f32.mrf.mxu0  ;;  %v943_v16 = vpop.f32.mrf.mxu1 }
 0x2b1   : > { %v5402_v40 = vpack.c.bf16 %v870_v13, %v866_v9 }
 0x2b2   : > { %v874_v17 = vpop.f32.mrf.mxu0  ;;  %v4075_v18 = vpop.f32.mrf.mxu1 }
 0x2b3   : > { %v5376_v19 = vpack.c.bf16 %v4075_v18, %v4074_v12  ;;  %v987_v43 = vsel %vm970_vm0, %v5402_v40, 0 }
 0x2b4   : > { %v876_v20 = vpop.f32.mrf.mxu0  ;;  %v946_v21 = vpop.f32.mrf.mxu1 }
 0x2b5   : > { %v5378_v24 = vpack.c.bf16 %v946_v21, %v943_v16  ;;  %4092 = vmatprep.subr.bf16.mxu1 %v5376_v19 }
 0x2b6   : > { %v878_v25 = vpop.f32.mrf.mxu0  ;;  %4093 = vmatpush3.bf16.msra.mxu1 %v5376_v19 }
 0x2b7   : > { %4094 = vmatprep.subr.bf16.mxu1 %v5378_v24  ;;  %v5418_v46 = vpack.c.bf16 %v878_v25, %v874_v17 }
 0x2b8   : > { %v880_v26 = vpop.f32.mrf.mxu0 }
 0x2b9   : > { %v5394_v36 = vpack.c.bf16 %v880_v26, %v876_v20 }
 0x2ba   : > { %v884_v28 = vpop.f32.mrf.mxu0  ;;  %4095 = vmatpush3.bf16.msra.mxu1 %v5378_v24 }
 0x2bb   : > { %4096 = vmatprep.subr.bf16.mxu1 %v5383_v27  ;;  %v990_v41 = vsel %vm970_vm0, %v5394_v36, 0 }
 0x2bc   : > { %v886_v29 = vpop.f32.mrf.mxu0 }
 0x2be   : > { %v888_v33 = vpop.f32.mrf.mxu0  ;;  %4097 = vmatpush3.bf16.msra.mxu1 %v5383_v27 }
 0x2bf   : > { %4098 = vmatprep.subr.bf16.mxu1 %v5387_v32  ;;  %v5424_v47 = vpack.c.bf16 %v888_v33, %v884_v28 }
 0x2c0   : > { %v890_v34 = vpop.f32.mrf.mxu0 }
 0x2c1   : > { %v5391_v35 = vpack.c.bf16 %v890_v34, %v886_v29 }
 0x2c2   : > { %4099 = vmatpush3.bf16.msra.mxu1 %v5387_v32 }
 0x2c3   : > { %4228 = vmatprep.subr.msk.bf16.mxu0 %vm970_vm0, %v5391_v35  ;;  %v993_v37 = vsel %vm970_vm0, %v5391_v35, 0 }
 0x2c4   : > { %4077 = vmatpush3.bf16.xpose.msra.mxu0 %v993_v37 }
 0x2c5   : > { %4229 = vmatprep.subr.msk.bf16.mxu0 %vm970_vm0, %v5394_v36 }
 0x2cc   : > { %4079 = vmatpush3.bf16.xpose.msra.mxu0 %v990_v41 }
 0x2cd   : > { %4230 = vmatprep.subr.msk.bf16.mxu0 %vm970_vm0, %v5402_v40 }
 0x2d4   : > { %4081 = vmatpush3.bf16.xpose.msra.mxu0 %v987_v43 }
 0x2d5   : > { %4231 = vmatprep.subr.msk.bf16.mxu0 %vm970_vm0, %v5408_v42 }
 0x2dc   : > { %4083 = vmatpush3.bf16.xpose.msra.mxu0 %v984_v44 }
 0x2e3   : > { %4085 = vmatmul.mubr.msk.bf16.vlgmr.msra.gmra.mxu0 %vm970_vm0, %v5416_v45 }
 0x2e4   : > { %4088 = vmatprep.mubr.msk.bf16.mxu0 %vm970_vm0, %v5418_v46 }
 0x2eb   : > { %4089 = vmatmul.mubr.msk.bf16.gmra.mxu0 %vm970_vm0, %v5424_v47 }
 0x3a3   : > { %v4086_v14 = vpop.f32.mrf.mxu0 }
 0x3a4   : > { %v1062_v51 = vmul.f32 0.17677669, %v4086_v14 }
 0x3a5   : > { %v1029_v48 = vpop.f32.mrf.mxu0 }
 0x3a6   : > { %v1060_v49 = vmul.f32 0.17677669, %v1029_v48  ;;  %v1075_v56 = vsel %vm1068_vm1, %v1062_v51, -inf }
 0x3a7   : > { %v4087_v50 = vpop.f32.mrf.mxu0 }
 0x3a8   : > { %v1063_v52 = vmul.f32 0.17677669, %v4087_v50  ;;  %v1069_v53 = vsel %vm1068_vm1, %v1060_v49, -inf }
 0x3a9   : > { %1070 = vmax.xlane.f32.xlu0 %v1069_v53  ;;  %v1032_v22 = vpop.f32.mrf.mxu0 }
 0x3aa   : > { %v1061_v15 = vmul.f32 0.17677669, %v1032_v22  ;;  %v1078_v54 = vsel %vm1068_vm1, %v1063_v52, -inf }
 0x3ab   : > { %1079 = vmax.xlane.f32.xlu1 %v1078_v54  ;;  %v4090_v55 = vpop.f32.mrf.mxu0 }
 0x3ac   : > { %v1072_v30 = vsel %vm1068_vm1, %v1061_v15, -inf  ;;  %v1066_v59 = vmul.f32 0.17677669, %v4090_v55 }
 0x3ad   : > { %1076 = vmax.xlane.f32.xlu0 %v1075_v56  ;;  %v1045_v57 = vpop.f32.mrf.mxu0 }
 0x3ae   : > { %v1064_v23 = vmul.f32 0.17677669, %v1045_v57  ;;  %v1087_v1 = vsel %vm1068_vm1, %v1066_v59, -inf }
 0x3af   : > { %1073 = vmax.xlane.f32.xlu1 %v1072_v30  ;;  %v4091_v58 = vpop.f32.mrf.mxu0 }
 0x3b0   : > { %v1067_v60 = vmul.f32 0.17677669, %v4091_v58  ;;  %v1081_v61 = vsel %vm1068_vm1, %v1064_v23, -inf }
 0x3b1   : > { %1082 = vmax.xlane.f32.xlu0 %v1081_v61  ;;  %v1048_v63 = vpop.f32.mrf.mxu0 }
 0x3b2   : > { %v1065_v0 = vmul.f32 0.17677669, %v1048_v63  ;;  %v1090_v31 = vsel %vm1068_vm1, %v1067_v60, -inf }
 0x3b3   : > { %1091 = vmax.xlane.f32.xlu1 %v1090_v31 }
 0x3b4   : > { %v1084_v38 = vsel %vm1068_vm1, %v1065_v0, -inf }
 0x3b5   : > { %1088 = vmax.xlane.f32.xlu0 %v1087_v1 }
 0x3b7   : > { %1085 = vmax.xlane.f32.xlu1 %v1084_v38 }
 0x3c8   : > { %1262 = vrot.lane.b32.xlu1 %v5394_v36, %s5036_s28 }
 0x3cc   : > { %1260 = vrot.lane.b32.xlu1 %v5402_v40, %s5036_s28 }
 0x432   : > { %v1071_v2 = vpop.xlane.xlu0 %1070 }
 0x433   : > { %v1093_v3 = vsub.f32 %v1060_v49, %v1071_v2 }
 0x434   : > { %v1080_v4 = vpop.xlane.xlu1 %1079 }
 0x435   : > { %v1096_v5 = vsub.f32 %v1063_v52, %v1080_v4  ;;  %v1101_v9 = vmul.f32 1.442695, %v1093_v3 }
 0x436   : > { %v1077_v6 = vpop.xlane.xlu0 %1076 }
 0x437   : > { %v1107_v7 = vmul.f32 1.442695, %v1096_v5  ;;  %v1095_v8 = vsub.f32 %v1062_v51, %v1077_v6 }
 0x438   : > { %v1074_v10 = vpop.xlane.xlu1 %1073 }
 0x439   : > { %4511 = vpow2.f32 %v1107_v7  ;;  %v1105_v11 = vmul.f32 1.442695, %v1095_v8  ;;  %v1094_v12 = vsub.f32 %v1061_v15, %v1074_v10 }
 0x43a   : > { %v1083_v29 = vpop.xlane.xlu0 %1082 }
 0x43b   : > { %4513 = vpow2.f32 %v1105_v11  ;;  %v1103_v13 = vmul.f32 1.442695, %v1094_v12  ;;  %v1097_v48 = vsub.f32 %v1064_v23, %v1083_v29 }
 0x43c   : > { %4515 = vpow2.f32 %v1101_v9  ;;  %v1092_v33 = vpop.xlane.xlu1 %1091 }
 0x43d   : > { %4517 = vpow2.f32 %v1103_v13  ;;  %v1100_v37 = vsub.f32 %v1067_v60, %v1092_v33  ;;  %v1109_v51 = vmul.f32 1.442695, %v1097_v48 }
 0x43e   : > { %v1089_v34 = vpop.xlane.xlu0 %1088 }
 0x43f   : > { %v1099_v43 = vsub.f32 %v1066_v59, %v1089_v34  ;;  %v1115_v44 = vmul.f32 1.442695, %v1100_v37 }
 0x440   : > { %v1086_v41 = vpop.xlane.xlu1 %1085 }
 0x441   : > { %v1098_v14 = vsub.f32 %v1065_v0, %v1086_v41  ;;  %v1113_v49 = vmul.f32 1.442695, %v1099_v43  ;;  %4519 = vpow2.f32 %v1115_v44 }
 0x443   : > { %v1111_v50 = vmul.f32 1.442695, %v1098_v14  ;;  %4521 = vpow2.f32 %v1113_v49 }
 0x444   : > { %v1263_v23 = vpop.permute.xlu1 %1262 }
 0x445   : > { %4523 = vpow2.f32 %v1111_v50  ;;  %v1285_v11 = vsel %vm970_vm0, %v1263_v23, 0 }
 0x446   : > { %v5440_v16 = vpop.eup %4511  ;;  %4525 = vpow2.f32 %v1109_v51 }
 0x447   : > { %v1126_v17 = vsel %vm1068_vm1, %v5440_v16, 0.0 }
 0x448   : > { %v5444_v18 = vpop.eup %4513  ;;  %1127 = vadd.xlane.f32.xlu1 %v1126_v17  ;;  %v1261_v30 = vpop.permute.xlu1 %1260 }
 0x449   : > { %v5446_v20 = vpop.eup %4515  ;;  %v1123_v21 = vsel %vm1068_vm1, %v5444_v18, 0.0  ;;  %v1282_v12 = vsel %vm970_vm0, %v1261_v30, 0 }
 0x44a   : > { %v5450_v25 = vpop.eup %4517  ;;  %1124 = vadd.xlane.f32.xlu0 %v1123_v21  ;;  %v1117_v28 = vsel %vm1068_vm1, %v5446_v20, 0.0 }
 0x44b   : > { %v1120_v26 = vsel %vm1068_vm1, %v5450_v25, 0.0 }
 0x44c   : > { %1121 = vadd.xlane.f32.xlu1 %v1120_v26 }
 0x44e   : > { %1118 = vadd.xlane.f32.xlu0 %v1117_v28  ;;  %v5460_v52 = vpop.eup %4519 }
 0x44f   : > { %v1138_v22 = vsel %vm1068_vm1, %v5460_v52, 0.0 }
 0x450   : > { %v5462_v53 = vpop.eup %4521 }
 0x451   : > { %v1135_v54 = vsel %vm1068_vm1, %v5462_v53, 0.0 }
 0x452   : > { %v5466_v15 = vpop.eup %4523 }
 0x453   : > { %v5470_v55 = vpop.eup %4525  ;;  %v1132_v56 = vsel %vm1068_vm1, %v5466_v15, 0.0 }
 0x454   : > { %v1129_v57 = vsel %vm1068_vm1, %v5470_v55, 0.0 }
 0x45d   : > { %1566 = vrot.lane.b32.xlu1 %v5391_v35, %s5037_s15 }
 0x464   : > { %1264 = vrot.lane.b32.xlu0 %v5391_v35, %s5036_s28 }
 0x481   : > { %1139 = vadd.xlane.f32.xlu1 %v1138_v22 }
 0x483   : > { %1136 = vadd.xlane.f32.xlu0 %v1135_v54 }
 0x485   : > { %1133 = vadd.xlane.f32.xlu1 %v1132_v56 }
 0x487   : > { %1130 = vadd.xlane.f32.xlu0 %v1129_v57 }
 0x496   : > { %1564 = vrot.lane.b32.xlu1 %v5394_v36, %s5037_s15 }
 0x49a   : > { %1248 = vrot.lane.b32.xlu1 %v5416_v45, %s5036_s28 }
 0x49d   : > { %1258 = vrot.lane.b32.xlu0 %v5408_v42, %s5036_s28 }
 0x49e   : > { %1250 = vrot.lane.b32.xlu1 %v5418_v46, %s5036_s28 }
 0x4a1   : > { %1246 = vrot.lane.b32.xlu0 %v5372_v39, %s5036_s28 }
 0x4a2   : > { %1560 = vrot.lane.b32.xlu1 %v5408_v42, %s5037_s15 }
 0x4a5   : > { %1562 = vrot.lane.b32.xlu0 %v5402_v40, %s5037_s15 }
 0x4a6   : > { %1554 = vrot.lane.b32.xlu1 %v5416_v45, %s5037_s15 }
 0x4a9   : > { %1252 = vrot.lane.b32.xlu0 %v5424_v47, %s5036_s28 }
 0x4aa   : > { %1558 = vrot.lane.b32.xlu1 %v5424_v47, %s5037_s15 }
 0x4ad   : > { %1552 = vrot.lane.b32.xlu0 %v5372_v39, %s5037_s15 }
 0x4b1   : > { %1556 = vrot.lane.b32.xlu0 %v5418_v46, %s5037_s15 }
 0x4d1   : > { %v1128_v58 = vpop.xlane.xlu1 %1127 }
 0x4d3   : > { %v1125_v59 = vpop.xlane.xlu0 %1124 }
 0x4d4   : > { %4527 = vrcp.f32 %v1125_v59 }
 0x4d5   : > { %v1122_v60 = vpop.xlane.xlu1 %1121 }
 0x4d6   : > { %4529 = vrcp.f32 %v1122_v60 }
 0x4d7   : > { %4531 = vrcp.f32 %v1128_v58  ;;  %v1119_v61 = vpop.xlane.xlu0 %1118 }
 0x4d8   : > { %4533 = vrcp.f32 %v1119_v61 }
 0x4d9   : > { %v1567_v63 = vpop.permute.xlu1 %1566 }
 0x4da   : > { %4236 = vmatprep.subr.msk.bf16.mxu0 %vm970_vm0, %v1567_v63  ;;  %v1590_v0 = vsel %vm970_vm0, %v1567_v63, 0 }
 0x4db   : > { %v1265_v31 = vpop.permute.xlu0 %1264  ;;  %4141 = vmatpush3.bf16.xpose.msra.mxu0 %v1590_v0 }
 0x4dc   : > { %4232 = vmatprep.subr.msk.bf16.mxu1 %vm970_vm0, %v1265_v31  ;;  %v1288_v10 = vsel %vm970_vm0, %v1265_v31, 0 }
 0x4e1   : > { %v4528_v1 = vpop.eup %4527 }
 0x4e2   : > { %v1151_v4 = vmul.f32 %v4528_v1, %v5444_v18 }
 0x4e3   : > { %v4530_v38 = vpop.eup %4529 }
 0x4e4   : > { %v4532_v2 = vpop.eup %4531  ;;  %v1150_v6 = vmul.f32 %v4530_v38, %v5450_v25 }
 0x4e5   : > { %v4534_v3 = vpop.eup %4533  ;;  %v1152_v7 = vmul.f32 %v4532_v2, %v5440_v16 }
 0x4e6   : > { %v1149_v5 = vmul.f32 %v4534_v3, %v5446_v20 }
 0x4e7   : > { %v1158_v9 = vpack.c.bf16 %v1152_v7, %v1151_v4 }
 0x4e8   : > { %v1157_v8 = vpack.c.bf16 %v1150_v6, %v1149_v5 }
 0x4ea   : > { %4100 = vmatprep.mubr.msk.bf16.mxu1 %vm1068_vm1, %v1157_v8 }
 0x4eb   : > { %4101 = vmatmul.mubr.msk.bf16.vlgmr.msra.gmra.mxu1 %vm1068_vm1, %v1158_v9 }
 0x4ec   : > { %4109 = vmatpush3.bf16.xpose.msra.mxu1 %v1288_v10 }
 0x4ed   : > { %4233 = vmatprep.subr.msk.bf16.mxu1 %vm970_vm0, %v1263_v23 }
 0x4f4   : > { %4111 = vmatpush3.bf16.xpose.msra.mxu1 %v1285_v11 }
 0x4f5   : > { %4234 = vmatprep.subr.msk.bf16.mxu1 %vm970_vm0, %v1261_v30 }
 0x4fc   : > { %4113 = vmatpush3.bf16.xpose.msra.mxu1 %v1282_v12 }
 0x50a   : > { %v1140_v13 = vpop.xlane.xlu1 %1139 }
 0x50c   : > { %v1137_v16 = vpop.xlane.xlu0 %1136 }
 0x50d   : > { %4535 = vrcp.f32 %v1137_v16 }
 0x50e   : > { %v1134_v17 = vpop.xlane.xlu1 %1133 }
 0x50f   : > { %4537 = vrcp.f32 %v1134_v17 }
 0x510   : > { %4539 = vrcp.f32 %v1140_v13  ;;  %v1131_v18 = vpop.xlane.xlu0 %1130 }
 0x511   : > { %4541 = vrcp.f32 %v1131_v18 }
 0x512   : > { %v1565_v20 = vpop.permute.xlu1 %1564 }
 0x513   : > { %4237 = vmatprep.subr.msk.bf16.mxu0 %vm970_vm0, %v1565_v20  ;;  %v1587_v21 = vsel %vm970_vm0, %v1565_v20, 0 }
 0x514   : > { %v1259_v25 = vpop.permute.xlu0 %1258  ;;  %4143 = vmatpush3.bf16.xpose.msra.mxu0 %v1587_v21 }
 0x515   : > { %4235 = vmatprep.subr.msk.bf16.mxu1 %vm970_vm0, %v1259_v25  ;;  %v1279_v26 = vsel %vm970_vm0, %v1259_v25, 0 }
 0x516   : > { %4115 = vmatpush3.bf16.xpose.msra.mxu1 %v1279_v26  ;;  %v1249_v28 = vpop.permute.xlu1 %1248 }
 0x518   : > { %v1247_v29 = vpop.permute.xlu0 %1246 }
 0x51a   : > { %v1251_v33 = vpop.permute.xlu1 %1250  ;;  %v4536_v34 = vpop.eup %4535 }
 0x51b   : > { %v1155_v49 = vmul.f32 %v4536_v34, %v5462_v53 }
 0x51c   : > { %v4538_v37 = vpop.eup %4537  ;;  %v1563_v41 = vpop.permute.xlu0 %1562 }
 0x51d   : > { %v4540_v43 = vpop.eup %4539  ;;  %4238 = vmatprep.subr.msk.bf16.mxu0 %vm970_vm0, %v1563_v41  ;;  %v1584_v44 = vsel %vm970_vm0, %v1563_v41, 0  ;;  %v1154_v51 = vmul.f32 %v4538_v37, %v5466_v15 }
 0x51e   : > { %v4542_v14 = vpop.eup %4541  ;;  %4145 = vmatpush3.bf16.xpose.msra.mxu0 %v1584_v44  ;;  %v1561_v48 = vpop.permute.xlu1 %1560  ;;  %v1156_v54 = vmul.f32 %v4540_v43, %v5460_v52 }
 0x51f   : > { %4239 = vmatprep.subr.msk.bf16.mxu0 %vm970_vm0, %v1561_v48  ;;  %v1153_v50 = vmul.f32 %v4542_v14, %v5470_v55  ;;  %v1581_v53 = vsel %vm970_vm0, %v1561_v48, 0 }
 0x520   : > { %v1253_v22 = vpop.permute.xlu0 %1252  ;;  %v1160_v57 = vpack.c.bf16 %v1156_v54, %v1155_v49 }
 0x521   : > { %v1159_v56 = vpack.c.bf16 %v1154_v51, %v1153_v50 }
 0x522   : > { %v1555_v55 = vpop.permute.xlu1 %1554 }
 0x523   : > { %4104 = vmatprep.mubr.msk.bf16.mxu1 %vm1068_vm1, %v1159_v56 }
 0x524   : > { %v1553_v23 = vpop.permute.xlu0 %1552  ;;  %4105 = vmatmul.mubr.msk.bf16.gmra.mxu1 %vm1068_vm1, %v1160_v57 }
 0x525   : > { %4116 = vmatprep.mubr.msk.bf16.mxu1 %vm970_vm0, %v1247_v29  ;;  %4148 = vmatprep.mubr.msk.bf16.mxu0 %vm970_vm0, %v1553_v23 }
 0x526   : > { %4147 = vmatpush3.bf16.xpose.msra.mxu0 %v1581_v53  ;;  %v1559_v52 = vpop.permute.xlu1 %1558 }
 0x528   : > { %v1557_v15 = vpop.permute.xlu0 %1556 }
 0x52c   : > { %4117 = vmatmul.mubr.msk.bf16.vlgmr.msra.gmra.mxu1 %vm970_vm0, %v1249_v28 }
 0x52d   : > { %4120 = vmatprep.mubr.msk.bf16.mxu1 %vm970_vm0, %v1251_v33  ;;  %4149 = vmatmul.mubr.msk.bf16.vlgmr.msra.gmra.mxu0 %vm970_vm0, %v1555_v55 }
 0x52e   : > { %4152 = vmatprep.mubr.msk.bf16.mxu0 %vm970_vm0, %v1557_v15 }
 0x534   : > { %4121 = vmatmul.mubr.msk.bf16.gmra.mxu1 %vm970_vm0, %v1253_v22 }
 0x535   : > { %4153 = vmatmul.mubr.msk.bf16.gmra.mxu0 %vm970_vm0, %v1559_v52 }
 0x5ab   : > { %v5536_v30 = vpop.f32.mrf.mxu1 }
 0x5ad   : > { %v5538_v58 = vpop.f32.mrf.mxu1 }
 0x5af   : > { %v5540_v59 = vpop.f32.mrf.mxu1 }
 0x5b0   : > { %v1239_v60 = vpack.c.bf16 %v5540_v59, %v5536_v30 }
 0x5b1   : > { %v5544_v61 = vpop.f32.mrf.mxu1 }
 0x5b2   : > { %v1238_v63 = vpack.c.bf16 %v5544_v61, %v5538_v58 }
 0x5e4   : > { %v5548_v0 = vpop.f32.mrf.mxu1 }
 0x5e6   : > { %v5550_v31 = vpop.f32.mrf.mxu1 }
 0x5e8   : > { %v5552_v1 = vpop.f32.mrf.mxu1 }
 0x5ea   : > { %v5556_v2 = vpop.f32.mrf.mxu1 }
 0x5eb   : > { %v1240_v3 = vpack.c.bf16 %v5556_v2, %v5550_v31  ;;  %v6542_v2 = vmov 0  }
 0x5ec   : > { %v4118_v4 = vpop.f32.mrf.mxu1 }
 0x5ed   : > { %v4150_v5 = vpop.f32.mrf.mxu0  ;;  %v5576_v33 = vmul.f32 0.17677669, %v4118_v4 }
 0x5ee   : > { %v1324_v6 = vpop.f32.mrf.mxu1  ;;  %v5562_v10 = vmul.f32 0.17677669, %v4150_v5 }
 0x5ef   : > { %v1626_v7 = vpop.f32.mrf.mxu0  ;;  %v5582_v14 = vmul.f32 0.17677669, %v1324_v6  ;;  %v1369_v49 = vsel %vm1068_vm1, %v5576_v33, -inf }
 0x5f0   : > { %v5560_v8 = vmul.f32 0.17677669, %v1626_v7  ;;  %v4119_v12 = vpop.f32.mrf.mxu1  ;;  %v1671_v20 = vsel %vm1068_vm1, %v5562_v10, -inf }
 0x5f1   : > { %v4151_v9 = vpop.f32.mrf.mxu0  ;;  %v5589_v22 = vmul.f32 0.17677669, %v4119_v12  ;;  %v1363_v56 = vsel %vm1068_vm1, %v5582_v14, -inf }
 0x5f2   : > { %v1665_v11 = vsel %vm1068_vm1, %v5560_v8, -inf  ;;  %v5568_v18 = vmul.f32 0.17677669, %v4151_v9  ;;  %v1327_v25 = vpop.f32.mrf.mxu1 }
 0x5f3   : > { %1666 = vmax.xlane.f32.xlu0 %v1665_v11  ;;  %v1629_v13 = vpop.f32.mrf.mxu0  ;;  %v5584_v48 = vmul.f32 0.17677669, %v1327_v25  ;;  %v1372_v15 = vsel %vm1068_vm1, %v5589_v22, -inf }
 0x5f4   : > { %v5566_v16 = vmul.f32 0.17677669, %v1629_v13  ;;  %v1674_v34 = vsel %vm1068_vm1, %v5568_v18, -inf  ;;  %v4122_v41 = vpop.f32.mrf.mxu1 }
 0x5f5   : > { %v4154_v17 = vpop.f32.mrf.mxu0  ;;  %v1366_v57 = vsel %vm1068_vm1, %v5584_v48, -inf  ;;  %v5597_v53 = vmul.f32 0.17677669, %v4122_v41 }
 0x5f6   : > { %v1668_v21 = vsel %vm1068_vm1, %v5566_v16, -inf  ;;  %v1340_v51 = vpop.f32.mrf.mxu1  ;;  %v5613_v11 = vmul.f32 0.17677669, %v4154_v17 }
 0x5f7   : > { %1672 = vmax.xlane.f32.xlu0 %v1671_v20  ;;  %1669 = vmax.xlane.f32.xlu1 %v1668_v21  ;;  %v1642_v26 = vpop.f32.mrf.mxu0  ;;  %v5605_v5 = vmul.f32 0.17677669, %v1340_v51  ;;  %v1381_v7 = vsel %vm1068_vm1, %v5597_v53, -inf }
 0x5f8   : > { %v5574_v28 = vmul.f32 0.17677669, %v1642_v26  ;;  %v4123_v23 = vpop.f32.mrf.mxu1  ;;  %v1683_v20 = vsel %vm1068_vm1, %v5613_v11, -inf }
 0x5f9   : > { %v4155_v29 = vpop.f32.mrf.mxu0  ;;  %v5599_v55 = vmul.f32 0.17677669, %v4123_v23  ;;  %v1375_v12 = vsel %vm1068_vm1, %v5605_v5, -inf }
 0x5fa   : > { %v1677_v37 = vsel %vm1068_vm1, %v5574_v28, -inf  ;;  %v5591_v54 = vmul.f32 0.17677669, %v4155_v29  ;;  %v1343_v4 = vpop.f32.mrf.mxu1 }
 0x5fb   : > { %1675 = vmax.xlane.f32.xlu1 %v1674_v34  ;;  %1678 = vmax.xlane.f32.xlu0 %v1677_v37  ;;  %v1645_v43 = vpop.f32.mrf.mxu0  ;;  %v5607_v6 = vmul.f32 0.17677669, %v1343_v4  ;;  %v1384_v9 = vsel %vm1068_vm1, %v5599_v55, -inf }
 0x5fc   : > { %v1662_v44 = vmul.f32 0.17677669, %v1645_v43  ;;  %v1686_v52 = vsel %vm1068_vm1, %v5591_v54, -inf }
 0x5fd   : > { %v1378_v13 = vsel %vm1068_vm1, %v5607_v6, -inf }
 0x5fe   : > { %v1680_v50 = vsel %vm1068_vm1, %v1662_v44, -inf }
 0x5ff   : > { %1370 = vmax.xlane.f32.xlu0 %v1369_v49  ;;  %1681 = vmax.xlane.f32.xlu1 %v1680_v50 }
 0x603   : > { %1364 = vmax.xlane.f32.xlu0 %v1363_v56  ;;  %1367 = vmax.xlane.f32.xlu1 %v1366_v57 }
 0x607   : > { %1373 = vmax.xlane.f32.xlu0 %v1372_v15  ;;  %1687 = vmax.xlane.f32.xlu1 %v1686_v52 }
 0x60b   : > { %1382 = vmax.xlane.f32.xlu0 %v1381_v7  ;;  %1385 = vmax.xlane.f32.xlu1 %v1384_v9 }
 0x60f   : > { %1376 = vmax.xlane.f32.xlu0 %v1375_v12  ;;  %1379 = vmax.xlane.f32.xlu1 %v1378_v13 }
 0x613   : > { %1684 = vmax.xlane.f32.xlu0 %v1683_v20 }
 0x629   : > { %1465 = vrot.lane.b32.xlu0 %v5376_v19, %s5036_s28 }
 0x62d   : > { %1461 = vrot.lane.b32.xlu0 %v5383_v27, %s5036_s28 }
 0x631   : > { %1459 = vrot.lane.b32.xlu0 %v5387_v32, %s5036_s28 }
 0x635   : > { %1763 = vrot.lane.b32.xlu0 %v5376_v19, %s5037_s15 }
 0x639   : > { %1759 = vrot.lane.b32.xlu0 %v5383_v27, %s5037_s15 }
 0x67c   : > { %v1667_v17 = vpop.xlane.xlu0 %1666 }
 0x67d   : > { %v1689_v21 = vsub.f32 %v5560_v8, %v1667_v17 }
 0x67f   : > { %v1697_v25 = vmul.f32 1.442695, %v1689_v21 }
 0x680   : > { %v1673_v26 = vpop.xlane.xlu0 %1672  ;;  %v1670_v29 = vpop.xlane.xlu1 %1669 }
 0x681   : > { %4543 = vpow2.f32 %v1697_v25  ;;  %v1691_v34 = vsub.f32 %v5562_v10, %v1673_v26  ;;  %v1690_v37 = vsub.f32 %v5566_v16, %v1670_v29 }
 0x683   : > { %v1699_v41 = vmul.f32 1.442695, %v1690_v37  ;;  %v1701_v43 = vmul.f32 1.442695, %v1691_v34 }
 0x684   : > { %v5634_v49 = vpop.xlane.xlu0 %1678  ;;  %v1676_v50 = vpop.xlane.xlu1 %1675 }
 0x685   : > { %v1692_v51 = vsub.f32 %v5568_v18, %v1676_v50  ;;  %4545 = vpow2.f32 %v1699_v41 }
 0x686   : > { %4547 = vpow2.f32 %v1701_v43 }
 0x687   : > { %v1703_v56 = vmul.f32 1.442695, %v1692_v51 }
 0x688   : > { %v1371_v57 = vpop.xlane.xlu0 %1370  ;;  %v1682_v8 = vpop.xlane.xlu1 %1681 }
 0x689   : > { %v1389_v23 = vsub.f32 %v5576_v33, %v1371_v57  ;;  %v1694_v15 = vsub.f32 %v1662_v44, %v1682_v8  ;;  %4549 = vpow2.f32 %v1703_v56 }
 0x68b   : > { %v1707_v52 = vmul.f32 1.442695, %v1694_v15  ;;  %v1399_v10 = vmul.f32 1.442695, %v1389_v23 }
 0x68c   : > { %v1365_v4 = vpop.xlane.xlu0 %1364  ;;  %v1368_v33 = vpop.xlane.xlu1 %1367 }
 0x68d   : > { %v1387_v16 = vsub.f32 %v5582_v14, %v1365_v4  ;;  %4551 = vpow2.f32 %v1707_v52 }
 0x68e   : > { %v5639_v7 = vpop.eup %4543  ;;  %4553 = vpow2.f32 %v1399_v10 }
 0x68f   : > { %v1713_v18 = vsel %vm1068_vm1, %v5639_v7, 0.0  ;;  %v1395_v9 = vmul.f32 1.442695, %v1387_v16 }
 0x690   : > { %v1374_v12 = vpop.xlane.xlu0 %1373  ;;  %1714 = vadd.xlane.f32.xlu1 %v1713_v18  ;;  %v1688_v34 = vpop.xlane.xlu1 %1687 }
 0x691   : > { %4555 = vpow2.f32 %v1395_v9  ;;  %v1696_v50 = vsub.f32 %v5591_v54, %v1688_v34 }
 0x692   : > { %v5643_v13 = vpop.eup %4545 }
 0x693   : > { %v1716_v20 = vsel %vm1068_vm1, %v5643_v13, 0.0  ;;  %v5647_v17 = vpop.eup %4547  ;;  %v1711_v23 = vmul.f32 1.442695, %v1696_v50 }
 0x694   : > { %v1383_v44 = vpop.xlane.xlu0 %1382  ;;  %1717 = vadd.xlane.f32.xlu1 %v1716_v20  ;;  %v1719_v26 = vsel %vm1068_vm1, %v5647_v17, 0.0  ;;  %v1386_v34 = vpop.xlane.xlu1 %1385 }
 0x695   : > { %v1393_v14 = vsub.f32 %v5597_v53, %v1383_v44 }
 0x696   : > { %v5652_v29 = vpop.eup %4549 }
 0x697   : > { %v1407_v21 = vmul.f32 1.442695, %v1393_v14  ;;  %v1722_v53 = vsel %vm1068_vm1, %v5652_v29, 0.0 }
 0x698   : > { %v1377_v25 = vpop.xlane.xlu0 %1376  ;;  %1720 = vadd.xlane.f32.xlu1 %v1719_v26  ;;  %v1390_v26 = vsub.f32 %v5589_v22, %v1374_v12 }
 0x699   : > { %4557 = vpow2.f32 %v1407_v21  ;;  %v1391_v37 = vsub.f32 %v5605_v5, %v1377_v25  ;;  %v1693_v21 = vsub.f32 %v5574_v28, %v5634_v49 }
 0x69a   : > { %v5655_v41 = vpop.eup %4551 }
 0x69b   : > { %v1403_v43 = vmul.f32 1.442695, %v1391_v37  ;;  %v1728_v56 = vsel %vm1068_vm1, %v5655_v41, 0.0  ;;  %v5662_v57 = vpop.eup %4553  ;;  %v1705_v25 = vmul.f32 1.442695, %v1693_v21  ;;  %v1388_v37 = vsub.f32 %v5584_v48, %v1368_v33 }
 0x69c   : > { %v1685_v51 = vpop.xlane.xlu0 %1684  ;;  %1723 = vadd.xlane.f32.xlu1 %v1722_v53  ;;  %1729 = vadd.xlane.f32.xlu0 %v1728_v56  ;;  %v1417_v54 = vsel %vm1068_vm1, %v5662_v57, 0.0  ;;  %v1380_v53 = vpop.xlane.xlu1 %1379 }
 0x69d   : > { %4559 = vpow2.f32 %v1403_v43  ;;  %v1695_v8 = vsub.f32 %v5613_v11, %v1685_v51  ;;  %v1401_v43 = vmul.f32 1.442695, %v1390_v26  ;;  %v1397_v50 = vmul.f32 1.442695, %v1388_v37 }
 0x69e   : > { %v5667_v52 = vpop.eup %4555  ;;  %v1394_v51 = vsub.f32 %v5599_v55, %v1386_v34  ;;  %v1392_v28 = vsub.f32 %v5607_v6, %v1380_v53 }
 0x69f   : > { %v1709_v5 = vmul.f32 1.442695, %v1695_v8  ;;  %v1411_v10 = vsel %vm1068_vm1, %v5667_v52, 0.0 }
 0x6a0   : > { %v1466_v15 = vpop.permute.xlu0 %1465  ;;  %1418 = vadd.xlane.f32.xlu0 %v1417_v54  ;;  %v1409_v56 = vmul.f32 1.442695, %v1394_v51  ;;  %v1405_v22 = vmul.f32 1.442695, %v1392_v28 }
 0x6a1   : > { %4561 = vpow2.f32 %v1709_v5  ;;  %4124 = vmatprep.subr.bf16.mxu1 %v1466_v15 }
 0x6a2   : > { %4125 = vmatpush3.bf16.msra.mxu1 %v1466_v15  ;;  %4563 = vpow2.f32 %v1711_v23 }
 0x6a3   : > { %4565 = vpow2.f32 %v1705_v25 }
 0x6a4   : > { %1412 = vadd.xlane.f32.xlu0 %v1411_v10  ;;  %4567 = vpow2.f32 %v1401_v43 }
 0x6a5   : > { %4569 = vpow2.f32 %v1397_v50 }
 0x6a6   : > { %v5671_v11 = vpop.eup %4557  ;;  %4571 = vpow2.f32 %v1409_v56 }
 0x6a7   : > { %v1429_v4 = vsel %vm1068_vm1, %v5671_v11, 0.0  ;;  %4573 = vpow2.f32 %v1405_v22 }
 0x6a8   : > { %1430 = vadd.xlane.f32.xlu0 %v1429_v4 }
 0x6aa   : > { %v5675_v16 = vpop.eup %4559 }
 0x6ab   : > { %v1423_v18 = vsel %vm1068_vm1, %v5675_v16, 0.0 }
 0x6ac   : > { %1424 = vadd.xlane.f32.xlu0 %v1423_v18 }
 0x6ad   : > { %1463 = vrot.lane.b32.xlu1 %v5378_v24, %s5036_s28 }
 0x6ae   : > { %v5679_v9 = vpop.eup %4561 }
 0x6af   : > { %v1731_v44 = vsel %vm1068_vm1, %v5679_v9, 0.0  ;;  %v5685_v20 = vpop.eup %4563 }
 0x6b0   : > { %1732 = vadd.xlane.f32.xlu0 %v1731_v44  ;;  %v1734_v14 = vsel %vm1068_vm1, %v5685_v20, 0.0  ;;  %v5701_v48 = vpop.eup %4565 }
 0x6b1   : > { %1761 = vrot.lane.b32.xlu1 %v5378_v24, %s5037_s15  ;;  %v1725_v55 = vsel %vm1068_vm1, %v5701_v48, 0.0  ;;  %v5707_v49 = vpop.eup %4567 }
 0x6b2   : > { %v5711_v6 = vpop.eup %4569 }
 0x6b3   : > { %v5715_v12 = vpop.eup %4571 }
 0x6b4   : > { %1735 = vadd.xlane.f32.xlu0 %v1734_v14  ;;  %v5719_v33 = vpop.eup %4573 }
 0x6b5   : > { %v1426_v8 = vsel %vm1068_vm1, %v5719_v33, 0.0 }
 0x6ca   : > { %1864 = vrot.lane.b32.xlu0 %v5391_v35, %s5038_s30  ;;  %v1420_v35 = vsel %vm1068_vm1, %v5707_v49, 0.0 }
 0x6ce   : > { %1850 = vrot.lane.b32.xlu0 %v5372_v39, %s5038_s30  ;;  %v1414_v39 = vsel %vm1068_vm1, %v5711_v6, 0.0 }
 0x6d2   : > { %1854 = vrot.lane.b32.xlu0 %v5418_v46, %s5038_s30  ;;  %v1432_v46 = vsel %vm1068_vm1, %v5715_v12, 0.0 }
 0x6d5   : > { %1726 = vadd.xlane.f32.xlu1 %v1725_v55 }
 0x6d9   : > { %1421 = vadd.xlane.f32.xlu1 %v1420_v35 }
 0x6dd   : > { %1415 = vadd.xlane.f32.xlu1 %v1414_v39 }
 0x6e1   : > { %1433 = vadd.xlane.f32.xlu1 %v1432_v46 }
 0x6e5   : > { %1427 = vadd.xlane.f32.xlu1 %v1426_v8 }
 0x6f6   : > { %1757 = vrot.lane.b32.xlu1 %v5387_v32, %s5037_s15 }
 0x6fa   : > { %1862 = vrot.lane.b32.xlu1 %v5394_v36, %s5038_s30  ;;  %v1462_v36 = vpop.permute.xlu0 %1461 }
 0x6fe   : > { %1860 = vrot.lane.b32.xlu1 %v5402_v40, %s5038_s30 }
 0x702   : > { %1858 = vrot.lane.b32.xlu1 %v5408_v42, %s5038_s30 }
 0x706   : > { %1852 = vrot.lane.b32.xlu1 %v5416_v45, %s5038_s30 }
 0x70a   : > { %1856 = vrot.lane.b32.xlu1 %v5424_v47, %s5038_s30  ;;  %v1460_v47 = vpop.permute.xlu0 %1459 }
 0x70e   : > { %v1764_v14 = vpop.permute.xlu0 %1763 }
 0x712   : > { %v1760_v26 = vpop.permute.xlu0 %1759 }
 0x719   : > { %v1715_v5 = vpop.xlane.xlu1 %1714 }
 0x71a   : > { %4575 = vrcp.f32 %v1715_v5 }
 0x71d   : > { %v1718_v23 = vpop.xlane.xlu1 %1717 }
 0x71e   : > { %4577 = vrcp.f32 %v1718_v23 }
 0x721   : > { %v1721_v15 = vpop.xlane.xlu1 %1720 }
 0x722   : > { %4579 = vrcp.f32 %v1721_v15 }
 0x725   : > { %v1724_v54 = vpop.xlane.xlu1 %1723  ;;  %v1730_v34 = vpop.xlane.xlu0 %1729 }
 0x726   : > { %4581 = vrcp.f32 %v1724_v54 }
 0x727   : > { %v4576_v10 = vpop.eup %4575 }
 0x728   : > { %v5736_v42 = vmul.f32 %v4576_v10, %v5639_v7 }
 0x729   : > { %v1464_v40 = vpop.permute.xlu1 %1463  ;;  %v1419_v37 = vpop.xlane.xlu0 %1418 }
 0x72a   : > { %4126 = vmatprep.subr.bf16.mxu1 %v1464_v40 }
 0x72b   : > { %v4578_v4 = vpop.eup %4577  ;;  %4127 = vmatpush3.bf16.msra.mxu1 %v1464_v40 }
 0x72c   : > { %4128 = vmatprep.subr.bf16.mxu1 %v1462_v36  ;;  %v5739_v45 = vmul.f32 %v4578_v4, %v5643_v13 }
 0x72d   : > { %v1762_v43 = vpop.permute.xlu1 %1761  ;;  %v1413_v50 = vpop.xlane.xlu0 %1412 }
 0x72e   : > { %v1753_v18 = vpack.c.bf16 %v5739_v45, %v5736_v42 }
 0x72f   : > { %4129 = vmatpush3.bf16.msra.mxu1 %v1462_v36  ;;  %v4580_v44 = vpop.eup %4579 }
 0x730   : > { %4130 = vmatprep.subr.bf16.mxu1 %v1460_v47  ;;  %v5744_v25 = vmul.f32 %v4580_v44, %v5647_v17 }
 0x731   : > { %v1431_v56 = vpop.xlane.xlu0 %1430 }
 0x733   : > { %4131 = vmatpush3.bf16.msra.mxu1 %v1460_v47  ;;  %v4582_v21 = vpop.eup %4581 }
 0x734   : > { %4156 = vmatprep.subr.bf16.mxu1 %v1764_v14  ;;  %v5747_v7 = vmul.f32 %v4582_v21, %v5652_v29 }
 0x735   : > { %v1425_v17 = vpop.xlane.xlu0 %1424 }
 0x736   : > { %v1754_v13 = vpack.c.bf16 %v5747_v7, %v5744_v25 }
 0x739   : > { %v1733_v46 = vpop.xlane.xlu0 %1732 }
 0x73d   : > { %v1736_v4 = vpop.xlane.xlu0 %1735 }
 0x75e   : > { %v1727_v51 = vpop.xlane.xlu1 %1726 }
 0x762   : > { %v1422_v53 = vpop.xlane.xlu1 %1421 }
 0x763   : > { %4583 = vrcp.f32 %v1422_v53 }
 0x764   : > { %4585 = vrcp.f32 %v1413_v50 }
 0x765   : > { %4587 = vrcp.f32 %v1419_v37 }
 0x766   : > { %v1416_v28 = vpop.xlane.xlu1 %1415 }
 0x767   : > { %4589 = vrcp.f32 %v1416_v28 }
 0x76a   : > { %v1434_v22 = vpop.xlane.xlu1 %1433 }
 0x76b   : > { %4591 = vrcp.f32 %v1434_v22 }
 0x76c   : > { %4593 = vrcp.f32 %v1425_v17 }
 0x76d   : > { %4595 = vrcp.f32 %v1431_v56 }
 0x76e   : > { %v1428_v29 = vpop.xlane.xlu1 %1427 }
 0x76f   : > { %4597 = vrcp.f32 %v1428_v29 }
 0x770   : > { %v4584_v55 = vpop.eup %4583  ;;  %4599 = vrcp.f32 %v1727_v51 }
 0x771   : > { %v4586_v35 = vpop.eup %4585  ;;  %v1446_v5 = vmul.f32 %v4584_v55, %v5707_v49  ;;  %4601 = vrcp.f32 %v1730_v34 }
 0x772   : > { %v4588_v39 = vpop.eup %4587  ;;  %v1443_v23 = vmul.f32 %v4586_v35, %v5667_v52  ;;  %4603 = vrcp.f32 %v1736_v4 }
 0x773   : > { %v1445_v54 = vmul.f32 %v4588_v39, %v5662_v57  ;;  %4605 = vrcp.f32 %v1733_v46 }
 0x774   : > { %v4590_v8 = vpop.eup %4589 }
 0x775   : > { %v1444_v15 = vmul.f32 %v4590_v8, %v5711_v6  ;;  %v1452_v10 = vpack.c.bf16 %v1446_v5, %v1445_v54 }
 0x777   : > { %v1451_v36 = vpack.c.bf16 %v1444_v15, %v1443_v23 }
 0x778   : > { %v4592_v40 = vpop.eup %4591 }
 0x779   : > { %4132 = vmatprep.mubr.msk.bf16.mxu1 %vm1068_vm1, %v1451_v36  ;;  %v4594_v47 = vpop.eup %4593  ;;  %v1450_v52 = vmul.f32 %v4592_v40, %v5715_v12  ;;  %v1865_v12 = vpop.permute.xlu0 %1864 }
 0x77a   : > { %4133 = vmatmul.mubr.msk.bf16.vlgmr.msra.gmra.mxu1 %vm1068_vm1, %v1452_v10  ;;  %v4596_v44 = vpop.eup %4595  ;;  %v1447_v6 = vmul.f32 %v4594_v47, %v5675_v16  ;;  %v1888_v53 = vsel %vm970_vm0, %v1865_v12, 0 }
 0x77b   : > { %4157 = vmatpush3.bf16.msra.mxu1 %v1764_v14  ;;  %v1449_v21 = vmul.f32 %v4596_v44, %v5671_v11  ;;  %v1758_v14 = vpop.permute.xlu1 %1757 }
 0x77c   : > { %v4598_v49 = vpop.eup %4597  ;;  %4158 = vmatprep.subr.bf16.mxu1 %v1762_v43 }
 0x77d   : > { %v1448_v57 = vmul.f32 %v4598_v49, %v5719_v33  ;;  %v1454_v37 = vpack.c.bf16 %v1450_v52, %v1449_v21  ;;  %v4600_v50 = vpop.eup %4599 }
 0x77e   : > { %v4602_v16 = vpop.eup %4601  ;;  %v1749_v11 = vmul.f32 %v4600_v50, %v5701_v48 }
 0x77f   : > { %4159 = vmatpush3.bf16.msra.mxu1 %v1762_v43  ;;  %v1453_v34 = vpack.c.bf16 %v1448_v57, %v1447_v6  ;;  %v1750_v33 = vmul.f32 %v4602_v16, %v5655_v41  ;;  %v4604_v43 = vpop.eup %4603  ;;  %v1863_v45 = vpop.permute.xlu1 %1862 }
 0x780   : > { %4160 = vmatprep.subr.bf16.mxu1 %v1760_v26  ;;  %v4606_v42 = vpop.eup %4605  ;;  %v1752_v41 = vmul.f32 %v4604_v43, %v5685_v20  ;;  %v1885_v56 = vsel %vm970_vm0, %v1863_v45, 0 }
 0x781   : > { %4136 = vmatprep.mubr.msk.bf16.mxu1 %vm1068_vm1, %v1453_v34  ;;  %v1755_v51 = vpack.c.bf16 %v1750_v33, %v1749_v11  ;;  %v1751_v48 = vmul.f32 %v4606_v42, %v5679_v9 }
 0x782   : > { %4137 = vmatmul.mubr.msk.bf16.gmra.mxu1 %vm1068_vm1, %v1454_v37 }
 0x783   : > { %4161 = vmatpush3.bf16.msra.mxu1 %v1760_v26  ;;  %4164 = vmatprep.mubr.msk.bf16.mxu1 %vm1068_vm1, %v1753_v18  ;;  %v1756_v18 = vpack.c.bf16 %v1752_v41, %v1751_v48  ;;  %v1851_v26 = vpop.permute.xlu0 %1850  ;;  %v1861_v25 = vpop.permute.xlu1 %1860 }
 0x784   : > { %4162 = vmatprep.subr.bf16.mxu1 %v1758_v14  ;;  %v1882_v7 = vsel %vm970_vm0, %v1861_v25, 0 }
 0x787   : > { %4163 = vmatpush3.bf16.msra.mxu1 %v1758_v14  ;;  %v1855_v28 = vpop.permute.xlu0 %1854 }
 0x788   : > { %4240 = vmatprep.subr.msk.bf16.mxu1 %vm970_vm0, %v1865_v12 }
 0x78a   : > { %4165 = vmatmul.mubr.msk.bf16.vlgmr.msra.gmra.mxu1 %vm1068_vm1, %v1754_v13  ;;  %v1859_v13 = vpop.permute.xlu1 %1858 }
 0x78b   : > { %4173 = vmatpush3.bf16.xpose.msra.mxu1 %v1888_v53  ;;  %4168 = vmatprep.mubr.msk.bf16.mxu1 %vm1068_vm1, %v1755_v51  ;;  %v1879_v9 = vsel %vm970_vm0, %v1859_v13, 0 }
 0x78c   : > { %4241 = vmatprep.subr.msk.bf16.mxu1 %vm970_vm0, %v1863_v45 }
 0x78e   : > { %v1853_v20 = vpop.permute.xlu1 %1852 }
 0x792   : > { %4169 = vmatmul.mubr.msk.bf16.gmra.mxu1 %vm1068_vm1, %v1756_v18  ;;  %v1857_v17 = vpop.permute.xlu1 %1856 }
 0x793   : > { %4175 = vmatpush3.bf16.xpose.msra.mxu1 %v1885_v56  ;;  %4180 = vmatprep.mubr.msk.bf16.mxu1 %vm970_vm0, %v1851_v26 }
 0x794   : > { %4242 = vmatprep.subr.msk.bf16.mxu1 %vm970_vm0, %v1861_v25 }
 0x79b   : > { %4177 = vmatpush3.bf16.xpose.msra.mxu1 %v1882_v7 }
 0x79c   : > { %4243 = vmatprep.subr.msk.bf16.mxu1 %vm970_vm0, %v1859_v13 }
 0x7a3   : > { %4179 = vmatpush3.bf16.xpose.msra.mxu1 %v1879_v9 }
 0x7aa   : > { %4181 = vmatmul.mubr.msk.bf16.vlgmr.msra.gmra.mxu1 %vm970_vm0, %v1853_v20 }
 0x7ab   : > { %4184 = vmatprep.mubr.msk.bf16.mxu1 %vm970_vm0, %v1855_v28 }
 0x7b2   : > { %4185 = vmatmul.mubr.msk.bf16.gmra.mxu1 %vm970_vm0, %v1857_v17 }
 0x7b3   : > { %2623 = vmatprep.mubr.bf16.mxu1 %v6491_v62 }
 0x83a   : > { %v5790_v22 = vpop.f32.mrf.mxu1 }
 0x83c   : > { %v5792_v29 = vpop.f32.mrf.mxu1 }
 0x83e   : > { %v5794_v55 = vpop.f32.mrf.mxu1 }
 0x83f   : > { %v1549_v35 = vpack.c.bf16 %v5794_v55, %v5790_v22 }
 0x840   : > { %v5798_v39 = vpop.f32.mrf.mxu1 }
 0x841   : > { %v1548_v46 = vpack.c.bf16 %v5798_v39, %v5792_v29 }
 0x842   : > { %v5802_v8 = vpop.f32.mrf.mxu1 }
 0x844   : > { %v5804_v5 = vpop.f32.mrf.mxu1 }
 0x846   : > { %v5806_v23 = vpop.f32.mrf.mxu1 }
 0x847   : > { %v1551_v15 = vpack.c.bf16 %v5806_v23, %v5802_v8 }
 0x848   : > { %v5810_v54 = vpop.f32.mrf.mxu1 }
 0x849   : > { %v1550_v36 = vpack.c.bf16 %v5810_v54, %v5804_v5 }
 0x84a   : > { %v5814_v10 = vpop.f32.mrf.mxu1 }
 0x84c   : > { %v5816_v40 = vpop.f32.mrf.mxu1 }
 0x84e   : > { %v5818_v4 = vpop.f32.mrf.mxu1 }
 0x84f   : > { %v1847_v47 = vpack.c.bf16 %v5818_v4, %v5814_v10 }
 0x850   : > { %v5822_v44 = vpop.f32.mrf.mxu1 }
 0x851   : > { %v1846_v49 = vpack.c.bf16 %v5822_v44, %v5816_v40 }
 0x852   : > { %v5826_v52 = vpop.f32.mrf.mxu1 }
 0x854   : > { %v5828_v6 = vpop.f32.mrf.mxu1 }
 0x856   : > { %v5830_v57 = vpop.f32.mrf.mxu1 }
 0x857   : > { %v1849_v21 = vpack.c.bf16 %v5830_v57, %v5826_v52 }
 0x858   : > { %v5834_v34 = vpop.f32.mrf.mxu1 }
 0x859   : > { %v1848_v37 = vpack.c.bf16 %v5834_v34, %v5828_v6 }
 0x86a   : > { %v4182_v50 = vpop.f32.mrf.mxu1 }
 0x86b   : > { %v1957_v12 = vmul.f32 0.17677669, %v4182_v50 }
 0x86c   : > { %v1924_v14 = vpop.f32.mrf.mxu1 }
 0x86d   : > { %v1955_v16 = vmul.f32 0.17677669, %v1924_v14  ;;  %v1969_v45 = vsel %vm1068_vm1, %v1957_v12, -inf }
 0x86e   : > { %v4183_v11 = vpop.f32.mrf.mxu1 }
 0x86f   : > { %v1963_v33 = vsel %vm1068_vm1, %v1955_v16, -inf  ;;  %v1958_v42 = vmul.f32 0.17677669, %v4183_v11 }
 0x870   : > { %1964 = vmax.xlane.f32.xlu0 %v1963_v33  ;;  %v1927_v43 = vpop.f32.mrf.mxu1 }
 0x871   : > { %v1956_v51 = vmul.f32 0.17677669, %v1927_v43  ;;  %v1972_v56 = vsel %vm1068_vm1, %v1958_v42, -inf }
 0x872   : > { %v4186_v53 = vpop.f32.mrf.mxu1 }
 0x873   : > { %v1966_v41 = vsel %vm1068_vm1, %v1956_v51, -inf  ;;  %v1961_v13 = vmul.f32 0.17677669, %v4186_v53 }
 0x874   : > { %1970 = vmax.xlane.f32.xlu0 %v1969_v45  ;;  %1967 = vmax.xlane.f32.xlu1 %v1966_v41  ;;  %v1940_v48 = vpop.f32.mrf.mxu1 }
 0x875   : > { %v1959_v26 = vmul.f32 0.17677669, %v1940_v48  ;;  %v1981_v17 = vsel %vm1068_vm1, %v1961_v13, -inf }
 0x876   : > { %v4187_v18 = vpop.f32.mrf.mxu1 }
 0x877   : > { %v1962_v9 = vmul.f32 0.17677669, %v4187_v18  ;;  %v1975_v20 = vsel %vm1068_vm1, %v1959_v26, -inf }
 0x878   : > { %1973 = vmax.xlane.f32.xlu0 %v1972_v56  ;;  %v1943_v25 = vpop.f32.mrf.mxu1 }
 0x879   : > { %v1960_v7 = vmul.f32 0.17677669, %v1943_v25  ;;  %v1984_v50 = vsel %vm1068_vm1, %v1962_v9, -inf }
 0x87b   : > { %v1978_v28 = vsel %vm1068_vm1, %v1960_v7, -inf }
 0x87c   : > { %1976 = vmax.xlane.f32.xlu0 %v1975_v20  ;;  %1979 = vmax.xlane.f32.xlu1 %v1978_v28 }
 0x880   : > { %1982 = vmax.xlane.f32.xlu0 %v1981_v17  ;;  %1985 = vmax.xlane.f32.xlu1 %v1984_v50 }
 0x896   : > { %2061 = vrot.lane.b32.xlu0 %v5376_v19, %s5038_s30 }
 0x8f9   : > { %v1965_v14 = vpop.xlane.xlu0 %1964 }
 0x8fa   : > { %v1987_v11 = vsub.f32 %v1955_v16, %v1965_v14 }
 0x8fc   : > { %v1995_v45 = vmul.f32 1.442695, %v1987_v11 }
 0x8fd   : > { %v1971_v33 = vpop.xlane.xlu0 %1970  ;;  %v1968_v43 = vpop.xlane.xlu1 %1967 }
 0x8fe   : > { %v1989_v53 = vsub.f32 %v1957_v12, %v1971_v33  ;;  %v1988_v48 = vsub.f32 %v1956_v51, %v1968_v43 }
 0x900   : > { %v1999_v41 = vmul.f32 1.442695, %v1989_v53  ;;  %v1997_v25 = vmul.f32 1.442695, %v1988_v48 }
 0x901   : > { %v1974_v18 = vpop.xlane.xlu0 %1973 }
 0x902   : > { %4607 = vpow2.f32 %v1999_v41  ;;  %v1990_v56 = vsub.f32 %v1958_v42, %v1974_v18 }
 0x903   : > { %4609 = vpow2.f32 %v1995_v45 }
 0x904   : > { %v2001_v20 = vmul.f32 1.442695, %v1990_v56 }
 0x905   : > { %v1977_v28 = vpop.xlane.xlu0 %1976  ;;  %v1980_v17 = vpop.xlane.xlu1 %1979 }
 0x906   : > { %4611 = vpow2.f32 %v2001_v20  ;;  %v1991_v50 = vsub.f32 %v1959_v26, %v1977_v28  ;;  %v1992_v42 = vsub.f32 %v1960_v7, %v1980_v17 }
 0x907   : > { %4613 = vpow2.f32 %v1997_v25 }
 0x908   : > { %v2003_v14 = vmul.f32 1.442695, %v1991_v50  ;;  %v2005_v45 = vmul.f32 1.442695, %v1992_v42 }
 0x909   : > { %v1983_v19 = vpop.xlane.xlu0 %1982  ;;  %v1986_v62 = vpop.xlane.xlu1 %1985 }
 0x90a   : > { %v1993_v16 = vsub.f32 %v1961_v13, %v1983_v19  ;;  %v1994_v12 = vsub.f32 %v1962_v9, %v1986_v62 }
 0x90c   : > { %v2007_v38 = vmul.f32 1.442695, %v1993_v16  ;;  %v2009_v33 = vmul.f32 1.442695, %v1994_v12 }
 0x90d   : > { %v2062_v11 = vpop.permute.xlu0 %2061 }
 0x90e   : > { %4615 = vpow2.f32 %v2007_v38  ;;  %4188 = vmatprep.subr.bf16.mxu0 %v2062_v11 }
 0x90f   : > { %v5848_v51 = vpop.eup %4607  ;;  %4189 = vmatpush3.bf16.msra.mxu0 %v2062_v11  ;;  %4617 = vpow2.f32 %v2003_v14 }
 0x910   : > { %v2017_v43 = vsel %vm1068_vm1, %v5848_v51, 0.0  ;;  %v4610_v53 = vpop.eup %4609  ;;  %4619 = vpow2.f32 %v2009_v33 }
 0x911   : > { %2018 = vadd.xlane.f32.xlu0 %v2017_v43  ;;  %v2011_v13 = vsel %vm1068_vm1, %v4610_v53, 0.0  ;;  %4621 = vpow2.f32 %v2005_v45 }
 0x913   : > { %v4612_v26 = vpop.eup %4611 }
 0x914   : > { %v2020_v62 = vsel %vm1068_vm1, %v4612_v26, 0.0  ;;  %v4614_v38 = vpop.eup %4613 }
 0x915   : > { %2012 = vadd.xlane.f32.xlu0 %v2011_v13  ;;  %2021 = vadd.xlane.f32.xlu1 %v2020_v62  ;;  %v2014_v9 = vsel %vm1068_vm1, %v4614_v38, 0.0 }
 0x919   : > { %2015 = vadd.xlane.f32.xlu1 %v2014_v9  ;;  %v4407_v9 = vld [vmem:[#allocation8 + $0x38] sm:$0xff]  }
 0x91b   : > { %v5855_v7 = vpop.eup %4615 }
 0x91c   : > { %v2029_v41 = vsel %vm1068_vm1, %v5855_v7, 0.0  ;;  %v4618_v48 = vpop.eup %4617 }
 0x91d   : > { %2030 = vadd.xlane.f32.xlu1 %v2029_v41  ;;  %v2023_v18 = vsel %vm1068_vm1, %v4618_v48, 0.0  ;;  %v4620_v56 = vpop.eup %4619  ;;  %v4409_v41 = vld [vmem:[#allocation8 + $0x28] sm:$0xff]  }
 0x91e   : > { %v2032_v25 = vsel %vm1068_vm1, %v4620_v56, 0.0  ;;  %v4622_v20 = vpop.eup %4621 }
 0x91f   : > { %v2026_v28 = vsel %vm1068_vm1, %v4622_v20, 0.0 }
 0x921   : > { %2024 = vadd.xlane.f32.xlu1 %v2023_v18  ;;  %v4411_v18 = vld [vmem:[#allocation8 + $0x18] sm:$0xff]  }
 0x925   : > { %2033 = vadd.xlane.f32.xlu1 %v2032_v25  ;;  %v4414_v25 = vld [vmem:[#allocation8] sm:$0xff]  }
 0x929   : > { %2027 = vadd.xlane.f32.xlu1 %v2026_v28 }
 0x92b   : > { %2057 = vrot.lane.b32.xlu0 %v5383_v27, %s5038_s30 }
 0x92f   : > { %2055 = vrot.lane.b32.xlu0 %v5387_v32, %s5038_s30 }
 0x933   : > { %2152 = vrot.lane.b32.xlu0 %v1548_v46, %s5038_s30 }
 0x937   : > { %2164 = vrot.lane.b32.xlu0 %v1846_v49, %s5037_s15 }
 0x93a   : > { %2059 = vrot.lane.b32.xlu1 %v5378_v24, %s5038_s30 }
 0x93e   : > { %2154 = vrot.lane.b32.xlu1 %v1549_v35, %s5038_s30 }
 0x942   : > { %2166 = vrot.lane.b32.xlu1 %v1847_v47, %s5037_s15 }
 0x99a   : > { %v2019_v27 = vpop.xlane.xlu0 %2018 }
 0x99e   : > { %v2013_v32 = vpop.xlane.xlu0 %2012  ;;  %v2022_v29 = vpop.xlane.xlu1 %2021 }
 0x99f   : > { %4623 = vrcp.f32 %v2013_v32 }
 0x9a2   : > { %v2016_v39 = vpop.xlane.xlu1 %2015  ;;  %v2058_v4 = vpop.permute.xlu0 %2057 }
 0x9a3   : > { %4625 = vrcp.f32 %v2016_v39 }
 0x9a4   : > { %4627 = vrcp.f32 %v2022_v29 }
 0x9a5   : > { %4629 = vrcp.f32 %v2019_v27 }
 0x9a6   : > { %v2031_v46 = vpop.xlane.xlu1 %2030  ;;  %v2056_v19 = vpop.permute.xlu0 %2055 }
 0x9aa   : > { %v2025_v40 = vpop.xlane.xlu1 %2024  ;;  %v2153_v5 = vpop.permute.xlu0 %2152 }
 0x9ab   : > { %4631 = vrcp.f32 %v2025_v40  ;;  %v2186_v52 = vsel %vm970_vm0, %v1238_v63, %v2153_v5 }
 0x9ac   : > { %v4624_v24 = vpop.eup %4623 }
 0x9ad   : > { %v2043_v22 = vmul.f32 %v4624_v24, %v4610_v53 }
 0x9ae   : > { %v2034_v44 = vpop.xlane.xlu1 %2033  ;;  %v2165_v54 = vpop.permute.xlu0 %2164 }
 0x9af   : > { %v2197_v57 = vsel %vm1068_vm1, %v2186_v52, %v2165_v54 }
 0x9b0   : > { %v4626_v49 = vpop.eup %4625 }
 0x9b1   : > { %v2044_v55 = vmul.f32 %v4626_v49, %v4614_v38  ;;  %v4628_v17 = vpop.eup %4627 }
 0x9b2   : > { %v2028_v35 = vpop.xlane.xlu1 %2027  ;;  %v4630_v50 = vpop.eup %4629  ;;  %v2046_v16 = vmul.f32 %v4628_v17, %v4612_v26 }
 0x9b3   : > { %4633 = vrcp.f32 %v2028_v35  ;;  %v2051_v10 = vpack.c.bf16 %v2044_v55, %v2043_v22  ;;  %v2045_v12 = vmul.f32 %v4630_v50, %v5848_v51  ;;  %v4408_v51 = vld [vmem:[#allocation8 + $0x30] sm:$0xff]  }
 0x9b4   : > { %4635 = vrcp.f32 %v2034_v44 }
 0x9b5   : > { %4196 = vmatprep.mubr.msk.bf16.mxu0 %vm1068_vm1, %v2051_v10  ;;  %4637 = vrcp.f32 %v2031_v46  ;;  %v2052_v42 = vpack.c.bf16 %v2046_v16, %v2045_v12 }
 0x9b6   : > { %v2060_v47 = vpop.permute.xlu1 %2059 }
 0x9b7   : > { %4190 = vmatprep.subr.bf16.mxu0 %v2060_v47 }
 0x9b8   : > { %4191 = vmatpush3.bf16.msra.mxu0 %v2060_v47  ;;  %v4632_v14 = vpop.eup %4631 }
 0x9b9   : > { %4192 = vmatprep.subr.bf16.mxu0 %v2058_v4  ;;  %v2047_v33 = vmul.f32 %v4632_v14, %v4618_v48  ;;  %v4410_v48 = vld [vmem:[#allocation8 + $0x20] sm:$0xff]  }
 0x9ba   : > { %v2155_v23 = vpop.permute.xlu1 %2154  ;;  %v4719_v14 = vld [vmem:[%s5295_s18] sm:$0xff] }
 0x9bb   : > { %v2189_v6 = vsel %vm970_vm0, %v1239_v60, %v2155_v23  ;;  %v6541_v60 = vpack.c.bf16 %v5552_v1, %v5548_v0  ;;  %v3801_v0 = vld [vmem:[%s6477_s5] ss:$0 sm:$0xff] }
 0x9bc   : > { %4193 = vmatpush3.bf16.msra.mxu0 %v2058_v4 }
 0x9bd   : > { %4194 = vmatprep.subr.bf16.mxu0 %v2056_v19 }
 0x9c0   : > { %v4634_v11 = vpop.eup %4633  ;;  %4195 = vmatpush3.bf16.msra.mxu0 %v2056_v19 }
 0x9c1   : > { %v2048_v43 = vmul.f32 %v4634_v11, %v4622_v20  ;;  %v4636_v53 = vpop.eup %4635  ;;  %4204 = vmatprep.subr.bf16.mxu0 %v4407_v9 }
 0x9c2   : > { %v4638_v13 = vpop.eup %4637  ;;  %v2050_v62 = vmul.f32 %v4636_v53, %v4620_v56  ;;  %v4412_v56 = vld [vmem:[#allocation8 + $0x10] sm:$0xff]  }
 0x9c3   : > { %4197 = vmatmul.mubr.msk.bf16.vlgmr.msra.gmra.mxu0 %vm1068_vm1, %v2052_v42  ;;  %v2053_v45 = vpack.c.bf16 %v2048_v43, %v2047_v33  ;;  %v2049_v38 = vmul.f32 %v4638_v13, %v5855_v7  ;;  %v4413_v7 = vld [vmem:[#allocation8 + $0x8] sm:$0xff]  }
 0x9c4   : > { %4205 = vmatpush3.bf16.msra.mxu0 %v4407_v9  ;;  %v4720_v33 = vld [vmem:[%s5295_s18 + $0x10] sm:$0xff] }
 0x9c5   : > { %4200 = vmatprep.mubr.msk.bf16.mxu0 %vm1068_vm1, %v2053_v45  ;;  %v2054_v26 = vpack.c.bf16 %v2050_v62, %v2049_v38  ;;  %4206 = vmatprep.subr.bf16.mxu0 %v4408_v51  ;;  %v4721_v45 = vld [vmem:[%s5295_s18 + $0x8] sm:$0xff]  ;;  %v4722_v38 = vld [vmem:[%s5295_s18 + $0x18] sm:$0xff] }
 0x9c8   : > { %4207 = vmatpush3.bf16.msra.mxu0 %v4408_v51 }
 0x9c9   : > { %4208 = vmatprep.subr.bf16.mxu0 %v4409_v41 }
 0x9cb   : > { %4201 = vmatmul.mubr.msk.bf16.gmra.mxu0 %vm1068_vm1, %v2054_v26 }
 0x9cc   : > { %4209 = vmatpush3.bf16.msra.mxu0 %v4409_v41 }
 0x9cd   : > { %4210 = vmatprep.subr.bf16.mxu0 %v4410_v48 }
 0x9d0   : > { %4211 = vmatpush3.bf16.msra.mxu0 %v4410_v48 }
 0x9d1   : > { %4212 = vmatprep.subr.bf16.mxu0 %v4411_v18 }
 0x9d4   : > { %4213 = vmatpush3.bf16.msra.mxu0 %v4411_v18  ;;  %v4723_v18 = vld [vmem:[%s5295_s18 + $0x20] sm:$0xff] }
 0x9d5   : > { %4214 = vmatprep.subr.bf16.mxu0 %v4412_v56 }
 0x9d8   : > { %4215 = vmatpush3.bf16.msra.mxu0 %v4412_v56 }
 0x9d9   : > { %4216 = vmatprep.subr.bf16.mxu0 %v4413_v7 }
 0x9dc   : > { %4217 = vmatpush3.bf16.msra.mxu0 %v4413_v7 }
 0x9dd   : > { %4218 = vmatprep.subr.bf16.mxu0 %v4414_v25 }
 0x9e0   : > { %4219 = vmatpush3.bf16.msra.mxu0 %v4414_v25 }
 0xa83   : > { %v4198_v20 = vpop.f32.mrf.mxu0 }
 0xa85   : > { %v2113_v28 = vpop.f32.mrf.mxu0 }
 0xa87   : > { %v4199_v27 = vpop.f32.mrf.mxu0 }
 0xa88   : > { %v2145_v32 = vpack.c.bf16 %v4199_v27, %v4198_v20  ;;  %v4724_v20 = vld [vmem:[%s5295_s18 + $0x30] sm:$0xff] }
 0xa89   : > { %v2116_v29 = vpop.f32.mrf.mxu0 }
 0xa8a   : > { %v2144_v39 = vpack.c.bf16 %v2116_v29, %v2113_v28  ;;  %2178 = vrot.lane.b32.xlu1 %v2145_v32, %s5036_s28  ;;  %v4725_v32 = vld [vmem:[%s5295_s18 + $0x28] sm:$0xff] }
 0xa8b   : > { %v4202_v46 = vpop.f32.mrf.mxu0 }
 0xa8c   : > { %2176 = vrot.lane.b32.xlu0 %v2144_v39, %s5036_s28  ;;  %v4726_v39 = vld [vmem:[%s5295_s18 + $0x38] sm:$0xff] }
 0xa8d   : > { %v2129_v40 = vpop.f32.mrf.mxu0 }
 0xa8e   : > { %2158 = vrot.lane.b32.xlu1 %v1551_v15, %s5038_s30  ;;  %v2167_v15 = vpop.permute.xlu1 %2166 }
 0xa8f   : > { %v4203_v24 = vpop.f32.mrf.mxu0  ;;  %v2199_v34 = vsel %vm1068_vm1, %v2189_v6, %v2167_v15 }
 0xa90   : > { %2156 = vrot.lane.b32.xlu0 %v1550_v36, %s5038_s30  ;;  %v2147_v49 = vpack.c.bf16 %v4203_v24, %v4202_v46  ;;  %v4417_v24 = vld [vmem:[#allocation11 + $0xe4] ss:$16 sps:$4 sm:$0xff]   ;;  %s6425_s30 = scalar_lea.hbm %s6484_s12, %s3883_s10 }
 0xa91   : > { %v2132_v44 = vpop.f32.mrf.mxu0  ;;  %2591 = vmatprep.subr.bf16.mxu1 %v4417_v24  ;;  %v4453_v24 = vld [vmem:[#allocation11 + $0x24] ss:$16 sps:$4 sm:$0xff]  }
 0xa92   : > { %2170 = vrot.lane.b32.xlu1 %v1849_v21, %s5037_s15  ;;  %v2146_v8 = vpack.c.bf16 %v2132_v44, %v2129_v40  ;;  %v4415_v40 = vld [vmem:[#allocation11 + $0xe0] ss:$16 sps:$4 sm:$0xff]   ;;  %v4418_v44 = vld [vmem:[#allocation11 + $0xe8] ss:$16 sps:$4 sm:$0xff]  }
 0xa93   : > { %2592 = vmatpush1.bf16.msra.mxu1 %v4415_v40  ;;  %v4448_v40 = vld [vmem:[#allocation11 + $0x48] ss:$16 sps:$4 sm:$0xff]  }
 0xa94   : > { %2168 = vrot.lane.b32.xlu0 %v1848_v37, %s5037_s15 }
 0xa96   : > { %2182 = vrot.lane.b32.xlu1 %v2147_v49, %s5036_s28  ;;  %v4420_v49 = vld [vmem:[#allocation11 + $0xec] ss:$16 sps:$4 sm:$0xff]  }
 0xa97   : > { %2956 = vmatprep.subr.bf16.mxu0 %v4420_v49  ;;  %v4451_v49 = vld [vmem:[#allocation11 + $0x20] ss:$16 sps:$4 sm:$0xff]  }
 0xa98   : > { %2180 = vrot.lane.b32.xlu0 %v2146_v8, %s5036_s28 }
 0xafc   : > { %v2179_v36 = vpop.permute.xlu1 %2178 }
 0xafd   : > { %v2209_v22 = vsel %vm2204_vm2, %v2199_v34, %v2179_v36 }
 0xafe   : > { %v2177_v21 = vpop.permute.xlu0 %2176 }
 0xaff   : > { %v2206_v37 = vsel %vm2204_vm2, %v2197_v57, %v2177_v21 }
 0xb00   : > { %4220 = vmatprep.mubr.bf16.mxu0 %v2206_v37  ;;  %v2159_v55 = vpop.permute.xlu1 %2158 }
 0xb01   : > { %4221 = vmatmul.mubr.bf16.vlgmr.msra.gmra.mxu0 %v2209_v22  ;;  %v2195_v35 = vsel %vm970_vm0, %v6541_v60, %v2159_v55 }
 0xb02   : > { %v2157_v58 = vpop.permute.xlu0 %2156  ;;  %2957 = vmatpush1.bf16.msra.mxu0 %v4418_v44  ;;  %v4456_v44 = vld [vmem:[#allocation11 + $0x2c] ss:$16 sps:$4 sm:$0xff]  }
 0xb03   : > { %v2192_v30 = vsel %vm970_vm0, %v1240_v3, %v2157_v58 }
 0xb04   : > { %v2171_v61 = vpop.permute.xlu1 %2170 }
 0xb05   : > { %v2203_v47 = vsel %vm1068_vm1, %v2195_v35, %v2171_v61 }
 0xb06   : > { %v2169_v63 = vpop.permute.xlu0 %2168 }
 0xb07   : > { %v2201_v10 = vsel %vm1068_vm1, %v2192_v30, %v2169_v63 }
 0xb08   : > { %v2183_v59 = vpop.permute.xlu1 %2182 }
 0xb09   : > { %v2215_v31 = vsel %vm2204_vm2, %v2203_v47, %v2183_v59 }
 0xb0a   : > { %v2181_v4 = vpop.permute.xlu0 %2180 }
 0xb0b   : > { %v2212_v17 = vsel %vm2204_vm2, %v2201_v10, %v2181_v4 }
 0xb0c   : > { %4224 = vmatprep.mubr.bf16.mxu0 %v2212_v17  ;;  %v4423_v17 = vld [vmem:[#allocation11 + $0xc4] ss:$16 sps:$4 sm:$0xff]  }
 0xb0d   : > { %4225 = vmatmul.mubr.bf16.gmra.mxu0 %v2215_v31  ;;  %v4426_v31 = vld [vmem:[#allocation11 + $0xcc] ss:$16 sps:$4 sm:$0xff]   ;;  %2593 = vmatprep.subr.bf16.mxu1 %v4423_v17 }
 0xb0e   : > { %2988 = vmatprep.mubr.bf16.mxu0 %v6542_v2  ;;  %2958 = vmatprep.subr.bf16.mxu0 %v4426_v31 }
 0xbc1   : > { %v4222_v3 = vpop.f32.mrf.mxu0 }
 0xbc2   : > { %v2331_v16 = vadd.f32 %v4222_v3, %v3801_v0 }
 0xbc3   : > { %v2322_v1 = vpop.f32.mrf.mxu0 }
 0xbc4   : > { %v2323_v50 = vadd.f32 %v3801_v0, %v2322_v1  ;;  %v5943_v43 = vadd.f32 %v4720_v33, %v2331_v16  ;;  %v4421_v1 = vld [vmem:[#allocation11 + $0xc0] ss:$16 sps:$4 sm:$0xff]   ;;  %v4432_v33 = vld [vmem:[#allocation11 + $0xac] ss:$16 sps:$4 sm:$0xff]  }
 0xbc5   : > { %v4223_v19 = vpop.f32.mrf.mxu0  ;;  %2594 = vmatpush1.bf16.msra.mxu1 %v4421_v1 }
 0xbc6   : > { %v5939_v12 = vadd.f32 %v4719_v14, %v2323_v50  ;;  %6544 = vst [vmem:[#allocation24_spill] sm:$0xff] %v5943_v43  ;;  %v2334_v53 = vadd.f32 %v4223_v19, %v3801_v0  ;;  %v4424_v50 = vld [vmem:[#allocation11 + $0xc8] ss:$16 sps:$4 sm:$0xff]  }
 0xbc7   : > { %v2325_v11 = vpop.f32.mrf.mxu0  ;;  %2959 = vmatpush1.bf16.msra.mxu0 %v4424_v50 }
 0xbc8   : > { %6543 = vst [vmem:[#allocation23_spill] sm:$0xff] %v5939_v12  ;;  %v2326_v42 = vadd.f32 %v3801_v0, %v2325_v11  ;;  %2363 = vadd.xlane.f32.xlu0 %v5939_v12  ;;  %v5951_v26 = vadd.f32 %v4722_v38, %v2334_v53  ;;  %2960 = vmatprep.subr.bf16.mxu0 %v4432_v33 }
 0xbca   : > { %v5946_v13 = vadd.f32 %v4721_v45, %v2326_v42  ;;  %6546 = vst [vmem:[#allocation26_spill] sm:$0xff] %v5951_v26  ;;  %v4429_v42 = vld [vmem:[#allocation11 + $0xa4] ss:$16 sps:$4 sm:$0xff]   ;;  %v4427_v45 = vld [vmem:[#allocation11 + $0xa0] ss:$16 sps:$4 sm:$0xff]  }
 0xbcb   : > { %2595 = vmatprep.subr.bf16.mxu1 %v4429_v42 }
 0xbcc   : > { %6545 = vst [vmem:[#allocation25_spill] sm:$0xff] %v5946_v13  ;;  %2365 = vadd.xlane.f32.xlu1 %v5946_v13  ;;  %2367 = vadd.xlane.f32.xlu0 %v5943_v43 }
 0xbcd   : > { %v4226_v62 = vpop.f32.mrf.mxu0  ;;  %2596 = vmatpush1.bf16.msra.mxu1 %v4427_v45  ;;  %v3810_v45 = vld [vmem:[%s6478_s6] ss:$0 sm:$0xff] }
 0xbce   : > { %v2347_v48 = vadd.f32 %v4226_v62, %v3801_v0  ;;  %v4430_v62 = vld [vmem:[#allocation11 + $0xa8] ss:$16 sps:$4 sm:$0xff]  }
 0xbcf   : > { %v2338_v9 = vpop.f32.mrf.mxu0  ;;  %2961 = vmatpush1.bf16.msra.mxu0 %v4430_v62 }
 0xbd0   : > { %v2339_v51 = vadd.f32 %v3801_v0, %v2338_v9  ;;  %2369 = vadd.xlane.f32.xlu0 %v5951_v26  ;;  %v5959_v28 = vadd.f32 %v4724_v20, %v2347_v48  ;;  %v4435_v9 = vld [vmem:[#allocation11 + $0x84] ss:$16 sps:$4 sm:$0xff]   ;;  %v4436_v48 = vld [vmem:[#allocation11 + $0x88] ss:$16 sps:$4 sm:$0xff]  }
 0xbd1   : > { %v4227_v41 = vpop.f32.mrf.mxu0  ;;  %2597 = vmatprep.subr.bf16.mxu1 %v4435_v9  ;;  %v4442_v20 = vld [vmem:[#allocation11 + $0x68] ss:$16 sps:$4 sm:$0xff]  }
 0xbd2   : > { %v5955_v56 = vadd.f32 %v4723_v18, %v2339_v51  ;;  %6548 = vst [vmem:[#allocation28_spill] sm:$0xff] %v5959_v28  ;;  %v2350_v27 = vadd.f32 %v4227_v41, %v3801_v0  ;;  %v4438_v51 = vld [vmem:[#allocation11 + $0x8c] ss:$16 sps:$4 sm:$0xff]   ;;  %v4433_v41 = vld [vmem:[#allocation11 + $0x80] ss:$16 sps:$4 sm:$0xff]  }
 0xbd3   : > { %v2341_v7 = vpop.f32.mrf.mxu0  ;;  %2962 = vmatprep.subr.bf16.mxu0 %v4438_v51  ;;  %2598 = vmatpush1.bf16.msra.mxu1 %v4433_v41  ;;  %v4441_v18 = vld [vmem:[#allocation11 + $0x64] ss:$16 sps:$4 sm:$0xff]  }
 0xbd4   : > { %6547 = vst [vmem:[#allocation27_spill] sm:$0xff] %v5955_v56  ;;  %v2342_v25 = vadd.f32 %v3801_v0, %v2341_v7  ;;  %2371 = vadd.xlane.f32.xlu0 %v5955_v56  ;;  %v5967_v46 = vadd.f32 %v4726_v39, %v2350_v27  ;;  %2963 = vmatpush1.bf16.msra.mxu0 %v4436_v48  ;;  %v4444_v7 = vld [vmem:[#allocation11 + $0x6c] ss:$16 sps:$4 sm:$0xff]   ;;  %v4447_v27 = vld [vmem:[#allocation11 + $0x44] ss:$16 sps:$4 sm:$0xff]  }
 0xbd5   : > { %2599 = vmatprep.subr.bf16.mxu1 %v4441_v18  ;;  %2964 = vmatprep.subr.bf16.mxu0 %v4444_v7  ;;  %v4445_v39 = vld [vmem:[#allocation11 + $0x40] ss:$16 sps:$4 sm:$0xff]   ;;  %v3811_v18 = vld [vmem:[#allocation10] ss:$0 sm:$0xff] }
 0xbd6   : > { %v5962_v29 = vadd.f32 %v4725_v32, %v2342_v25  ;;  %6550 = vst [vmem:[#allocation30_spill] sm:$0xff] %v5967_v46  ;;  %v4439_v25 = vld [vmem:[#allocation11 + $0x60] ss:$16 sps:$4 sm:$0xff]   ;;  %v4450_v32 = vld [vmem:[#allocation11 + $0x4c] ss:$16 sps:$4 sm:$0xff]  }
 0xbd7   : > { %2600 = vmatpush1.bf16.msra.mxu1 %v4439_v25 }
 0xbd8   : > { %6549 = vst [vmem:[#allocation29_spill] sm:$0xff] %v5962_v29  ;;  %2373 = vadd.xlane.f32.xlu1 %v5962_v29  ;;  %2375 = vadd.xlane.f32.xlu0 %v5959_v28 }
 0xbd9   : > { %2965 = vmatpush1.bf16.msra.mxu0 %v4442_v20  ;;  %2601 = vmatprep.subr.bf16.mxu1 %v4447_v27 }
 0xbda   : > { %2966 = vmatprep.subr.bf16.mxu0 %v4450_v32 }
 0xbdb   : > { %2602 = vmatpush1.bf16.msra.mxu1 %v4445_v39 }
 0xbdc   : > { %2377 = vadd.xlane.f32.xlu1 %v5967_v46  ;;  %2603 = vmatprep.subr.bf16.mxu1 %v4453_v24 }
 0xbdd   : > { %2967 = vmatpush1.bf16.msra.mxu0 %v4448_v40 }
 0xbde   : > { %2968 = vmatprep.subr.bf16.mxu0 %v4456_v44 }
 0xbdf   : > { %2604 = vmatpush1.bf16.msra.mxu1 %v4451_v49 }
 0xc51   : > { %v2364_v8 = vpop.xlane.xlu0 %2363 }
 0xc52   : > { %v2379_v23 = vmul.f32 0.0078125, %v2364_v8  ;;  %v4454_v8 = vld [vmem:[#allocation11 + $0x28] ss:$16 sps:$4 sm:$0xff]  }
 0xc53   : > { %2969 = vmatpush1.bf16.msra.mxu0 %v4454_v8 }
 0xc54   : > { %v5971_v5 = vsub.f32 %v5939_v12, %v2379_v23  ;;  %v4457_v23 = vld [vmem:[#allocation11] ss:$16 sps:$4 sm:$0xff]  }
 0xc55   : > { %v2368_v15 = vpop.xlane.xlu0 %2367  ;;  %v2366_v54 = vpop.xlane.xlu1 %2365 }
 0xc56   : > { %v2381_v36 = vmul.f32 0.0078125, %v2368_v15  ;;  %v2380_v52 = vmul.f32 0.0078125, %v2366_v54  ;;  %v2395_v57 = vmul.f32 %v5971_v5, %v5971_v5  ;;  %v4459_v15 = vld [vmem:[#allocation11 + $0x4] ss:$16 sps:$4 sm:$0xff]   ;;  %v4460_v54 = vld [vmem:[#allocation11 + $0x8] ss:$16 sps:$4 sm:$0xff]  }
 0xc57   : > { %2605 = vmatprep.subr.bf16.mxu1 %v4459_v15 }
 0xc58   : > { %v5976_v6 = vsub.f32 %v5943_v43, %v2381_v36  ;;  %v5979_v21 = vsub.f32 %v5946_v13, %v2380_v52  ;;  %2403 = vadd.xlane.f32.xlu0 %v2395_v57  ;;  %v4462_v36 = vld [vmem:[#allocation11 + $0xc] ss:$16 sps:$4 sm:$0xff]   ;;  %2606 = vmatpush1.bf16.msra.mxu1 %v4457_v23 }
 0xc59   : > { %v2370_v34 = vpop.xlane.xlu0 %2369  ;;  %2970 = vmatprep.subr.bf16.mxu0 %v4462_v36 }
 0xc5a   : > { %v2382_v37 = vmul.f32 0.0078125, %v2370_v34  ;;  %v2397_v22 = vmul.f32 %v5976_v6, %v5976_v6  ;;  %v2396_v55 = vmul.f32 %v5979_v21, %v5979_v21  ;;  %2971 = vmatpush1.bf16.msra.mxu0 %v4460_v54 }
 0xc5c   : > { %v5986_v58 = vsub.f32 %v5951_v26, %v2382_v37  ;;  %2407 = vadd.xlane.f32.xlu0 %v2397_v22  ;;  %2405 = vadd.xlane.f32.xlu1 %v2396_v55 }
 0xc5d   : > { %v2372_v61 = vpop.xlane.xlu0 %2371 }
 0xc5e   : > { %v2383_v63 = vmul.f32 0.0078125, %v2372_v61  ;;  %v2398_v30 = vmul.f32 %v5986_v58, %v5986_v58 }
 0xc60   : > { %v5991_v59 = vsub.f32 %v5955_v56, %v2383_v63  ;;  %2409 = vadd.xlane.f32.xlu1 %v2398_v30 }
 0xc61   : > { %v2376_v60 = vpop.xlane.xlu0 %2375  ;;  %v2374_v35 = vpop.xlane.xlu1 %2373 }
 0xc62   : > { %v2385_v10 = vmul.f32 0.0078125, %v2376_v60  ;;  %v2384_v4 = vmul.f32 0.0078125, %v2374_v35  ;;  %v2399_v47 = vmul.f32 %v5991_v59, %v5991_v59 }
 0xc64   : > { %v5996_v3 = vsub.f32 %v5959_v28, %v2385_v10  ;;  %v5999_v0 = vsub.f32 %v5962_v29, %v2384_v4  ;;  %2411 = vadd.xlane.f32.xlu0 %v2399_v47 }
 0xc65   : > { %v2378_v19 = vpop.xlane.xlu1 %2377 }
 0xc66   : > { %v2386_v16 = vmul.f32 0.0078125, %v2378_v19  ;;  %v2401_v14 = vmul.f32 %v5996_v3, %v5996_v3  ;;  %v2400_v11 = vmul.f32 %v5999_v0, %v5999_v0 }
 0xc68   : > { %v6006_v53 = vsub.f32 %v5967_v46, %v2386_v16  ;;  %2415 = vadd.xlane.f32.xlu0 %v2401_v14  ;;  %2413 = vadd.xlane.f32.xlu1 %v2400_v11 }
 0xc6a   : > { %v2402_v38 = vmul.f32 %v6006_v53, %v6006_v53 }
 0xc6c   : > { %2417 = vadd.xlane.f32.xlu1 %v2402_v38 }
 0xce1   : > { %v2404_v52 = vpop.xlane.xlu0 %2403 }
 0xce2   : > { %v2419_v57 = vmul.f32 0.0078125, %v2404_v52 }
 0xce4   : > { %v2427_v34 = vadd.f32 1e-05, %v2419_v57 }
 0xce5   : > { %v2408_v37 = vpop.xlane.xlu0 %2407  ;;  %v2406_v22 = vpop.xlane.xlu1 %2405 }
 0xce6   : > { %4639 = vrsqrt.f32 %v2427_v34  ;;  %v2421_v55 = vmul.f32 0.0078125, %v2408_v37  ;;  %v2420_v61 = vmul.f32 0.0078125, %v2406_v22 }
 0xce8   : > { %v2428_v63 = vadd.f32 1e-05, %v2420_v61  ;;  %v2429_v30 = vadd.f32 1e-05, %v2421_v55 }
 0xce9   : > { %v2410_v60 = vpop.xlane.xlu1 %2409 }
 0xcea   : > { %v2422_v35 = vmul.f32 0.0078125, %v2410_v60  ;;  %4641 = vrsqrt.f32 %v2428_v63  ;;  %v4463_v60 = vld [vmem:[#allocation13 + $0xf8] sm:$0xff]  }
 0xceb   : > { %4643 = vrsqrt.f32 %v2429_v30  ;;  %3972 = vmatprep.subr.bf16.mxu1 %v4463_v60 }
 0xcec   : > { %v2430_v10 = vadd.f32 1e-05, %v2422_v35  ;;  %v4464_v35 = vld [vmem:[#allocation13 + $0x78] sm:$0xff]  }
 0xced   : > { %v2412_v4 = vpop.xlane.xlu0 %2411  ;;  %4012 = vmatprep.subr.bf16.mxu0 %v4464_v35 }
 0xcee   : > { %4645 = vrsqrt.f32 %v2430_v10  ;;  %v2423_v47 = vmul.f32 0.0078125, %v2412_v4  ;;  %v4466_v10 = vld [vmem:[#allocation13 + $0x38] sm:$0xff]   ;;  %v4468_v4 = vld [vmem:[#allocation13 + $0x70] sm:$0xff]  }
 0xcf0   : > { %v2431_v17 = vadd.f32 1e-05, %v2423_v47  ;;  %v4469_v47 = vld [vmem:[#allocation13 + $0xb0] sm:$0xff]  }
 0xcf1   : > { %v2414_v31 = vpop.xlane.xlu1 %2413  ;;  %v2416_v1 = vpop.xlane.xlu0 %2415 }
 0xcf2   : > { %v2424_v50 = vmul.f32 0.0078125, %v2414_v31  ;;  %4647 = vrsqrt.f32 %v2431_v17  ;;  %v2425_v11 = vmul.f32 0.0078125, %v2416_v1  ;;  %v4470_v17 = vld [vmem:[#allocation13 + $0x30] sm:$0xff]   ;;  %v4472_v31 = vld [vmem:[#allocation13 + $0x68] sm:$0xff]  }
 0xcf3   : > { %v4640_v19 = vpop.eup %4639  ;;  %v4473_v1 = vld [vmem:[#allocation13 + $0xa8] sm:$0xff]  }
 0xcf4   : > { %v2432_v16 = vadd.f32 1e-05, %v2424_v50  ;;  %v2443_v14 = vmul.f32 %v4640_v19, %v5971_v5  ;;  %v2433_v51 = vadd.f32 1e-05, %v2425_v11  ;;  %v4474_v50 = vld [vmem:[#allocation13 + $0x28] sm:$0xff]   ;;  %v4475_v19 = vld [vmem:[#allocation13 + $0xe0] sm:$0xff]  }
 0xcf5   : > { %v2418_v42 = vpop.xlane.xlu1 %2417  ;;  %v4478_v11 = vld [vmem:[#allocation13 + $0x20] sm:$0xff]  }
 0xcf6   : > { %v2426_v33 = vmul.f32 0.0078125, %v2418_v42  ;;  %4649 = vrsqrt.f32 %v2432_v16  ;;  %v2457_v41 = vmul.f32 %v3810_v45, %v2443_v14  ;;  %v4476_v16 = vld [vmem:[#allocation13 + $0x60] sm:$0xff]   ;;  %v4479_v42 = vld [vmem:[#allocation13 + $0xd8] sm:$0xff]  }
 0xcf7   : > { %v4642_v62 = vpop.eup %4641  ;;  %v4477_v14 = vld [vmem:[#allocation13 + $0xa0] sm:$0xff]  }
 0xcf8   : > { %v2434_v38 = vadd.f32 1e-05, %v2426_v33  ;;  %v2444_v9 = vmul.f32 %v4642_v62, %v5979_v21  ;;  %v4644_v48 = vpop.eup %4643  ;;  %v2471_v20 = vadd.f32 %v3811_v18, %v2457_v41  ;;  %v4480_v33 = vld [vmem:[#allocation13 + $0x58] sm:$0xff]   ;;  %v4486_v41 = vld [vmem:[#allocation13 + $0x10] sm:$0xff]  }
 0xcf9   : > { %v2445_v32 = vmul.f32 %v4644_v48, %v5976_v6  ;;  %v4482_v62 = vld [vmem:[#allocation13 + $0x18] sm:$0xff]   ;;  %v4487_v48 = vld [vmem:[#allocation13 + $0xc8] sm:$0xff]  }
 0xcfa   : > { %4651 = vrsqrt.f32 %v2434_v38  ;;  %v2458_v5 = vmul.f32 %v3810_v45, %v2444_v9  ;;  %v4483_v38 = vld [vmem:[#allocation13 + $0xd0] sm:$0xff]  }
 0xcfb   : > { %v4646_v7 = vpop.eup %4645  ;;  %4653 = vrsqrt.f32 %v2433_v51  ;;  %v2459_v24 = vmul.f32 %v3810_v45, %v2445_v32  ;;  %v4484_v9 = vld [vmem:[#allocation13 + $0x50] sm:$0xff]   ;;  %v4494_v32 = vld [vmem:[#allocation13] sm:$0xff]  }
 0xcfc   : > { %v2446_v25 = vmul.f32 %v4646_v7, %v5986_v58  ;;  %v2472_v27 = vadd.f32 %v3811_v18, %v2458_v5  ;;  %v4485_v51 = vld [vmem:[#allocation13 + $0x90] sm:$0xff]   ;;  %v4489_v7 = vld [vmem:[#allocation13 + $0x88] sm:$0xff]  }
 0xcfd   : > { %v2473_v8 = vadd.f32 %v3811_v18, %v2459_v24  ;;  %v4490_v5 = vld [vmem:[#allocation13 + $0x8] sm:$0xff]  }
 0xcfe   : > { %v2479_v39 = vpack.c.bf16 %v2472_v27, %v2471_v20  ;;  %v2460_v40 = vmul.f32 %v3810_v45, %v2446_v25  ;;  %v4491_v25 = vld [vmem:[#allocation13 + $0xc0] sm:$0xff]  }
 0xcff   : > { %v4648_v21 = vpop.eup %4647  ;;  %v4492_v20 = vld [vmem:[#allocation13 + $0x40] sm:$0xff]  }
 0xd00   : > { %2624 = vmatmul.mubr.bf16.vlgmr.msra.gmra.mxu1 %v2479_v39  ;;  %2989 = vmatmul.mubr.bf16.vlgmr.msra.gmra.mxu0 %v2479_v39  ;;  %v2474_v44 = vadd.f32 %v3811_v18, %v2460_v40  ;;  %v2447_v58 = vmul.f32 %v4648_v21, %v5991_v59  ;;  %v4493_v27 = vld [vmem:[#allocation13 + $0x80] sm:$0xff]   ;;  %v2501_v39 = vlaneseq  ;;  %v2499_v21 = vld [vmem:[%s6481_s9] sm:$0x3] }
 0xd01   : > { %2633 = vmatprep.mubr.bf16.mxu1 %v6542_v2  ;;  %2998 = vmatprep.mubr.bf16.mxu0 %v6542_v2 }
 0xd02   : > { %v2480_v15 = vpack.c.bf16 %v2474_v44, %v2473_v8  ;;  %v2461_v36 = vmul.f32 %v3810_v45, %v2447_v58  ;;  %4013 = vmatpush3.bf16.msra.mxu0 %v4466_v10  ;;  %v2502_v40 = vshrl.u32 %v2501_v39, 7  ;;  %v2864_v44 = vld [vmem:[%s6481_s9 + $0x2] sm:$0x3] }
 0xd03   : > { %v4650_v49 = vpop.eup %4649  ;;  %4014 = vmatprep.subr.bf16.mxu0 %v4468_v4 }
 0xd04   : > { %v2448_v23 = vmul.f32 %v4650_v49, %v5999_v0  ;;  %v2475_v37 = vadd.f32 %v3811_v18, %v2461_v36  ;;  %v2503_v24 = vsub.s32 0, %v2502_v40  ;;  %v2507_v49 = vsub.s32 1, %v2502_v40 }
 0xd06   : > { %v2462_v54 = vmul.f32 %v3810_v45, %v2448_v23  ;;  %4015 = vmatpush3.bf16.msra.mxu0 %v4470_v17  ;;  %v6033_v8 = vrot.slane %v2499_v21, %v2503_v24  ;;  %v6035_v58 = vrot.slane %v2864_v44, %v2503_v24 }
 0xd07   : > { %v4652_v6 = vpop.eup %4651  ;;  %4016 = vmatprep.subr.bf16.mxu0 %v4472_v31 }
 0xd08   : > { %2634 = vmatmul.mubr.bf16.gmra.mxu1 %v2480_v15  ;;  %2999 = vmatmul.mubr.bf16.gmra.mxu0 %v2480_v15  ;;  %v4654_v52 = vpop.eup %4653  ;;  %v2476_v57 = vadd.f32 %v3811_v18, %v2462_v54  ;;  %v2450_v34 = vmul.f32 %v4652_v6, %v6006_v53  ;;  %v4465_v53 = vld [vmem:[#allocation13 + $0xb8] sm:$0xff]   ;;  %v6037_v54 = vrot.slane %v2499_v21, %v2507_v49 }
 0xd09   : > { %2643 = vmatprep.mubr.bf16.mxu1 %v6542_v2  ;;  %3008 = vmatprep.mubr.bf16.mxu0 %v6542_v2  ;;  %v2449_v22 = vmul.f32 %v4654_v52, %v5996_v3  ;;  %v4467_v3 = vld [vmem:[#allocation13 + $0xf0] sm:$0xff]   ;;  %v6039_v6 = vrot.slane %v2864_v44, %v2507_v49 }
 0xd0a   : > { %v2481_v59 = vpack.c.bf16 %v2476_v57, %v2475_v37  ;;  %v2464_v55 = vmul.f32 %v3810_v45, %v2450_v34  ;;  %3973 = vmatpush3.bf16.msra.mxu1 %v4465_v53  ;;  %4017 = vmatpush3.bf16.msra.mxu0 %v4474_v50 }
 0xd0b   : > { %v2463_v0 = vmul.f32 %v3810_v45, %v2449_v22  ;;  %3974 = vmatprep.subr.bf16.mxu1 %v4467_v3  ;;  %4018 = vmatprep.subr.bf16.mxu0 %v4476_v16  ;;  %v4481_v45 = vld [vmem:[#allocation13 + $0x98] sm:$0xff]  }
 0xd0c   : > { %v2478_v61 = vadd.f32 %v3811_v18, %v2464_v55 }
 0xd0d   : > { %v2477_v63 = vadd.f32 %v3811_v18, %v2463_v0  ;;  %v4488_v18 = vld [vmem:[#allocation13 + $0x48] sm:$0xff]  }
 0xd0e   : > { %3975 = vmatpush3.bf16.msra.mxu1 %v4469_v47  ;;  %4019 = vmatpush3.bf16.msra.mxu0 %v4478_v11 }
 0xd0f   : > { %v2482_v30 = vpack.c.bf16 %v2478_v61, %v2477_v63  ;;  %4020 = vmatprep.subr.bf16.mxu0 %v4480_v33 }
 0xd10   : > { %2644 = vmatmul.mubr.bf16.gmra.mxu1 %v2481_v59  ;;  %3009 = vmatmul.mubr.bf16.gmra.mxu0 %v2481_v59 }
 0xd11   : > { %2653 = vmatprep.mubr.bf16.mxu1 %v6542_v2  ;;  %3018 = vmatprep.mubr.bf16.mxu0 %v6542_v2  ;;  %v4471_v2 = vld [vmem:[#allocation13 + $0xe8] sm:$0xff]  }
 0xd12   : > { %3976 = vmatprep.subr.bf16.mxu1 %v4471_v2  ;;  %4021 = vmatpush3.bf16.msra.mxu0 %v4482_v62 }
 0xd13   : > { %3977 = vmatpush3.bf16.msra.mxu1 %v4473_v1  ;;  %4022 = vmatprep.subr.bf16.mxu0 %v4484_v9 }
 0xd14   : > { %3978 = vmatprep.subr.bf16.mxu1 %v4475_v19 }
 0xd16   : > { %4023 = vmatpush3.bf16.msra.mxu0 %v4486_v41 }
 0xd17   : > { %3979 = vmatpush3.bf16.msra.mxu1 %v4477_v14  ;;  %4024 = vmatprep.subr.bf16.mxu0 %v4488_v18 }
 0xd18   : > { %2654 = vmatmul.mubr.bf16.gmra.mxu1 %v2482_v30  ;;  %3019 = vmatmul.mubr.bf16.gmra.mxu0 %v2482_v30 }
 0xd19   : > { %3980 = vmatprep.subr.bf16.mxu1 %v4479_v42 }
 0xd1a   : > { %4025 = vmatpush3.bf16.msra.mxu0 %v4490_v5 }
 0xd1b   : > { %3981 = vmatpush3.bf16.msra.mxu1 %v4481_v45  ;;  %4026 = vmatprep.subr.bf16.mxu0 %v4492_v20 }
 0xd1c   : > { %3982 = vmatprep.subr.bf16.mxu1 %v4483_v38 }
 0xd1e   : > { %4027 = vmatpush3.bf16.msra.mxu0 %v4494_v32 }
 0xd1f   : > { %3983 = vmatpush3.bf16.msra.mxu1 %v4485_v51 }
 0xd20   : > { %3984 = vmatprep.subr.bf16.mxu1 %v4487_v48 }
 0xd23   : > { %3985 = vmatpush3.bf16.msra.mxu1 %v4489_v7 }
 0xd24   : > { %3986 = vmatprep.subr.bf16.mxu1 %v4491_v25 }
 0xd27   : > { %3987 = vmatpush3.bf16.msra.mxu1 %v4493_v27 }
 0xdc0   : > { %v2625_v23 = vpop.f32.mrf.mxu1  ;;  %v2990_v15 = vpop.f32.mrf.mxu0 }
 0xdc1   : > { %v2626_v36 = vadd.f32 %v2625_v23, %v6033_v8  ;;  %v2991_v52 = vadd.f32 %v2990_v15, %v6035_v58 }
 0xdc2   : > { %v2627_v57 = vpop.f32.mrf.mxu1  ;;  %v2992_v34 = vpop.f32.mrf.mxu0 }
 0xdc3   : > { %v2680_v37 = vmul.f32 0.044715, %v2626_v36  ;;  %v3045_v22 = vmul.f32 0.044715, %v2991_v52  ;;  %v6044_v59 = vadd.f32 %v2627_v57, %v6037_v54  ;;  %v6047_v55 = vadd.f32 %v2992_v34, %v6039_v6 }
 0xdc4   : > { %v2629_v0 = vpop.f32.mrf.mxu1  ;;  %v2994_v61 = vpop.f32.mrf.mxu0  ;;  %v6056_v11 = vmul.f32 0.5, %v2626_v36  ;;  %v6061_v38 = vmul.f32 0.5, %v2991_v52 }
 0xdc5   : > { %v2696_v63 = vmul.f32 %v2680_v37, %v2626_v36  ;;  %v3061_v30 = vmul.f32 %v3045_v22, %v2991_v52  ;;  %v2630_v60 = vadd.f32 %v2629_v0, %v6033_v8  ;;  %v2995_v35 = vadd.f32 %v2994_v61, %v6035_v58 }
 0xdc6   : > { %v2631_v53 = vpop.f32.mrf.mxu1  ;;  %v2996_v10 = vpop.f32.mrf.mxu0  ;;  %v2681_v17 = vmul.f32 0.044715, %v6044_v59  ;;  %v3046_v19 = vmul.f32 0.044715, %v6047_v55  ;;  %v6064_v41 = vmul.f32 0.5, %v6047_v55  ;;  %v6082_v15 = vmul.f32 0.5, %v6044_v59 }
 0xdc7   : > { %v2712_v3 = vmul.f32 %v2696_v63, %v2626_v36  ;;  %v3077_v4 = vmul.f32 %v3061_v30, %v2991_v52  ;;  %v2682_v47 = vmul.f32 0.044715, %v2630_v60  ;;  %v3047_v2 = vmul.f32 0.044715, %v2995_v35 }
 0xdc8   : > { %v2635_v31 = vpop.f32.mrf.mxu1  ;;  %v3000_v1 = vpop.f32.mrf.mxu0  ;;  %v6054_v14 = vadd.f32 %v2631_v53, %v6037_v54  ;;  %v6059_v33 = vadd.f32 %v2996_v10, %v6039_v6  ;;  %6551 = vst [vmem:[#allocation31_spill] sm:$0xff] %v6064_v41  ;;  %v2697_v48 = vmul.f32 %v2681_v17, %v6044_v59  ;;  %v3062_v32 = vmul.f32 %v3046_v19, %v6047_v55 }
 0xdc9   : > { %v2728_v50 = vadd.f32 %v2712_v3, %v2626_v36  ;;  %v2698_v16 = vmul.f32 %v2682_v47, %v2630_v60  ;;  %v3063_v42 = vmul.f32 %v3047_v2, %v2995_v35  ;;  %v3093_v9 = vadd.f32 %v3077_v4, %v2991_v52  ;;  %6553 = vst [vmem:[#allocation33_spill] sm:$0xff] %v6082_v15 }
 0xdca   : > { %v2637_v45 = vpop.f32.mrf.mxu1  ;;  %v3002_v62 = vpop.f32.mrf.mxu0  ;;  %v6068_v7 = vadd.f32 %v2635_v31, %v6033_v8  ;;  %v6071_v5 = vadd.f32 %v3000_v1, %v6035_v58  ;;  %v2683_v39 = vmul.f32 0.044715, %v6054_v14  ;;  %v6078_v24 = vmul.f32 0.5, %v2630_v60 }
 0xdcb   : > { %v2714_v51 = vmul.f32 %v2698_v16, %v2630_v60  ;;  %v3079_v18 = vmul.f32 %v3063_v42, %v2995_v35  ;;  %v2744_v27 = vmul.f32 0.7978846, %v2728_v50  ;;  %v6076_v40 = vadd.f32 %v2637_v45, %v6037_v54 }
 0xdcc   : > { %v2639_v25 = vpop.f32.mrf.mxu1  ;;  %v3004_v20 = vpop.f32.mrf.mxu0  ;;  %6552 = vst [vmem:[#allocation32_spill] sm:$0xff] %v6078_v24  ;;  %v3048_v44 = vmul.f32 0.044715, %v6059_v33  ;;  %v3109_v36 = vmul.f32 0.7978846, %v3093_v9  ;;  %v6084_v52 = vmul.f32 0.5, %v2995_v35  ;;  %v6088_v37 = vmul.f32 %v2697_v48, %v6044_v59 }
 0xdcd   : > { %v2730_v21 = vadd.f32 %v2714_v51, %v2630_v60  ;;  %v3095_v57 = vadd.f32 %v3079_v18, %v2995_v35  ;;  %v2684_v34 = vmul.f32 0.044715, %v6068_v7  ;;  %v3049_v22 = vmul.f32 0.044715, %v6071_v5 }
 0xdce   : > { %v2641_v49 = vpop.f32.mrf.mxu1  ;;  %v3006_v23 = vpop.f32.mrf.mxu0  ;;  %v2685_v0 = vmul.f32 0.044715, %v6076_v40  ;;  %v6093_v61 = vadd.f32 %v3002_v62, %v6039_v6  ;;  %4655 = vtanh.f32 %v2744_v27  ;;  %v6096_v60 = vmul.f32 %v3062_v32, %v6047_v55 }
 0xdcf   : > { %v2699_v35 = vmul.f32 %v2683_v39, %v6054_v14  ;;  %v6100_v53 = vadd.f32 %v2639_v25, %v6033_v8  ;;  %v2746_v10 = vmul.f32 0.7978846, %v2730_v21  ;;  %v3064_v3 = vmul.f32 %v3048_v44, %v6059_v33 }
 0xdd0   : > { %v2645_v63 = vpop.f32.mrf.mxu1  ;;  %v3010_v30 = vpop.f32.mrf.mxu0  ;;  %v3050_v4 = vmul.f32 0.044715, %v6093_v61  ;;  %v6105_v47 = vadd.f32 %v3004_v20, %v6035_v58  ;;  %4657 = vtanh.f32 %v3109_v36  ;;  %v3111_v31 = vmul.f32 0.7978846, %v3095_v57 }
 0xdd1   : > { %v2700_v1 = vmul.f32 %v2684_v34, %v6068_v7  ;;  %v6109_v50 = vadd.f32 %v2641_v49, %v6037_v54  ;;  %v3065_v19 = vmul.f32 %v3049_v22, %v6071_v5  ;;  %v2701_v16 = vmul.f32 %v2685_v0, %v6076_v40 }
 0xdd2   : > { %v2647_v17 = vpop.f32.mrf.mxu1  ;;  %v3012_v2 = vpop.f32.mrf.mxu0  ;;  %v6114_v42 = vadd.f32 %v3006_v23, %v6039_v6  ;;  %v6117_v45 = vadd.f32 %v2645_v63, %v6033_v8  ;;  %v6120_v51 = vmul.f32 %v2699_v35, %v6054_v14  ;;  %v2686_v48 = vmul.f32 0.044715, %v6100_v53 }
 0xdd3   : > { %v6124_v18 = vadd.f32 %v3010_v30, %v6035_v58  ;;  %v6127_v25 = vadd.f32 %v2647_v17, %v6037_v54  ;;  %4659 = vtanh.f32 %v2746_v10  ;;  %v6130_v20 = vmul.f32 %v3064_v3, %v6059_v33 }
 0xdd4   : > { %6554 = vst [vmem:[#allocation34_spill] sm:$0xff] %v6117_v45  ;;  %v2649_v62 = vpop.f32.mrf.mxu1  ;;  %v3014_v9 = vpop.f32.mrf.mxu0  ;;  %v3066_v27 = vmul.f32 %v3050_v4, %v6093_v61  ;;  %v3051_v32 = vmul.f32 0.044715, %v6105_v47  ;;  %4661 = vtanh.f32 %v3111_v31  ;;  %v6135_v44 = vmul.f32 %v2700_v1, %v6068_v7 }
 0xdd5   : > { %6555 = vst [vmem:[#allocation35_spill] sm:$0xff] %v6124_v18  ;;  %v2687_v49 = vmul.f32 0.044715, %v6109_v50  ;;  %v3052_v23 = vmul.f32 0.044715, %v6114_v42  ;;  %v6140_v36 = vmul.f32 %v3065_v19, %v6071_v5  ;;  %v6143_v57 = vmul.f32 %v2701_v16, %v6076_v40 }
 0xdd6   : > { %v2651_v39 = vpop.f32.mrf.mxu1  ;;  %v3016_v21 = vpop.f32.mrf.mxu0  ;;  %v2688_v34 = vmul.f32 0.044715, %v6117_v45  ;;  %v6147_v22 = vadd.f32 %v3012_v2, %v6039_v6  ;;  %v2702_v30 = vmul.f32 %v2686_v48, %v6100_v53  ;;  %v3053_v35 = vmul.f32 0.044715, %v6124_v18 }
 0xdd7   : > { %v2689_v10 = vmul.f32 0.044715, %v6127_v25  ;;  %v6153_v3 = vadd.f32 %v2649_v62, %v6033_v8  ;;  %v6156_v4 = vmul.f32 %v3066_v27, %v6093_v61  ;;  %v3067_v17 = vmul.f32 %v3051_v32, %v6105_v47 }
 0xdd8   : > { %v2655_v0 = vpop.f32.mrf.mxu1  ;;  %v3020_v63 = vpop.f32.mrf.mxu0  ;;  %v3054_v31 = vmul.f32 0.044715, %v6147_v22  ;;  %v6161_v2 = vadd.f32 %v3014_v9, %v6035_v58  ;;  %v2703_v16 = vmul.f32 %v2687_v49, %v6109_v50  ;;  %v3068_v48 = vmul.f32 %v3052_v23, %v6114_v42 }
 0xdd9   : > { %6556 = vst [vmem:[#allocation36_spill] sm:$0xff] %v6153_v3  ;;  %v2690_v46 = vmul.f32 0.044715, %v6153_v3  ;;  %v6167_v62 = vadd.f32 %v2651_v39, %v6037_v54  ;;  %v2704_v27 = vmul.f32 %v2688_v34, %v6117_v45  ;;  %v6172_v28 = vadd.f32 %v3016_v21, %v6039_v6 }
 0xdda   : > { %6557 = vst [vmem:[#allocation37_spill] sm:$0xff] %v6161_v2  ;;  %v2657_v1 = vpop.f32.mrf.mxu1  ;;  %v3022_v19 = vpop.f32.mrf.mxu0  ;;  %v3055_v32 = vmul.f32 0.044715, %v6161_v2  ;;  %v6175_v9 = vadd.f32 %v2655_v0, %v6033_v8  ;;  %v6178_v49 = vmul.f32 %v2702_v30, %v6100_v53  ;;  %v3069_v23 = vmul.f32 %v3053_v35, %v6124_v18 }
 0xddb   : > { %v2705_v56 = vmul.f32 %v2689_v10, %v6127_v25  ;;  %v3070_v39 = vmul.f32 %v3054_v31, %v6147_v22  ;;  %v6183_v34 = vpop.eup %4655  ;;  %v6186_v43 = vmul.f32 %v3067_v17, %v6105_v47  ;;  %v2691_v21 = vmul.f32 0.044715, %v6167_v62 }
 0xddc   : > { %v2659_v29 = vpop.f32.mrf.mxu1  ;;  %v3024_v26 = vpop.f32.mrf.mxu0  ;;  %v6190_v0 = vadd.f32 %v3020_v63, %v6035_v58  ;;  %v6193_v30 = vadd.f32 %v2657_v1, %v6037_v54  ;;  %v6196_v35 = vmul.f32 %v2703_v16, %v6109_v50  ;;  %v2706_v10 = vmul.f32 %v2690_v46, %v6153_v3 }
 0xddd   : > { %v3056_v31 = vmul.f32 0.044715, %v6172_v28  ;;  %v2692_v13 = vmul.f32 0.044715, %v6175_v9  ;;  %v4658_v12 = vpop.eup %4657  ;;  %v3084_v17 = vmul.f32 %v3068_v48, %v6114_v42  ;;  %v6203_v15 = vmul.f32 %v2704_v27, %v6117_v45 }
 0xdde   : > { %v3071_v63 = vmul.f32 %v3055_v32, %v6161_v2  ;;  %v6207_v1 = vadd.f32 %v3022_v19, %v6039_v6  ;;  %v2661_v41 = vpop.f32.mrf.mxu1  ;;  %v6210_v16 = vmul.f32 %v3069_v23, %v6124_v18  ;;  %v6213_v46 = vmul.f32 %v2705_v56, %v6127_v25  ;;  %v3026_v27 = vpop.f32.mrf.mxu0 }
 0xddf   : > { %6558 = vst [vmem:[#allocation38_spill] sm:$0xff] %v6203_v15  ;;  %v6216_v24 = vmul.f32 %v3070_v39, %v6147_v22  ;;  %v6219_v48 = vadd.f32 %v2659_v29, %v6033_v8  ;;  %v2707_v15 = vmul.f32 %v2691_v21, %v6167_v62  ;;  %v3057_v32 = vmul.f32 0.044715, %v6190_v0 }
 0xde0   : > { %6559 = vst [vmem:[#allocation39_spill] sm:$0xff] %v6210_v16  ;;  %v2693_v19 = vmul.f32 0.044715, %v6193_v30  ;;  %v6225_v45 = vadd.f32 %v3024_v26, %v6035_v58  ;;  %v4660_v23 = vpop.eup %4659  ;;  %v6228_v56 = vmul.f32 %v2706_v10, %v6153_v3  ;;  %v3072_v39 = vmul.f32 %v3056_v31, %v6172_v28 }
 0xde1   : > { %v2708_v16 = vmul.f32 %v2692_v13, %v6175_v9  ;;  %v6233_v29 = vadd.f32 %v2661_v41, %v6037_v54  ;;  %v4662_v8 = vpop.eup %4661  ;;  %v6236_v21 = vmul.f32 %v3071_v63, %v6161_v2  ;;  %v3058_v18 = vmul.f32 0.044715, %v6207_v1 }
 0xde2   : > { %6560 = vst [vmem:[#allocation40_spill] sm:$0xff] %v6228_v56  ;;  %v2694_v26 = vmul.f32 0.044715, %v6219_v48  ;;  %v6241_v58 = vadd.f32 %v3026_v27, %v6039_v6  ;;  %v3059_v10 = vmul.f32 0.044715, %v6225_v45  ;;  %v3094_v13 = vadd.f32 %v6096_v60, %v6047_v55 }
 0xde3   : > { %6561 = vst [vmem:[#allocation41_spill] sm:$0xff] %v6236_v21  ;;  %v2695_v31 = vmul.f32 0.044715, %v6233_v29  ;;  %v3096_v54 = vadd.f32 %v6130_v20, %v6059_v33  ;;  %v6250_v41 = vmul.f32 %v2707_v15, %v6167_v62  ;;  %v3073_v63 = vmul.f32 %v3057_v32, %v6190_v0 }
 0xde4   : > { %v2709_v56 = vmul.f32 %v2693_v19, %v6193_v30  ;;  %v3060_v6 = vmul.f32 0.044715, %v6241_v58  ;;  %v3088_v27 = vmul.f32 %v3072_v39, %v6172_v28  ;;  %v6257_v3 = vmul.f32 %v2708_v16, %v6175_v9 }
 0xde5   : > { %v3110_v21 = vmul.f32 0.7978846, %v3094_v13  ;;  %v3112_v2 = vmul.f32 0.7978846, %v3096_v54  ;;  %v3074_v55 = vmul.f32 %v3058_v18, %v6207_v1  ;;  %v2710_v60 = vmul.f32 %v2694_v26, %v6219_v48 }
 0xde6   : > { %v2729_v15 = vadd.f32 %v6088_v37, %v6044_v59  ;;  %v2731_v20 = vadd.f32 %v6120_v51, %v6054_v14  ;;  %v3075_v32 = vmul.f32 %v3059_v10, %v6225_v45  ;;  %v2711_v19 = vmul.f32 %v2695_v31, %v6233_v29 }
 0xde7   : > { %v3076_v39 = vmul.f32 %v3060_v6, %v6241_v58  ;;  %4663 = vtanh.f32 %v3110_v21  ;;  %v3141_v54 = vadd.f32 1.0, %v4658_v12  ;;  %v6269_v18 = vmul.f32 %v3073_v63, %v6190_v0 }
 0xde8   : > { %4665 = vtanh.f32 %v3112_v2  ;;  %v2745_v16 = vmul.f32 0.7978846, %v2729_v15  ;;  %v2747_v13 = vmul.f32 0.7978846, %v2731_v20  ;;  %v6272_v26 = vmul.f32 %v2709_v56, %v6193_v30 }
 0xde9   : > { %v3032_v59 = vmul.f32 0.5, %v6059_v33  ;;  %v3143_v37 = vadd.f32 1.0, %v4662_v8  ;;  %v6276_v51 = vmul.f32 %v3074_v55, %v6207_v1  ;;  %v6279_v10 = vmul.f32 0.5, %v6054_v14 }
 0xdea   : > { %4667 = vtanh.f32 %v2745_v16  ;;  %v3098_v2 = vadd.f32 %v6156_v4, %v6093_v61  ;;  %v6284_v12 = vmul.f32 %v2710_v60, %v6219_v48  ;;  %v6287_v21 = vmul.f32 %v3075_v32, %v6225_v45 }
 0xdeb   : > { %v6290_v56 = vmul.f32 %v2711_v19, %v6233_v29  ;;  %4669 = vtanh.f32 %v2747_v13  ;;  %v6293_v33 = vmul.f32 %v3076_v39, %v6241_v58  ;;  %v6296_v14 = vmul.f32 %v3141_v54, %v6061_v38  ;;  %v6562_v39 = vld [vmem:[#allocation32_spill] sm:$0xff] }
 0xdec   : > { %v3100_v8 = vadd.f32 %v3084_v17, %v6114_v42  ;;  %v3114_v31 = vmul.f32 0.7978846, %v3098_v2  ;;  %v6300_v4 = vmul.f32 %v3143_v37, %v6084_v52  ;;  %v2776_v63 = vadd.f32 1.0, %v6183_v34 }
 0xded   : > { %v2733_v6 = vadd.f32 %v6143_v57, %v6076_v40  ;;  %v2735_v55 = vadd.f32 %v6196_v35, %v6109_v50  ;;  %v2778_v60 = vadd.f32 1.0, %v4660_v23  ;;  %v3097_v38 = vadd.f32 %v6140_v36, %v6071_v5 }
 0xdee   : > { %v3116_v15 = vmul.f32 0.7978846, %v3100_v8  ;;  %4671 = vtanh.f32 %v3114_v31  ;;  %v6310_v17 = vmul.f32 0.5, %v6093_v61  ;;  %v3099_v34 = vadd.f32 %v6186_v43, %v6105_v47 }
 0xdef   : > { %v2749_v20 = vmul.f32 0.7978846, %v2733_v6  ;;  %v2751_v52 = vmul.f32 0.7978846, %v2735_v55  ;;  %v6315_v32 = vmul.f32 0.5, %v6114_v42  ;;  %v2732_v35 = vadd.f32 %v6135_v44, %v6068_v7 }
 0xdf0   : > { %4673 = vtanh.f32 %v3116_v15  ;;  %v3113_v57 = vmul.f32 0.7978846, %v3097_v38  ;;  %v3173_v23 = vpack.c.bf16 %v6300_v4, %v6296_v14  ;;  %v3115_v36 = vmul.f32 0.7978846, %v3099_v34 }
 0xdf1   : > { %4675 = vtanh.f32 %v2749_v20  ;;  %v2734_v61 = vadd.f32 %v6178_v49, %v6100_v53  ;;  %v6324_v19 = vmul.f32 %v2776_v63, %v6056_v11  ;;  %v2748_v43 = vmul.f32 0.7978846, %v2732_v35  ;;  %v6564_v20 = vld [vmem:[#allocation35_spill] sm:$0xff]  ;;  %v6567_v35 = vld [vmem:[#allocation41_spill] sm:$0xff] }
 0xdf2   : > { %4677 = vtanh.f32 %v2751_v52  ;;  %v3102_v42 = vadd.f32 %v6216_v24, %v6147_v22  ;;  %v6329_v16 = vmul.f32 %v2778_v60, %v6562_v39  ;;  %v3104_v13 = vadd.f32 %v3088_v27, %v6172_v28  ;;  %v6565_v52 = vld [vmem:[#allocation39_spill] sm:$0xff]  ;;  %v6568_v39 = vld [vmem:[#allocation33_spill] sm:$0xff] }
 0xdf3   : > { %4679 = vtanh.f32 %v3113_v57  ;;  %v2750_v44 = vmul.f32 0.7978846, %v2734_v61  ;;  %v6333_v37 = vmul.f32 0.5, %v6076_v40  ;;  %v2737_v11 = vadd.f32 %v6213_v46, %v6127_v25  ;;  %v6563_v40 = vld [vmem:[#allocation31_spill] sm:$0xff]  ;;  %v6566_v57 = vld [vmem:[#allocation37_spill] sm:$0xff] }
 0xdf4   : > { %v4664_v54 = vpop.eup %4663  ;;  %4681 = vtanh.f32 %v3115_v36  ;;  %v3118_v49 = vmul.f32 0.7978846, %v3102_v42  ;;  %v3120_v24 = vmul.f32 0.7978846, %v3104_v13  ;;  %v2739_v8 = vadd.f32 %v6250_v41, %v6167_v62  ;;  %v6569_v13 = vld [vmem:[#allocation34_spill] sm:$0xff] }
 0xdf5   : > { %v4666_v2 = vpop.eup %4665  ;;  %v3142_v14 = vadd.f32 1.0, %v4664_v54  ;;  %4683 = vtanh.f32 %v2748_v43  ;;  %v2671_v4 = vmul.f32 0.5, %v6109_v50  ;;  %v2753_v27 = vmul.f32 0.7978846, %v2737_v11  ;;  %v6570_v54 = vld [vmem:[#allocation38_spill] sm:$0xff] }
 0xdf6   : > { %v3144_v31 = vadd.f32 1.0, %v4666_v2  ;;  %4685 = vtanh.f32 %v2750_v44  ;;  %v2808_v55 = vpack.c.bf16 %v6329_v16, %v6324_v19  ;;  %v2755_v46 = vmul.f32 0.7978846, %v2739_v8  ;;  %v6571_v2 = vld [vmem:[#allocation36_spill] sm:$0xff] }
 0xdf7   : > { %v4668_v63 = vpop.eup %4667  ;;  %v3158_v6 = vmul.f32 %v3142_v14, %v6563_v40  ;;  %4687 = vtanh.f32 %v3118_v49  ;;  %v3101_v41 = vadd.f32 %v6565_v52, %v6564_v20  ;;  %v3033_v50 = vmul.f32 0.5, %v6071_v5  ;;  %v6572_v14 = vld [vmem:[#allocation40_spill] sm:$0xff] }
 0xdf8   : > { %v4670_v60 = vpop.eup %4669  ;;  %v3160_v15 = vmul.f32 %v3144_v31, %v3032_v59  ;;  %v2777_v38 = vadd.f32 1.0, %v4668_v63  ;;  %4689 = vtanh.f32 %v3120_v24  ;;  %v3103_v36 = vadd.f32 %v6567_v35, %v6566_v57 }
 0xdf9   : > { %v2779_v34 = vadd.f32 1.0, %v4670_v60  ;;  %4691 = vtanh.f32 %v2753_v27  ;;  %v3035_v43 = vmul.f32 0.5, %v6105_v47  ;;  %v3117_v19 = vmul.f32 0.7978846, %v3101_v41 }
 0xdfa   : > { %v3174_v61 = vpack.c.bf16 %v3160_v15, %v3158_v6  ;;  %4693 = vtanh.f32 %v2755_v46  ;;  %v2793_v59 = vmul.f32 %v2777_v38, %v6568_v39  ;;  %v3119_v44 = vmul.f32 0.7978846, %v3103_v36 }
 0xdfb   : > { %v4672_v42 = vpop.eup %4671  ;;  %v2795_v16 = vmul.f32 %v2779_v34, %v6279_v10  ;;  %v2736_v49 = vadd.f32 %v6570_v54, %v6569_v13  ;;  %v2668_v11 = vmul.f32 0.5, %v6068_v7  ;;  %4695 = vtanh.f32 %v3117_v19 }
 0xdfc   : > { %3341 = vmatprep.mubr.bf16.mxu1 %v3174_v61  ;;  %v3146_v5 = vadd.f32 1.0, %v4672_v42  ;;  %v2738_v24 = vadd.f32 %v6572_v14, %v6571_v2  ;;  %v2670_v31 = vmul.f32 0.5, %v6100_v53  ;;  %4697 = vtanh.f32 %v3119_v44 }
 0xdfd   : > { %v4674_v47 = vpop.eup %4673  ;;  %v2809_v8 = vpack.c.bf16 %v2795_v16, %v2793_v59  ;;  %3342 = vmatmul.mubr.bf16.vlgmr.msra.gmra.mxu1 %v3173_v23  ;;  %v2752_v27 = vmul.f32 0.7978846, %v2736_v49  ;;  %v3038_v40 = vmul.f32 0.5, %v6147_v22  ;;  %v3106_v46 = vadd.f32 %v6276_v51, %v6207_v1 }
 0xdfe   : > { %v4676_v10 = vpop.eup %4675  ;;  %v3148_v63 = vadd.f32 1.0, %v4674_v47  ;;  %v2754_v6 = vmul.f32 0.7978846, %v2738_v24  ;;  %v3162_v60 = vmul.f32 %v3146_v5, %v6310_v17  ;;  %v3108_v23 = vadd.f32 %v6293_v33, %v6241_v58 }
 0xdff   : > { %v4678_v7 = vpop.eup %4677  ;;  %3502 = vmatprep.mubr.bf16.mxu0 %v2809_v8  ;;  %v2781_v15 = vadd.f32 1.0, %v4676_v10  ;;  %4699 = vtanh.f32 %v2752_v27  ;;  %v3122_v22 = vmul.f32 0.7978846, %v3106_v46  ;;  %v3040_v35 = vmul.f32 0.5, %v6172_v28 }
 0xe00   : > { %v4680_v53 = vpop.eup %4679  ;;  %3503 = vmatmul.mubr.bf16.vlgmr.msra.gmra.mxu0 %v2808_v55  ;;  %v3164_v38 = vmul.f32 %v3148_v63, %v6315_v32  ;;  %v2783_v52 = vadd.f32 1.0, %v4678_v7  ;;  %4701 = vtanh.f32 %v2754_v6  ;;  %v3124_v36 = vmul.f32 0.7978846, %v3108_v23 }
 0xe01   : > { %v4682_v41 = vpop.eup %4681  ;;  %v2797_v34 = vmul.f32 %v2781_v15, %v6333_v37  ;;  %v3145_v51 = vadd.f32 1.0, %v4680_v53  ;;  %4703 = vtanh.f32 %v3122_v22  ;;  %v2741_v32 = vadd.f32 %v6272_v26, %v6193_v30 }
 0xe02   : > { %v4684_v17 = vpop.eup %4683  ;;  %v3176_v61 = vpack.c.bf16 %v3164_v38, %v3162_v60  ;;  %v2799_v19 = vmul.f32 %v2783_v52, %v2671_v4  ;;  %v3147_v42 = vadd.f32 1.0, %v4682_v41  ;;  %4705 = vtanh.f32 %v3124_v36 }
 0xe03   : > { %v4686_v33 = vpop.eup %4685  ;;  %v3161_v39 = vmul.f32 %v3145_v51, %v3033_v50  ;;  %v2780_v55 = vadd.f32 1.0, %v4684_v17  ;;  %v2743_v28 = vadd.f32 %v6290_v56, %v6233_v29  ;;  %v2673_v5 = vmul.f32 0.5, %v6127_v25 }
 0xe04   : > { %v4688_v59 = vpop.eup %4687  ;;  %3349 = vmatprep.mubr.bf16.mxu1 %v3176_v61  ;;  %v2811_v16 = vpack.c.bf16 %v2799_v19, %v2797_v34  ;;  %v3163_v37 = vmul.f32 %v3147_v42, %v3035_v43  ;;  %v2782_v44 = vadd.f32 1.0, %v4686_v33  ;;  %v2757_v14 = vmul.f32 0.7978846, %v2741_v32 }
 0xe05   : > { %v4690_v54 = vpop.eup %4689  ;;  %v2796_v49 = vmul.f32 %v2780_v55, %v2668_v11  ;;  %v3150_v4 = vadd.f32 1.0, %v4688_v59  ;;  %v2759_v26 = vmul.f32 0.7978846, %v2743_v28  ;;  %v2675_v43 = vmul.f32 0.5, %v6167_v62 }
 0xe06   : > { %v4692_v50 = vpop.eup %4691  ;;  %3510 = vmatprep.mubr.bf16.mxu0 %v2811_v16  ;;  %v3175_v24 = vpack.c.bf16 %v3163_v37, %v3161_v39  ;;  %v2798_v47 = vmul.f32 %v2782_v44, %v2670_v31  ;;  %v3152_v8 = vadd.f32 1.0, %v4690_v54  ;;  %4707 = vtanh.f32 %v2757_v14 }
 0xe07   : > { %v4694_v27 = vpop.eup %4693  ;;  %v3166_v10 = vmul.f32 %v3150_v4, %v3038_v40  ;;  %v2785_v63 = vadd.f32 1.0, %v4692_v50  ;;  %4709 = vtanh.f32 %v2759_v26  ;;  %v3037_v25 = vmul.f32 0.5, %v6564_v20 }
 0xe08   : > { %3350 = vmatmul.mubr.bf16.gmra.mxu1 %v3175_v24  ;;  %v2810_v56 = vpack.c.bf16 %v2798_v47, %v2796_v49  ;;  %v3168_v6 = vmul.f32 %v3152_v8, %v3040_v35  ;;  %v2787_v11 = vadd.f32 1.0, %v4694_v27  ;;  %v4696_v46 = vpop.eup %4695  ;;  %v3039_v7 = vmul.f32 0.5, %v6566_v57 }
 0xe09   : > { %v3105_v31 = vadd.f32 %v6269_v18, %v6190_v0  ;;  %v3107_v40 = vadd.f32 %v6287_v21, %v6225_v45  ;;  %v4698_v60 = vpop.eup %4697  ;;  %v2801_v15 = vmul.f32 %v2785_v63, %v2673_v5  ;;  %v3149_v53 = vadd.f32 1.0, %v4696_v46 }
 0xe0a   : > { %3511 = vmatmul.mubr.bf16.gmra.mxu0 %v2810_v56  ;;  %v3178_v62 = vpack.c.bf16 %v3168_v6, %v3166_v10  ;;  %v2803_v23 = vmul.f32 %v2787_v11, %v2675_v43  ;;  %v3151_v38 = vadd.f32 1.0, %v4698_v60  ;;  %v2740_v20 = vadd.f32 %v6257_v3, %v6175_v9 }
 0xe0b   : > { %v3121_v52 = vmul.f32 0.7978846, %v3105_v31  ;;  %v3123_v22 = vmul.f32 0.7978846, %v3107_v40  ;;  %v3165_v34 = vmul.f32 %v3149_v53, %v3037_v25  ;;  %v2672_v18 = vmul.f32 0.5, %v6569_v13 }
 0xe0c   : > { %v4700_v41 = vpop.eup %4699  ;;  %3357 = vmatprep.mubr.bf16.mxu1 %v3178_v62  ;;  %v2813_v57 = vpack.c.bf16 %v2803_v23, %v2801_v15  ;;  %v2742_v21 = vadd.f32 %v6284_v12, %v6219_v48  ;;  %v3167_v35 = vmul.f32 %v3151_v38, %v3039_v7  ;;  %v2756_v17 = vmul.f32 0.7978846, %v2740_v20 }
 0xe0d   : > { %v4702_v51 = vpop.eup %4701  ;;  %v2784_v36 = vadd.f32 1.0, %v4700_v41  ;;  %4711 = vtanh.f32 %v3121_v52  ;;  %v2674_v61 = vmul.f32 0.5, %v6571_v2  ;;  %v3042_v12 = vmul.f32 0.5, %v6207_v1  ;;  %v6392_v52 = vld [vmem:[#allocation14] ss:$0 sm:$0xff] }
 0xe0e   : > { %3518 = vmatprep.mubr.bf16.mxu0 %v2813_v57  ;;  %v2786_v19 = vadd.f32 1.0, %v4702_v51  ;;  %4713 = vtanh.f32 %v3123_v22  ;;  %v2758_v3 = vmul.f32 0.7978846, %v2742_v21  ;;  %v4704_v42 = vpop.eup %4703  ;;  %v3177_v33 = vpack.c.bf16 %v3167_v35, %v3165_v34  ;;  %v6573_v21 = vld [vmem:[#allocation23_spill] sm:$0xff] }
 0xe0f   : > { %4715 = vtanh.f32 %v2756_v17  ;;  %v4706_v39 = vpop.eup %4705  ;;  %v2800_v55 = vmul.f32 %v2784_v36, %v2672_v18  ;;  %v3154_v32 = vadd.f32 1.0, %v4704_v42  ;;  %v3044_v59 = vmul.f32 0.5, %v6241_v58 }
 0xe10   : > { %v2802_v13 = vmul.f32 %v2786_v19, %v2674_v61  ;;  %4717 = vtanh.f32 %v2758_v3  ;;  %3358 = vmatmul.mubr.bf16.gmra.mxu1 %v3177_v33  ;;  %v3156_v16 = vadd.f32 1.0, %v4706_v39  ;;  %v2677_v5 = vmul.f32 0.5, %v6193_v30  ;;  %v6574_v33 = vld [vmem:[#allocation25_spill] sm:$0xff] }
 0xe11   : > { %v3170_v44 = vmul.f32 %v3154_v32, %v3042_v12  ;;  %v2679_v14 = vmul.f32 0.5, %v6233_v29  ;;  %v3041_v10 = vmul.f32 0.5, %v6190_v0  ;;  %v3043_v43 = vmul.f32 0.5, %v6225_v45 }
 0xe12   : > { %v2812_v37 = vpack.c.bf16 %v2802_v13, %v2800_v55  ;;  %v3172_v2 = vmul.f32 %v3156_v16, %v3044_v59  ;;  %v2676_v30 = vmul.f32 0.5, %v6175_v9  ;;  %v2678_v46 = vmul.f32 0.5, %v6219_v48 }
 0xe13   : > { %v4708_v28 = vpop.eup %4707 }
 0xe14   : > { %3519 = vmatmul.mubr.bf16.gmra.mxu0 %v2812_v37  ;;  %v4710_v54 = vpop.eup %4709  ;;  %v3180_v49 = vpack.c.bf16 %v3172_v2, %v3170_v44  ;;  %v2789_v4 = vadd.f32 1.0, %v4708_v28  ;;  %v6575_v28 = vld [vmem:[#allocation24_spill] sm:$0xff] }
 0xe15   : > { %v2791_v50 = vadd.f32 1.0, %v4710_v54 }
 0xe16   : > { %3365 = vmatprep.mubr.bf16.mxu1 %v3180_v49  ;;  %v2805_v24 = vmul.f32 %v2789_v4, %v2677_v5 }
 0xe17   : > { %v2807_v47 = vmul.f32 %v2791_v50, %v2679_v14 }
 0xe19   : > { %v2815_v8 = vpack.c.bf16 %v2807_v47, %v2805_v24 }
 0xe1a   : > { %v4712_v1 = vpop.eup %4711 }
 0xe1b   : > { %v4714_v58 = vpop.eup %4713  ;;  %v3153_v26 = vadd.f32 1.0, %v4712_v1  ;;  %3526 = vmatprep.mubr.bf16.mxu0 %v2815_v8  ;;  %v6576_v1 = vld [vmem:[#allocation26_spill] sm:$0xff] }
 0xe1c   : > { %v4716_v27 = vpop.eup %4715  ;;  %v3155_v63 = vadd.f32 1.0, %v4714_v58 }
 0xe1d   : > { %v4718_v56 = vpop.eup %4717  ;;  %v2788_v6 = vadd.f32 1.0, %v4716_v27  ;;  %v3169_v29 = vmul.f32 %v3153_v26, %v3041_v10 }
 0xe1e   : > { %v3171_v11 = vmul.f32 %v3155_v63, %v3043_v43  ;;  %v2790_v25 = vadd.f32 1.0, %v4718_v56 }
 0xe1f   : > { %v2804_v31 = vmul.f32 %v2788_v6, %v2676_v30  ;;  %v6577_v6 = vld [vmem:[#allocation27_spill] sm:$0xff] }
 0xe20   : > { %v3179_v7 = vpack.c.bf16 %v3171_v11, %v3169_v29  ;;  %v2806_v40 = vmul.f32 %v2790_v25, %v2678_v46  ;;  %v6578_v25 = vld [vmem:[#allocation29_spill] sm:$0xff] }
 0xe22   : > { %3366 = vmatmul.mubr.bf16.gmra.mxu1 %v3179_v7  ;;  %v2814_v60 = vpack.c.bf16 %v2806_v40, %v2804_v31 }
 0xe24   : > { %3527 = vmatmul.mubr.bf16.gmra.mxu0 %v2814_v60 }
 0xebd   : > { %v3988_v62 = vpop.f32.mrf.mxu1 }
 0xebf   : > { %v3989_v0 = vpop.f32.mrf.mxu1 }
 0xec0   : > { %v4028_v15 = vpop.f32.mrf.mxu0  ;;  %v3990_v45 = vadd.f32 %v3989_v0, %v3988_v62 }
 0xec1   : > { %v3991_v23 = vpop.f32.mrf.mxu1 }
 0xec2   : > { %v4029_v53 = vpop.f32.mrf.mxu0 }
 0xec3   : > { %v4030_v9 = vadd.f32 %v4029_v53, %v4028_v15  ;;  %v3992_v38 = vpop.f32.mrf.mxu1 }
 0xec4   : > { %v4031_v22 = vpop.f32.mrf.mxu0  ;;  %v3993_v20 = vadd.f32 %v3992_v38, %v3991_v23 }
 0xec5   : > { %v3505_v48 = vadd.f32 %v4030_v9, %v3990_v45 }
 0xec6   : > { %v4032_v41 = vpop.f32.mrf.mxu0 }
 0xec7   : > { %v3542_v57 = vadd.f32 %v6392_v52, %v3505_v48  ;;  %v4033_v34 = vadd.f32 %v4032_v41, %v4031_v22  ;;  %v6579_v41 = vld [vmem:[#allocation28_spill] sm:$0xff] }
 0xec8   : > { %v3994_v18 = vpop.f32.mrf.mxu1 }
 0xec9   : > { %v3550_v51 = vadd.f32 %v3542_v57, %v6573_v21  ;;  %v3508_v35 = vadd.f32 %v4033_v34, %v3993_v20  ;;  %v6580_v21 = vld [vmem:[#allocation30_spill] sm:$0xff] }
 0xeca   : > { %v4034_v36 = vpop.f32.mrf.mxu0  ;;  %v3995_v17 = vpop.f32.mrf.mxu1 }
 0xecb   : > { %3558 = vst [vmem:[%s6398_s3] sm:$0xff] %v3550_v51  ;;  %v3543_v61 = vadd.f32 %v6392_v52, %v3508_v35  ;;  %v3996_v19 = vadd.f32 %v3995_v17, %v3994_v18 }
 0xecc   : > { %v4035_v3 = vpop.f32.mrf.mxu0  ;;  %v3997_v42 = vpop.f32.mrf.mxu1 }
 0xecd   : > { %v3551_v39 = vadd.f32 %v3543_v61, %v6574_v33  ;;  %v4036_v55 = vadd.f32 %v4035_v3, %v4034_v36 }
 0xece   : > { %v4037_v13 = vpop.f32.mrf.mxu0  ;;  %v3998_v32 = vpop.f32.mrf.mxu1 }
 0xecf   : > { %3559 = vst [vmem:[%s6398_s3 + $0x8] sm:$0xff] %v3551_v39  ;;  %v3513_v12 = vadd.f32 %v4036_v55, %v3996_v19  ;;  %v3999_v59 = vadd.f32 %v3998_v32, %v3997_v42 }
 0xed0   : > { %v4038_v16 = vpop.f32.mrf.mxu0  ;;  %v4000_v2 = vpop.f32.mrf.mxu1 }
 0xed1   : > { %v3544_v37 = vadd.f32 %v6392_v52, %v3513_v12  ;;  %v4039_v44 = vadd.f32 %v4038_v16, %v4037_v13 }
 0xed2   : > { %v4001_v4 = vpop.f32.mrf.mxu1 }
 0xed3   : > { %v3552_v54 = vadd.f32 %v3544_v37, %v6575_v28  ;;  %v3516_v49 = vadd.f32 %v4039_v44, %v3999_v59  ;;  %v4002_v50 = vadd.f32 %v4001_v4, %v4000_v2 }
 0xed4   : > { %v4040_v5 = vpop.f32.mrf.mxu0  ;;  %v4003_v24 = vpop.f32.mrf.mxu1 }
 0xed5   : > { %3560 = vst [vmem:[%s6398_s3 + $0x10] sm:$0xff] %v3552_v54  ;;  %v3545_v14 = vadd.f32 %v6392_v52, %v3516_v49 }
 0xed6   : > { %v4041_v47 = vpop.f32.mrf.mxu0  ;;  %v4004_v26 = vpop.f32.mrf.mxu1 }
 0xed7   : > { %v3553_v8 = vadd.f32 %v3545_v14, %v6576_v1  ;;  %v4042_v58 = vadd.f32 %v4041_v47, %v4040_v5  ;;  %v4005_v43 = vadd.f32 %v4004_v26, %v4003_v24 }
 0xed8   : > { %v4043_v27 = vpop.f32.mrf.mxu0 }
 0xed9   : > { %3561 = vst [vmem:[%s6398_s3 + $0x18] sm:$0xff] %v3553_v8  ;;  %v3521_v10 = vadd.f32 %v4042_v58, %v4002_v50 }
 0xeda   : > { %v4044_v63 = vpop.f32.mrf.mxu0 }
 0xedb   : > { %v3546_v56 = vadd.f32 %v6392_v52, %v3521_v10  ;;  %v4045_v30 = vadd.f32 %v4044_v63, %v4043_v27 }
 0xedd   : > { %v3554_v29 = vadd.f32 %v3546_v56, %v6577_v6  ;;  %v3524_v11 = vadd.f32 %v4045_v30, %v4005_v43 }
 0xedf   : > { %3562 = vst [vmem:[%s6398_s3 + $0x20] sm:$0xff] %v3554_v29  ;;  %v3547_v46 = vadd.f32 %v6392_v52, %v3524_v11 }
 0xee1   : > { %v3555_v7 = vadd.f32 %v3547_v46, %v6578_v25 }
 0xee2   : > { %v4006_v31 = vpop.f32.mrf.mxu1 }
 0xee3   : > { %3563 = vst [vmem:[%s6398_s3 + $0x28] sm:$0xff] %v3555_v7 }
 0xee4   : > { %v4046_v40 = vpop.f32.mrf.mxu0  ;;  %v4007_v60 = vpop.f32.mrf.mxu1 }
 0xee5   : > { %v4008_v62 = vadd.f32 %v4007_v60, %v4006_v31 }
 0xee6   : > { %v4047_v0 = vpop.f32.mrf.mxu0  ;;  %v4009_v15 = vpop.f32.mrf.mxu1 }
 0xee7   : > { %v4048_v45 = vadd.f32 %v4047_v0, %v4046_v40 }
 0xee8   : > { %v4049_v23 = vpop.f32.mrf.mxu0  ;;  %v4010_v53 = vpop.f32.mrf.mxu1 }
 0xee9   : > { %v3529_v9 = vadd.f32 %v4048_v45, %v4008_v62  ;;  %v4011_v38 = vadd.f32 %v4010_v53, %v4009_v15 }
 0xeea   : > { %v4050_v22 = vpop.f32.mrf.mxu0 }
 0xeeb   : > { %v3548_v48 = vadd.f32 %v6392_v52, %v3529_v9  ;;  %v4051_v20 = vadd.f32 %v4050_v22, %v4049_v23 }
 0xeed   : > { %v3556_v57 = vadd.f32 %v3548_v48, %v6579_v41  ;;  %v3532_v34 = vadd.f32 %v4051_v20, %v4011_v38 }
 0xeef   : > { %3564 = vst [vmem:[%s6398_s3 + $0x30] sm:$0xff] %v3556_v57  ;;  %v3549_v18 = vadd.f32 %v6392_v52, %v3532_v34 }
 0xef1   : > { %v3557_v51 = vadd.f32 %v3549_v18, %v6580_v21 }
 0xef3   : > { %3565 = vst [vmem:[%s6398_s3 + $0x38] sm:$0xff] %v3557_v51 }
 0xef4   : > { %4950 = shalt.err (!%p4947_p3)
}
 0xef5   : > { %s4951_s7 = scalar_lea.hbm %s6425_s30, 1024  ;;  %s4955_s18 = scalar_lea.hbm %s6484_s12, 2048 }
 0xef6   : > { %p4952_p4 = scmp.ne.s32.totalorder %s6425_s30, %s4951_s7  ;;  %p4956_p9 = scmp.lt.s32.totalorder %s6425_s30, %s6484_s12 }
 0xef7   : > { %p4957_p11 = scmp.lt.s32.totalorder %s4955_s18, %s4951_s7 }
 0xef8   : > { %p4953_p5 = pnand %p4952_p4, %p6581_p1 }
 0xef9   : > { %p4958_p10 = por %p4957_p11, %p4956_p9 }
 0xefa   : > { %p4954_p8 = pneg %p4953_p5 }
 0xefc   : > { %p4959_p13 = pnand %p4958_p10, %p4954_p8 }
 0xefe   : > { %4962 = shalt.err (!%p4959_p13)
}
 0xeff   : > { %s5040_s28 = smov 128   ;;  %s5041_s15 = smov 8  }
 0xf00   : > { %4274 = dma.vmem_to_hbm [thread:$0]  (%p6581_p1), %s6427_s4, 1024, %s6425_s30, %s3567_s16, %s5040_s28, %s5040_s28, %s5041_s15  }
 0xf01 PF: > { %s3595_s2 = sand.u32 1, %s5005_s21   ;;  %p6582_p0 = scmp.ne.s32.totalorder %s6529_s26, 0 }
 0xf02   : > { %p6583_p2 = scmp.ge.s32.totalorder %s5017_s24, 2  ;;  %s3596_s27 = scalar_lea.sflag [#allocation4], %s3595_s2 }
 0xf04   : > { %p4303_p7 = pnand %p6583_p2, %p6582_p0 }
 0xf06   : > { %p4304_p12 = pneg %p4303_p7 }
 0xf08   : > { %5000 = dma.done.wait (%p4304_p12), %s3596_s27, 1024  }
 0xf09   : > { %5002 = vsyncadd (%p4304_p12), %s3596_s27, 4294966272  ;;  %p29_p6 = scmp.ge.s32.totalorder %s5223_s13, 4   ;;  %s6584_s21 = smov %s5009_s22 }
 0xf0a   : > { %s6585_s22 = smov %s5013_s23  ;;  %s6586_s23 = smov %s5235_s25 }
 0xf0b   : > { %s6587_s24 = smov %s5223_s13  ;;  %31 = sbr.rel (!%p29_p6) target bundleno = 16 (0x10), region = 141 }
 0xf10   :  { %3601 = vsyncpa [#allocation3], 1 }
 0xf11   :  { %3603 = vsyncpa [#allocation3 + $0x1], 1 }
 0xf12   :  { %3604 = vsyncpa [#allocation6], 1 }
 0xf13   :  { %3605 = vsyncpa [#allocation9], 1 }
 0xf14   :  { %3606 = vsyncpa [#allocation12], 1 }
 0xf15   :  { %3607 = vsyncpa [#allocation15], 1 }
 0xf16   :  { %3608 = vsyncpa [#allocation4], 1 }
 0xf17   :  { %3610 = vsyncpa [#allocation4 + $0x1], 1 }

</bundles_post_ra>
